<compile_context>
chip_gen: v7x
topology: tpu7x:2x2x1
jax: 0.10.0
libtpu: 0.0.40
codegen_flags: <defaults>
</compile_context>

<pallas_src>
import numpy as np
import jax
import jax.numpy as jnp
from jax.experimental import pallas as pl
from jax.experimental.pallas import tpu as pltpu

H = W = 28                    # spatial size implied by fc1 = Linear(16*28*28, 10)
KH = KW = 3                   # conv kernel
C_IN = 3                      # input channels
C_OUT = 16                    # conv output channels
NUM_CLASSES = 10

WPAD = 32                     # padded output width  (cols 28..31 are junk)
HPAD = 32                     # per-image row stripe (row 0 halo, 1..28 image, 29..31 halo/junk)
PAD_W = 34                    # padded input width incl. halo (x+kw <= 33)
K_CONV = PAD_W * C_IN         # 102  conv contraction (dense lanes)
N_CONV = WPAD * C_OUT         # 512  conv output lanes (dense, 4x128)
OUT_PAD = 128                 # lane-padded logits
TAIL = 8                      # zero tail rows of the conv staging buffer
MAX_BB = 8                    # images per grid step cap


def simple_cnn_kernel(x_ref, wc_ref, bc_ref, wf_ref, bf_ref, o_ref,
                      xpad_ref, h_ref):
    """One batch block per grid step.

    x_ref  : (bb, HPAD, K_CONV)   bf16  pre-padded image stripes (halo rows/cols = 0)
    wc_ref : (KH, K_CONV, N_CONV) bf16  Toeplitz-packed conv weight (one slab per kh)
    bc_ref : (1, N_CONV)          f32   conv bias tiled over the 32 output columns
    wf_ref : (NUM_CLASSES, HPAD, N_CONV) bf16  FC weight in activation layout
                                               (rows>=28 / cols x>=28 exactly zero)
    bf_ref : (1, OUT_PAD)         f32   FC bias, lane-padded
    o_ref  : (1, bb, OUT_PAD)     f32   lane-padded logits
    xpad_ref: (bb*HPAD + TAIL, K_CONV)  bf16  2-D conv staging buffer
    h_ref  : (bb, HPAD, N_CONV)   f32   conv+ReLU activations, per-image stripes
    """
    bb = x_ref.shape[0]
    n_rows = bb * HPAD

    # ---- stage the pre-padded stripes (aligned full-row block stores; no
    #      full-buffer re-zero).  Only the TAIL halo rows are zeroed so the
    #      kh=1,2 row shifts read finite values for the last image.
    for b in range(bb):
        xpad_ref[b * HPAD:(b + 1) * HPAD, :] = x_ref[b]
    xpad_ref[n_rows:, :] = jnp.zeros((TAIL, K_CONV), xpad_ref.dtype)

    # ---- 3x3 conv (pad=1) as 3 row-shifted matmuls:
    #      (bb*32, 102) @ (102, 512), f32 accumulation.
    acc = None
    for kh in range(KH):
        part = jnp.dot(xpad_ref[kh:kh + n_rows, :], wc_ref[kh],
                       preferred_element_type=jnp.float32)
        acc = part if acc is None else acc + part
    h2d = jnp.maximum(acc + bc_ref[...], 0.0)            # (bb*32, 512), ReLU

    # ---- restripe into per-image (32, 512) tiles (8-aligned slice stores),
    #      so the FC can broadcast one weight slab over the whole block.
    for b in range(bb):
        h_ref[b] = h2d[b * HPAD:(b + 1) * HPAD, :]
    h3 = h_ref[...]                                       # (bb, 32, 512) f32

    # ---- fused FC, lane-dense, one multiply+reduce pass per class for the
    #      whole block; logits accumulated in a value and stored once.
    #      Junk rows/cols of h are multiplied by exact-zero wf entries.
    col_ids = jax.lax.broadcasted_iota(jnp.int32, (1, OUT_PAD), 1)
    out128 = jnp.zeros((bb, OUT_PAD), jnp.float32)
    for n in range(NUM_CLASSES):
        t = h3 * wf_ref[n].astype(jnp.float32)            # (bb, 32, 512)
        s = jnp.sum(jnp.sum(t, axis=2), axis=1, keepdims=True)   # (bb, 1)
        out128 = jnp.where(col_ids == n, s, out128)

    o_ref[0] = out128 + bf_ref[...]                       # single dense store


def prepare_params(conv_w_pt, conv_b, fc_w_pt, fc_b):
    """One-time relayout of PyTorch-native parameters into kernel layouts."""
    conv_w = np.asarray(conv_w_pt, np.float32)                    # (CO, CI, KH, KW)
    w = np.transpose(conv_w, (2, 3, 1, 0))                        # (kh, kw, ci, co)

    # Toeplitz-packed conv weight: Wc[kh, (x+kw)*3+ci, x*16+co] = w[kh,kw,ci,co]
    Wc = np.zeros((KH, K_CONV, N_CONV), np.float32)
    for kh in range(KH):
        for kw in range(KW):
            for x in range(WPAD):
                wp = x + kw
                Wc[kh, wp * C_IN:(wp + 1) * C_IN,
                   x * C_OUT:(x + 1) * C_OUT] = w[kh, kw]

    bc = np.tile(np.asarray(conv_b, np.float32), WPAD).reshape(1, N_CONV)

    # FC weight in activation layout (y, x*16+co); padded rows/cols stay 0
    # even after the bf16 cast (exact zeros), so junk activations contribute 0.
    wf = np.asarray(fc_w_pt, np.float32).reshape(NUM_CLASSES, C_OUT, H, W)
    wf = np.transpose(wf, (0, 2, 3, 1))                           # (n, y, x, co)
    Wf = np.zeros((NUM_CLASSES, HPAD, N_CONV), np.float32)
    Wf[:, :H, :W * C_OUT] = wf.reshape(NUM_CLASSES, H, W * C_OUT)

    bf = np.zeros((1, OUT_PAD), np.float32)
    bf[0, :NUM_CLASSES] = np.asarray(fc_b, np.float32)

    return (jnp.asarray(Wc, jnp.bfloat16), jnp.asarray(bc, jnp.float32),
            jnp.asarray(Wf, jnp.bfloat16), jnp.asarray(bf, jnp.float32))


def _num_tensorcores():
    """Heuristic TC-per-device count (only affects block sizing, not results)."""
    try:
        kind = (jax.devices()[0].device_kind or "").lower()
    except Exception:
        return 1
    if "v7" in kind or "v4" in kind or "v5p" in kind:
        return 2
    return 1


def _pick_block_batch(batch, num_cores):
    # Single-TC chips (v5e/v6e): one big step (grid steps only add overhead).
    # Dual-TC chips (v7x): keep >=2 "parallel" steps so both cores get work.
    if num_cores <= 1:
        target = min(batch, MAX_BB)
    else:
        target = max(1, min(MAX_BB, batch // num_cores))
    bb = target
    while batch % bb:
        bb -= 1
    return bb


def simple_cnn_forward(x_nchw, params):
    """x_nchw: (B, 3, 28, 28) float32 — same API/layout as the PyTorch module."""
    wc, bc, wf, bf = params
    batch = x_nchw.shape[0]
    bb = _pick_block_batch(batch, _num_tensorcores())
    nblk = batch // bb

    # Layout plumbing (outside the kernel): NCHW -> pre-padded (B, 32, 102)
    # bf16 stripes with (w, c) interleaved in a wide, contiguous minor dim.
    x = jnp.transpose(x_nchw, (0, 2, 3, 1)).astype(jnp.float32)   # (B,28,28,3)
    x = jnp.pad(x, ((0, 0), (1, HPAD - 1 - H), (1, PAD_W - 1 - W), (0, 0)))
    x = x.reshape(batch, HPAD, K_CONV).astype(jnp.bfloat16)       # (B,32,102)

    out = pl.pallas_call(
        simple_cnn_kernel,
        out_shape=jax.ShapeDtypeStruct((nblk, bb, OUT_PAD), jnp.float32),
        grid=(nblk,),
        in_specs=[
            pl.BlockSpec((bb, HPAD, K_CONV), lambda i: (i, 0, 0)),
            pl.BlockSpec((KH, K_CONV, N_CONV), lambda i: (0, 0, 0)),
            pl.BlockSpec((1, N_CONV), lambda i: (0, 0)),
            pl.BlockSpec((NUM_CLASSES, HPAD, N_CONV), lambda i: (0, 0, 0)),
            pl.BlockSpec((1, OUT_PAD), lambda i: (0, 0)),
        ],
        out_specs=pl.BlockSpec((1, bb, OUT_PAD), lambda i: (i, 0, 0)),
        scratch_shapes=[
            pltpu.VMEM((bb * HPAD + TAIL, K_CONV), jnp.bfloat16),
            pltpu.VMEM((bb, HPAD, N_CONV), jnp.float32),
        ],
        compiler_params=pltpu.CompilerParams(
            dimension_semantics=("parallel",)),
    )(x, wc, bc, wf, bf)

    return out.reshape(batch, OUT_PAD)[:, :NUM_CLASSES]


def reference_forward(x_nchw, conv_w_pt, conv_b, fc_w_pt, fc_b):
    """Pure-JAX reference matching the PyTorch module semantics."""
    hp = jax.lax.Precision.HIGHEST
    out = jax.lax.conv_general_dilated(
        x_nchw, conv_w_pt, window_strides=(1, 1), padding=((1, 1), (1, 1)),
        dimension_numbers=("NCHW", "OIHW", "NCHW"), precision=hp)
    out = jnp.maximum(out + conv_b[None, :, None, None], 0.0)
    flat = out.reshape(x_nchw.shape[0], -1)                # (C, H, W) order
    return jnp.dot(flat, fc_w_pt.T, precision=hp) + fc_b[None, :]


if __name__ == "__main__":
    key = jax.random.PRNGKey(0)
    k1, k2, k3, k4, kx = jax.random.split(key, 5)

    # Deterministic synthetic parameters (PyTorch-native layouts).
    conv_w_pt = jax.random.normal(k1, (C_OUT, C_IN, KH, KW), jnp.float32) * 0.1
    conv_b = jax.random.normal(k2, (C_OUT,), jnp.float32) * 0.1
    fc_w_pt = jax.random.normal(k3, (NUM_CLASSES, C_OUT * H * W), jnp.float32) * 0.01
    fc_b = jax.random.normal(k4, (NUM_CLASSES,), jnp.float32) * 0.01

    # Small batch; spatial/channel sizes fixed by the module (fc1 = 16*28*28).
    x = jax.random.normal(kx, (2, C_IN, H, W), jnp.float32)

    params = prepare_params(conv_w_pt, conv_b, fc_w_pt, fc_b)   # one-time relayout
    fwd = jax.jit(simple_cnn_forward)

    out = jax.block_until_ready(fwd(x, params))
    assert out.shape == (2, NUM_CLASSES) and out.dtype == jnp.float32

    ref = reference_forward(x, conv_w_pt, conv_b, fc_w_pt, fc_b)
    assert jnp.allclose(out, ref, atol=2e-2, rtol=2e-2), (out, ref)

    print("KERNEL_OK")
</pallas_src>

<mosaic_0001>
module attributes {stable_mosaic.version = 11 : i64} {
  func.func @simple_cnn_kernel(%arg0: i32, %arg1: memref<2x32x102xbf16, #tpu.memory_space<vmem>>, %arg2: memref<3x102x512xbf16, #tpu.memory_space<vmem>>, %arg3: memref<1x512xf32, #tpu.memory_space<vmem>>, %arg4: memref<10x32x512xbf16, #tpu.memory_space<vmem>>, %arg5: memref<1x128xf32, #tpu.memory_space<vmem>>, %arg6: memref<1x2x128xf32, #tpu.memory_space<vmem>>, %arg7: memref<72x102xbf16, #tpu.memory_space<vmem>>, %arg8: memref<2x32x512xf32, #tpu.memory_space<vmem>>) attributes {dimension_semantics = [#tpu.dimension_semantics<parallel>], iteration_bounds = array<i64: 1>, scalar_prefetch = 0 : i64, scratch_operands = 2 : i64, tpu.core_type = #tpu.core_type<tc>, window_params = [{transform_indices = @transform_0, window_bounds = array<i64: 2, 32, 102>}, {pipeline_mode = #tpu.pipeline_mode<synchronous>, transform_indices = @transform_1, window_bounds = array<i64: 3, 102, 512>}, {pipeline_mode = #tpu.pipeline_mode<synchronous>, transform_indices = @transform_2, window_bounds = array<i64: 1, 512>}, {pipeline_mode = #tpu.pipeline_mode<synchronous>, transform_indices = @transform_3, window_bounds = array<i64: 10, 32, 512>}, {pipeline_mode = #tpu.pipeline_mode<synchronous>, transform_indices = @transform_4, window_bounds = array<i64: 1, 128>}, {transform_indices = @transform_5, window_bounds = array<i64: 1, 2, 128>}]} {
    %c0 = arith.constant 0 : index
    %c0_0 = arith.constant 0 : index
    %c0_1 = arith.constant 0 : index
    %0 = vector.load %arg1[%c0, %c0_0, %c0_1] : memref<2x32x102xbf16, #tpu.memory_space<vmem>>, vector<1x32x102xbf16>
    %1 = vector.shape_cast %0 : vector<1x32x102xbf16> to vector<32x102xbf16>
    %c0_2 = arith.constant 0 : index
    %c0_3 = arith.constant 0 : index
    %2 = vector.load %arg7[%c0_2, %c0_3] : memref<72x102xbf16, #tpu.memory_space<vmem>>, vector<32x102xbf16>
    tpu.vector_store %arg7[%c0_2, %c0_3], %1 {strides = array<i32>} : memref<72x102xbf16, #tpu.memory_space<vmem>>, vector<32x102xbf16>,
    %c1 = arith.constant 1 : index
    %c0_4 = arith.constant 0 : index
    %c0_5 = arith.constant 0 : index
    %3 = vector.load %arg1[%c1, %c0_4, %c0_5] : memref<2x32x102xbf16, #tpu.memory_space<vmem>>, vector<1x32x102xbf16>
    %4 = vector.shape_cast %3 : vector<1x32x102xbf16> to vector<32x102xbf16>
    %c32 = arith.constant 32 : index
    %c0_6 = arith.constant 0 : index
    %5 = vector.load %arg7[%c32, %c0_6] : memref<72x102xbf16, #tpu.memory_space<vmem>>, vector<32x102xbf16>
    tpu.vector_store %arg7[%c32, %c0_6], %4 {strides = array<i32>} : memref<72x102xbf16, #tpu.memory_space<vmem>>, vector<32x102xbf16>,
    %cst = arith.constant 0.000000e+00 : bf16
    %6 = vector.broadcast %cst : bf16 to vector<8x102xbf16>
    %c64 = arith.constant 64 : index
    %c0_7 = arith.constant 0 : index
    %7 = vector.load %arg7[%c64, %c0_7] : memref<72x102xbf16, #tpu.memory_space<vmem>>, vector<8x102xbf16>
    tpu.vector_store %arg7[%c64, %c0_7], %6 {strides = array<i32>} : memref<72x102xbf16, #tpu.memory_space<vmem>>, vector<8x102xbf16>,
    %c0_8 = arith.constant 0 : index
    %c0_9 = arith.constant 0 : index
    %8 = vector.load %arg7[%c0_8, %c0_9] : memref<72x102xbf16, #tpu.memory_space<vmem>>, vector<64x102xbf16>
    %c0_10 = arith.constant 0 : index
    %c0_11 = arith.constant 0 : index
    %c0_12 = arith.constant 0 : index
    %9 = vector.load %arg2[%c0_10, %c0_11, %c0_12] : memref<3x102x512xbf16, #tpu.memory_space<vmem>>, vector<1x102x512xbf16>
    %10 = vector.shape_cast %9 : vector<1x102x512xbf16> to vector<102x512xbf16>
    %cst_13 = arith.constant dense<0.000000e+00> : vector<64x512xf32>
    %11 = tpu.matmul %8, %10, %cst_13 {dimension_numbers = #tpu.dot_dimension_numbers<[1], [0], [0], [1], [0, 0, 1, 1], [], []>} : vector<64x102xbf16>, vector<102x512xbf16>, vector<64x512xf32> -> vector<64x512xf32>
    %c1_14 = arith.constant 1 : index
    %c0_15 = arith.constant 0 : index
    %12 = vector.load %arg7[%c1_14, %c0_15] : memref<72x102xbf16, #tpu.memory_space<vmem>>, vector<64x102xbf16>
    %c1_16 = arith.constant 1 : index
    %c0_17 = arith.constant 0 : index
    %c0_18 = arith.constant 0 : index
    %13 = vector.load %arg2[%c1_16, %c0_17, %c0_18] : memref<3x102x512xbf16, #tpu.memory_space<vmem>>, vector<1x102x512xbf16>
    %14 = vector.shape_cast %13 : vector<1x102x512xbf16> to vector<102x512xbf16>
    %cst_19 = arith.constant dense<0.000000e+00> : vector<64x512xf32>
    %15 = tpu.matmul %12, %14, %cst_19 {dimension_numbers = #tpu.dot_dimension_numbers<[1], [0], [0], [1], [0, 0, 1, 1], [], []>} : vector<64x102xbf16>, vector<102x512xbf16>, vector<64x512xf32> -> vector<64x512xf32>
    %16 = arith.addf %11, %15 : vector<64x512xf32>
    %c2 = arith.constant 2 : index
    %c0_20 = arith.constant 0 : index
    %17 = vector.load %arg7[%c2, %c0_20] : memref<72x102xbf16, #tpu.memory_space<vmem>>, vector<64x102xbf16>
    %c2_21 = arith.constant 2 : index
    %c0_22 = arith.constant 0 : index
    %c0_23 = arith.constant 0 : index
    %18 = vector.load %arg2[%c2_21, %c0_22, %c0_23] : memref<3x102x512xbf16, #tpu.memory_space<vmem>>, vector<1x102x512xbf16>
    %19 = vector.shape_cast %18 : vector<1x102x512xbf16> to vector<102x512xbf16>
    %cst_24 = arith.constant dense<0.000000e+00> : vector<64x512xf32>
    %20 = tpu.matmul %17, %19, %cst_24 {dimension_numbers = #tpu.dot_dimension_numbers<[1], [0], [0], [1], [0, 0, 1, 1], [], []>} : vector<64x102xbf16>, vector<102x512xbf16>, vector<64x512xf32> -> vector<64x512xf32>
    %21 = arith.addf %16, %20 : vector<64x512xf32>
    %c0_25 = arith.constant 0 : index
    %c0_26 = arith.constant 0 : index
    %22 = vector.load %arg3[%c0_25, %c0_26] : memref<1x512xf32, #tpu.memory_space<vmem>>, vector<1x512xf32>
    %23 = vector.broadcast %22 : vector<1x512xf32> to vector<64x512xf32>
    %24 = arith.addf %21, %23 : vector<64x512xf32>
    %cst_27 = arith.constant 0.000000e+00 : f32
    %25 = vector.broadcast %cst_27 : f32 to vector<64x512xf32>
    %26 = arith.maximumf %24, %25 : vector<64x512xf32>
    %27 = vector.extract_strided_slice %26 {offsets = [0, 0], sizes = [32, 512], strides = [1, 1]} : vector<64x512xf32> to vector<32x512xf32>
    %c0_28 = arith.constant 0 : index
    %c0_29 = arith.constant 0 : index
    %c0_30 = arith.constant 0 : index
    %28 = vector.load %arg8[%c0_28, %c0_29, %c0_30] : memref<2x32x512xf32, #tpu.memory_space<vmem>>, vector<1x32x512xf32>
    %29 = vector.shape_cast %28 : vector<1x32x512xf32> to vector<32x512xf32>
    %30 = vector.shape_cast %27 : vector<32x512xf32> to vector<1x32x512xf32>
    tpu.vector_store %arg8[%c0_28, %c0_29, %c0_30], %30 {strides = array<i32>} : memref<2x32x512xf32, #tpu.memory_space<vmem>>, vector<1x32x512xf32>,
    %31 = vector.extract_strided_slice %26 {offsets = [32, 0], sizes = [32, 512], strides = [1, 1]} : vector<64x512xf32> to vector<32x512xf32>
    %c1_31 = arith.constant 1 : index
    %c0_32 = arith.constant 0 : index
    %c0_33 = arith.constant 0 : index
    %32 = vector.load %arg8[%c1_31, %c0_32, %c0_33] : memref<2x32x512xf32, #tpu.memory_space<vmem>>, vector<1x32x512xf32>
    %33 = vector.shape_cast %32 : vector<1x32x512xf32> to vector<32x512xf32>
    %34 = vector.shape_cast %31 : vector<32x512xf32> to vector<1x32x512xf32>
    tpu.vector_store %arg8[%c1_31, %c0_32, %c0_33], %34 {strides = array<i32>} : memref<2x32x512xf32, #tpu.memory_space<vmem>>, vector<1x32x512xf32>,
    %c0_34 = arith.constant 0 : index
    %c0_35 = arith.constant 0 : index
    %c0_36 = arith.constant 0 : index
    %35 = vector.load %arg8[%c0_34, %c0_35, %c0_36] : memref<2x32x512xf32, #tpu.memory_space<vmem>>, vector<2x32x512xf32>
    %36 = tpu.iota {dimensions = array<i32: 1>} : vector<1x128xi32>
    %cst_37 = arith.constant 0.000000e+00 : f32
    %37 = vector.broadcast %cst_37 : f32 to vector<2x128xf32>
    %c0_38 = arith.constant 0 : index
    %c0_39 = arith.constant 0 : index
    %c0_40 = arith.constant 0 : index
    %38 = vector.load %arg4[%c0_38, %c0_39, %c0_40] : memref<10x32x512xbf16, #tpu.memory_space<vmem>>, vector<1x32x512xbf16>
    %39 = vector.shape_cast %38 : vector<1x32x512xbf16> to vector<32x512xbf16>
    %40 = arith.extf %39 : vector<32x512xbf16> to vector<32x512xf32>
    %41 = vector.shape_cast %40 : vector<32x512xf32> to vector<1x32x512xf32>
    %42 = vector.broadcast %41 : vector<1x32x512xf32> to vector<2x32x512xf32>
    %43 = arith.mulf %35, %42 : vector<2x32x512xf32>
    %cst_41 = arith.constant dense<0.000000e+00> : vector<2x32xf32>
    %44 = vector.multi_reduction <add>, %43, %cst_41 [2] : vector<2x32x512xf32> to vector<2x32xf32>
    %cst_42 = arith.constant dense<0.000000e+00> : vector<2xf32>
    %45 = vector.multi_reduction <add>, %44, %cst_42 [1] : vector<2x32xf32> to vector<2xf32>
    %46 = vector.shape_cast %45 : vector<2xf32> to vector<2x1xf32>
    %c0_i32 = arith.constant 0 : i32
    %47 = vector.broadcast %c0_i32 : i32 to vector<1x128xi32>
    %48 = arith.cmpi eq, %36, %47 : vector<1x128xi32>
    %49 = vector.shape_cast %48 : vector<1x128xi1> to vector<1x128xi1>
    %50 = vector.broadcast %49 : vector<1x128xi1> to vector<2x128xi1>
    %51 = vector.shape_cast %46 : vector<2x1xf32> to vector<2x1xf32>
    %52 = vector.broadcast %51 : vector<2x1xf32> to vector<2x128xf32>
    %53 = arith.select %50, %52, %37 : vector<2x128xi1>, vector<2x128xf32>
    %c1_43 = arith.constant 1 : index
    %c0_44 = arith.constant 0 : index
    %c0_45 = arith.constant 0 : index
    %54 = vector.load %arg4[%c1_43, %c0_44, %c0_45] : memref<10x32x512xbf16, #tpu.memory_space<vmem>>, vector<1x32x512xbf16>
    %55 = vector.shape_cast %54 : vector<1x32x512xbf16> to vector<32x512xbf16>
    %56 = arith.extf %55 : vector<32x512xbf16> to vector<32x512xf32>
    %57 = vector.shape_cast %56 : vector<32x512xf32> to vector<1x32x512xf32>
    %58 = vector.broadcast %57 : vector<1x32x512xf32> to vector<2x32x512xf32>
    %59 = arith.mulf %35, %58 : vector<2x32x512xf32>
    %cst_46 = arith.constant dense<0.000000e+00> : vector<2x32xf32>
    %60 = vector.multi_reduction <add>, %59, %cst_46 [2] : vector<2x32x512xf32> to vector<2x32xf32>
    %cst_47 = arith.constant dense<0.000000e+00> : vector<2xf32>
    %61 = vector.multi_reduction <add>, %60, %cst_47 [1] : vector<2x32xf32> to vector<2xf32>
    %62 = vector.shape_cast %61 : vector<2xf32> to vector<2x1xf32>
    %c1_i32 = arith.constant 1 : i32
    %63 = vector.broadcast %c1_i32 : i32 to vector<1x128xi32>
    %64 = arith.cmpi eq, %36, %63 : vector<1x128xi32>
    %65 = vector.shape_cast %64 : vector<1x128xi1> to vector<1x128xi1>
    %66 = vector.broadcast %65 : vector<1x128xi1> to vector<2x128xi1>
    %67 = vector.shape_cast %62 : vector<2x1xf32> to vector<2x1xf32>
    %68 = vector.broadcast %67 : vector<2x1xf32> to vector<2x128xf32>
    %69 = arith.select %66, %68, %53 : vector<2x128xi1>, vector<2x128xf32>
    %c2_48 = arith.constant 2 : index
    %c0_49 = arith.constant 0 : index
    %c0_50 = arith.constant 0 : index
    %70 = vector.load %arg4[%c2_48, %c0_49, %c0_50] : memref<10x32x512xbf16, #tpu.memory_space<vmem>>, vector<1x32x512xbf16>
    %71 = vector.shape_cast %70 : vector<1x32x512xbf16> to vector<32x512xbf16>
    %72 = arith.extf %71 : vector<32x512xbf16> to vector<32x512xf32>
    %73 = vector.shape_cast %72 : vector<32x512xf32> to vector<1x32x512xf32>
    %74 = vector.broadcast %73 : vector<1x32x512xf32> to vector<2x32x512xf32>
    %75 = arith.mulf %35, %74 : vector<2x32x512xf32>
    %cst_51 = arith.constant dense<0.000000e+00> : vector<2x32xf32>
    %76 = vector.multi_reduction <add>, %75, %cst_51 [2] : vector<2x32x512xf32> to vector<2x32xf32>
    %cst_52 = arith.constant dense<0.000000e+00> : vector<2xf32>
    %77 = vector.multi_reduction <add>, %76, %cst_52 [1] : vector<2x32xf32> to vector<2xf32>
    %78 = vector.shape_cast %77 : vector<2xf32> to vector<2x1xf32>
    %c2_i32 = arith.constant 2 : i32
    %79 = vector.broadcast %c2_i32 : i32 to vector<1x128xi32>
    %80 = arith.cmpi eq, %36, %79 : vector<1x128xi32>
    %81 = vector.shape_cast %80 : vector<1x128xi1> to vector<1x128xi1>
    %82 = vector.broadcast %81 : vector<1x128xi1> to vector<2x128xi1>
    %83 = vector.shape_cast %78 : vector<2x1xf32> to vector<2x1xf32>
    %84 = vector.broadcast %83 : vector<2x1xf32> to vector<2x128xf32>
    %85 = arith.select %82, %84, %69 : vector<2x128xi1>, vector<2x128xf32>
    %c3 = arith.constant 3 : index
    %c0_53 = arith.constant 0 : index
    %c0_54 = arith.constant 0 : index
    %86 = vector.load %arg4[%c3, %c0_53, %c0_54] : memref<10x32x512xbf16, #tpu.memory_space<vmem>>, vector<1x32x512xbf16>
    %87 = vector.shape_cast %86 : vector<1x32x512xbf16> to vector<32x512xbf16>
    %88 = arith.extf %87 : vector<32x512xbf16> to vector<32x512xf32>
    %89 = vector.shape_cast %88 : vector<32x512xf32> to vector<1x32x512xf32>
    %90 = vector.broadcast %89 : vector<1x32x512xf32> to vector<2x32x512xf32>
    %91 = arith.mulf %35, %90 : vector<2x32x512xf32>
    %cst_55 = arith.constant dense<0.000000e+00> : vector<2x32xf32>
    %92 = vector.multi_reduction <add>, %91, %cst_55 [2] : vector<2x32x512xf32> to vector<2x32xf32>
    %cst_56 = arith.constant dense<0.000000e+00> : vector<2xf32>
    %93 = vector.multi_reduction <add>, %92, %cst_56 [1] : vector<2x32xf32> to vector<2xf32>
    %94 = vector.shape_cast %93 : vector<2xf32> to vector<2x1xf32>
    %c3_i32 = arith.constant 3 : i32
    %95 = vector.broadcast %c3_i32 : i32 to vector<1x128xi32>
    %96 = arith.cmpi eq, %36, %95 : vector<1x128xi32>
    %97 = vector.shape_cast %96 : vector<1x128xi1> to vector<1x128xi1>
    %98 = vector.broadcast %97 : vector<1x128xi1> to vector<2x128xi1>
    %99 = vector.shape_cast %94 : vector<2x1xf32> to vector<2x1xf32>
    %100 = vector.broadcast %99 : vector<2x1xf32> to vector<2x128xf32>
    %101 = arith.select %98, %100, %85 : vector<2x128xi1>, vector<2x128xf32>
    %c4 = arith.constant 4 : index
    %c0_57 = arith.constant 0 : index
    %c0_58 = arith.constant 0 : index
    %102 = vector.load %arg4[%c4, %c0_57, %c0_58] : memref<10x32x512xbf16, #tpu.memory_space<vmem>>, vector<1x32x512xbf16>
    %103 = vector.shape_cast %102 : vector<1x32x512xbf16> to vector<32x512xbf16>
    %104 = arith.extf %103 : vector<32x512xbf16> to vector<32x512xf32>
    %105 = vector.shape_cast %104 : vector<32x512xf32> to vector<1x32x512xf32>
    %106 = vector.broadcast %105 : vector<1x32x512xf32> to vector<2x32x512xf32>
    %107 = arith.mulf %35, %106 : vector<2x32x512xf32>
    %cst_59 = arith.constant dense<0.000000e+00> : vector<2x32xf32>
    %108 = vector.multi_reduction <add>, %107, %cst_59 [2] : vector<2x32x512xf32> to vector<2x32xf32>
    %cst_60 = arith.constant dense<0.000000e+00> : vector<2xf32>
    %109 = vector.multi_reduction <add>, %108, %cst_60 [1] : vector<2x32xf32> to vector<2xf32>
    %110 = vector.shape_cast %109 : vector<2xf32> to vector<2x1xf32>
    %c4_i32 = arith.constant 4 : i32
    %111 = vector.broadcast %c4_i32 : i32 to vector<1x128xi32>
    %112 = arith.cmpi eq, %36, %111 : vector<1x128xi32>
    %113 = vector.shape_cast %112 : vector<1x128xi1> to vector<1x128xi1>
    %114 = vector.broadcast %113 : vector<1x128xi1> to vector<2x128xi1>
    %115 = vector.shape_cast %110 : vector<2x1xf32> to vector<2x1xf32>
    %116 = vector.broadcast %115 : vector<2x1xf32> to vector<2x128xf32>
    %117 = arith.select %114, %116, %101 : vector<2x128xi1>, vector<2x128xf32>
    %c5 = arith.constant 5 : index
    %c0_61 = arith.constant 0 : index
    %c0_62 = arith.constant 0 : index
    %118 = vector.load %arg4[%c5, %c0_61, %c0_62] : memref<10x32x512xbf16, #tpu.memory_space<vmem>>, vector<1x32x512xbf16>
    %119 = vector.shape_cast %118 : vector<1x32x512xbf16> to vector<32x512xbf16>
    %120 = arith.extf %119 : vector<32x512xbf16> to vector<32x512xf32>
    %121 = vector.shape_cast %120 : vector<32x512xf32> to vector<1x32x512xf32>
    %122 = vector.broadcast %121 : vector<1x32x512xf32> to vector<2x32x512xf32>
    %123 = arith.mulf %35, %122 : vector<2x32x512xf32>
    %cst_63 = arith.constant dense<0.000000e+00> : vector<2x32xf32>
    %124 = vector.multi_reduction <add>, %123, %cst_63 [2] : vector<2x32x512xf32> to vector<2x32xf32>
    %cst_64 = arith.constant dense<0.000000e+00> : vector<2xf32>
    %125 = vector.multi_reduction <add>, %124, %cst_64 [1] : vector<2x32xf32> to vector<2xf32>
    %126 = vector.shape_cast %125 : vector<2xf32> to vector<2x1xf32>
    %c5_i32 = arith.constant 5 : i32
    %127 = vector.broadcast %c5_i32 : i32 to vector<1x128xi32>
    %128 = arith.cmpi eq, %36, %127 : vector<1x128xi32>
    %129 = vector.shape_cast %128 : vector<1x128xi1> to vector<1x128xi1>
    %130 = vector.broadcast %129 : vector<1x128xi1> to vector<2x128xi1>
    %131 = vector.shape_cast %126 : vector<2x1xf32> to vector<2x1xf32>
    %132 = vector.broadcast %131 : vector<2x1xf32> to vector<2x128xf32>
    %133 = arith.select %130, %132, %117 : vector<2x128xi1>, vector<2x128xf32>
    %c6 = arith.constant 6 : index
    %c0_65 = arith.constant 0 : index
    %c0_66 = arith.constant 0 : index
    %134 = vector.load %arg4[%c6, %c0_65, %c0_66] : memref<10x32x512xbf16, #tpu.memory_space<vmem>>, vector<1x32x512xbf16>
    %135 = vector.shape_cast %134 : vector<1x32x512xbf16> to vector<32x512xbf16>
    %136 = arith.extf %135 : vector<32x512xbf16> to vector<32x512xf32>
    %137 = vector.shape_cast %136 : vector<32x512xf32> to vector<1x32x512xf32>
    %138 = vector.broadcast %137 : vector<1x32x512xf32> to vector<2x32x512xf32>
    %139 = arith.mulf %35, %138 : vector<2x32x512xf32>
    %cst_67 = arith.constant dense<0.000000e+00> : vector<2x32xf32>
    %140 = vector.multi_reduction <add>, %139, %cst_67 [2] : vector<2x32x512xf32> to vector<2x32xf32>
    %cst_68 = arith.constant dense<0.000000e+00> : vector<2xf32>
    %141 = vector.multi_reduction <add>, %140, %cst_68 [1] : vector<2x32xf32> to vector<2xf32>
    %142 = vector.shape_cast %141 : vector<2xf32> to vector<2x1xf32>
    %c6_i32 = arith.constant 6 : i32
    %143 = vector.broadcast %c6_i32 : i32 to vector<1x128xi32>
    %144 = arith.cmpi eq, %36, %143 : vector<1x128xi32>
    %145 = vector.shape_cast %144 : vector<1x128xi1> to vector<1x128xi1>
    %146 = vector.broadcast %145 : vector<1x128xi1> to vector<2x128xi1>
    %147 = vector.shape_cast %142 : vector<2x1xf32> to vector<2x1xf32>
    %148 = vector.broadcast %147 : vector<2x1xf32> to vector<2x128xf32>
    %149 = arith.select %146, %148, %133 : vector<2x128xi1>, vector<2x128xf32>
    %c7 = arith.constant 7 : index
    %c0_69 = arith.constant 0 : index
    %c0_70 = arith.constant 0 : index
    %150 = vector.load %arg4[%c7, %c0_69, %c0_70] : memref<10x32x512xbf16, #tpu.memory_space<vmem>>, vector<1x32x512xbf16>
    %151 = vector.shape_cast %150 : vector<1x32x512xbf16> to vector<32x512xbf16>
    %152 = arith.extf %151 : vector<32x512xbf16> to vector<32x512xf32>
    %153 = vector.shape_cast %152 : vector<32x512xf32> to vector<1x32x512xf32>
    %154 = vector.broadcast %153 : vector<1x32x512xf32> to vector<2x32x512xf32>
    %155 = arith.mulf %35, %154 : vector<2x32x512xf32>
    %cst_71 = arith.constant dense<0.000000e+00> : vector<2x32xf32>
    %156 = vector.multi_reduction <add>, %155, %cst_71 [2] : vector<2x32x512xf32> to vector<2x32xf32>
    %cst_72 = arith.constant dense<0.000000e+00> : vector<2xf32>
    %157 = vector.multi_reduction <add>, %156, %cst_72 [1] : vector<2x32xf32> to vector<2xf32>
    %158 = vector.shape_cast %157 : vector<2xf32> to vector<2x1xf32>
    %c7_i32 = arith.constant 7 : i32
    %159 = vector.broadcast %c7_i32 : i32 to vector<1x128xi32>
    %160 = arith.cmpi eq, %36, %159 : vector<1x128xi32>
    %161 = vector.shape_cast %160 : vector<1x128xi1> to vector<1x128xi1>
    %162 = vector.broadcast %161 : vector<1x128xi1> to vector<2x128xi1>
    %163 = vector.shape_cast %158 : vector<2x1xf32> to vector<2x1xf32>
    %164 = vector.broadcast %163 : vector<2x1xf32> to vector<2x128xf32>
    %165 = arith.select %162, %164, %149 : vector<2x128xi1>, vector<2x128xf32>
    %c8 = arith.constant 8 : index
    %c0_73 = arith.constant 0 : index
    %c0_74 = arith.constant 0 : index
    %166 = vector.load %arg4[%c8, %c0_73, %c0_74] : memref<10x32x512xbf16, #tpu.memory_space<vmem>>, vector<1x32x512xbf16>
    %167 = vector.shape_cast %166 : vector<1x32x512xbf16> to vector<32x512xbf16>
    %168 = arith.extf %167 : vector<32x512xbf16> to vector<32x512xf32>
    %169 = vector.shape_cast %168 : vector<32x512xf32> to vector<1x32x512xf32>
    %170 = vector.broadcast %169 : vector<1x32x512xf32> to vector<2x32x512xf32>
    %171 = arith.mulf %35, %170 : vector<2x32x512xf32>
    %cst_75 = arith.constant dense<0.000000e+00> : vector<2x32xf32>
    %172 = vector.multi_reduction <add>, %171, %cst_75 [2] : vector<2x32x512xf32> to vector<2x32xf32>
    %cst_76 = arith.constant dense<0.000000e+00> : vector<2xf32>
    %173 = vector.multi_reduction <add>, %172, %cst_76 [1] : vector<2x32xf32> to vector<2xf32>
    %174 = vector.shape_cast %173 : vector<2xf32> to vector<2x1xf32>
    %c8_i32 = arith.constant 8 : i32
    %175 = vector.broadcast %c8_i32 : i32 to vector<1x128xi32>
    %176 = arith.cmpi eq, %36, %175 : vector<1x128xi32>
    %177 = vector.shape_cast %176 : vector<1x128xi1> to vector<1x128xi1>
    %178 = vector.broadcast %177 : vector<1x128xi1> to vector<2x128xi1>
    %179 = vector.shape_cast %174 : vector<2x1xf32> to vector<2x1xf32>
    %180 = vector.broadcast %179 : vector<2x1xf32> to vector<2x128xf32>
    %181 = arith.select %178, %180, %165 : vector<2x128xi1>, vector<2x128xf32>
    %c9 = arith.constant 9 : index
    %c0_77 = arith.constant 0 : index
    %c0_78 = arith.constant 0 : index
    %182 = vector.load %arg4[%c9, %c0_77, %c0_78] : memref<10x32x512xbf16, #tpu.memory_space<vmem>>, vector<1x32x512xbf16>
    %183 = vector.shape_cast %182 : vector<1x32x512xbf16> to vector<32x512xbf16>
    %184 = arith.extf %183 : vector<32x512xbf16> to vector<32x512xf32>
    %185 = vector.shape_cast %184 : vector<32x512xf32> to vector<1x32x512xf32>
    %186 = vector.broadcast %185 : vector<1x32x512xf32> to vector<2x32x512xf32>
    %187 = arith.mulf %35, %186 : vector<2x32x512xf32>
    %cst_79 = arith.constant dense<0.000000e+00> : vector<2x32xf32>
    %188 = vector.multi_reduction <add>, %187, %cst_79 [2] : vector<2x32x512xf32> to vector<2x32xf32>
    %cst_80 = arith.constant dense<0.000000e+00> : vector<2xf32>
    %189 = vector.multi_reduction <add>, %188, %cst_80 [1] : vector<2x32xf32> to vector<2xf32>
    %190 = vector.shape_cast %189 : vector<2xf32> to vector<2x1xf32>
    %c9_i32 = arith.constant 9 : i32
    %191 = vector.broadcast %c9_i32 : i32 to vector<1x128xi32>
    %192 = arith.cmpi eq, %36, %191 : vector<1x128xi32>
    %193 = vector.shape_cast %192 : vector<1x128xi1> to vector<1x128xi1>
    %194 = vector.broadcast %193 : vector<1x128xi1> to vector<2x128xi1>
    %195 = vector.shape_cast %190 : vector<2x1xf32> to vector<2x1xf32>
    %196 = vector.broadcast %195 : vector<2x1xf32> to vector<2x128xf32>
    %197 = arith.select %194, %196, %181 : vector<2x128xi1>, vector<2x128xf32>
    %c0_81 = arith.constant 0 : index
    %c0_82 = arith.constant 0 : index
    %198 = vector.load %arg5[%c0_81, %c0_82] : memref<1x128xf32, #tpu.memory_space<vmem>>, vector<1x128xf32>
    %199 = vector.broadcast %198 : vector<1x128xf32> to vector<2x128xf32>
    %200 = arith.addf %197, %199 : vector<2x128xf32>
    %c0_83 = arith.constant 0 : index
    %c0_84 = arith.constant 0 : index
    %c0_85 = arith.constant 0 : index
    %201 = vector.load %arg6[%c0_83, %c0_84, %c0_85] : memref<1x2x128xf32, #tpu.memory_space<vmem>>, vector<1x2x128xf32>
    %202 = vector.shape_cast %201 : vector<1x2x128xf32> to vector<2x128xf32>
    %203 = vector.shape_cast %200 : vector<2x128xf32> to vector<1x2x128xf32>
    tpu.vector_store %arg6[%c0_83, %c0_84, %c0_85], %203 {strides = array<i32>} : memref<1x2x128xf32, #tpu.memory_space<vmem>>, vector<1x2x128xf32>,
    return
  }
  func.func @transform_0(%arg0: i32) -> (i32, i32, i32) {
    %c0_i32 = arith.constant 0 : i32
    %c0_i32_0 = arith.constant 0 : i32
    %c0_i32_1 = arith.constant 0 : i32
    return %arg0, %c0_i32, %c0_i32_0 : i32, i32, i32
  }
  func.func @transform_1(%arg0: i32) -> (i32, i32, i32) {
    %c0_i32 = arith.constant 0 : i32
    %c0_i32_0 = arith.constant 0 : i32
    %c0_i32_1 = arith.constant 0 : i32
    %c0_i32_2 = arith.constant 0 : i32
    return %c0_i32, %c0_i32_0, %c0_i32_1 : i32, i32, i32
  }
  func.func @transform_2(%arg0: i32) -> (i32, i32) {
    %c0_i32 = arith.constant 0 : i32
    %c0_i32_0 = arith.constant 0 : i32
    %c0_i32_1 = arith.constant 0 : i32
    return %c0_i32, %c0_i32_0 : i32, i32
  }
  func.func @transform_3(%arg0: i32) -> (i32, i32, i32) {
    %c0_i32 = arith.constant 0 : i32
    %c0_i32_0 = arith.constant 0 : i32
    %c0_i32_1 = arith.constant 0 : i32
    %c0_i32_2 = arith.constant 0 : i32
    return %c0_i32, %c0_i32_0, %c0_i32_1 : i32, i32, i32
  }
  func.func @transform_4(%arg0: i32) -> (i32, i32) {
    %c0_i32 = arith.constant 0 : i32
    %c0_i32_0 = arith.constant 0 : i32
    %c0_i32_1 = arith.constant 0 : i32
    return %c0_i32, %c0_i32_0 : i32, i32
  }
  func.func @transform_5(%arg0: i32) -> (i32, i32, i32) {
    %c0_i32 = arith.constant 0 : i32
    %c0_i32_0 = arith.constant 0 : i32
    %c0_i32_1 = arith.constant 0 : i32
    return %arg0, %c0_i32, %c0_i32_0 : i32, i32, i32
  }
}

</mosaic_0001>

<bundles_post_ra>
// kernel: simple_cnn_forward.1
= control target key start
LH: loop header
LB: loop body
LE: loop exit
PB: predicated region body
PF: predicated region fallthrough
CT: control target
= control target key end

     0   :  { %10 = vsyncpa [#allocation5], 0  ;;  %s5492_s0 = inlined_call_operand.vmem [shape: bf16[2,32,102], index: 0, kind: input, shape index: {}]   ;;  %s5493_s1 = inlined_call_operand.hbm [shape: bf16[3,102,512], index: 1, kind: input, shape index: {}]   ;;  %s5494_s2 = inlined_call_operand.vmem [shape: f32[1,512], index: 2, kind: input, shape index: {}]   ;;  %s5495_s3 = inlined_call_operand.vmem [shape: bf16[10,32,512], index: 3, kind: input, shape index: {}]   ;;  %s5496_s4 = inlined_call_operand.vmem [shape: f32[1,128], index: 4, kind: input, shape index: {}]   ;;  %s5497_s5 = inlined_call_operand.hbm [shape: f32[1,2,128], index: 5, kind: output, shape index: {}]  }
   0x1   :  { %11 = vsyncpa [#allocation6], 0  ;;  %s3292_s18 = smov [#allocation4]   ;;  %s3244_s22 = scalar_lea.hbm %s5493_s1, 9984 }
   0x2   :  { %s19_s19 = sshll.u32 %s3292_s18, 4  ;;  %p3245_p0 = scmp.ne.s32.totalorder %s5493_s1, %s3244_s22  ;;  %s20_s19 = int_to_ptr.vmem [resolvable:$true] %s19_s19 }
   0x3   :  { %p3248_p1 = scmp.lt.u32.totalorder %s3244_s22, %s5493_s1 }
   0x5   :  { %p3250_p2 = pnand %p3248_p1, %p3245_p0 }
   0x7   :  { %3253 = shalt.err (!%p3250_p2)
}
   0x8   :  { %s3254_s27 = scalar_lea.vmem %s20_s19, 9984  ;;  %p3259_p4 = scmp.lt.s32.totalorder %s20_s19, %s20_s19 }
   0x9   :  { %p3255_p3 = scmp.ne.s32.totalorder %s20_s19, %s3254_s27  ;;  %p3260_p5 = scmp.lt.s32.totalorder %s3254_s27, %s3254_s27 }
   0xb   :  { %p3261_p6 = por %p3260_p5, %p3259_p4 }
   0xd   :  { %p3262_p7 = pnand %p3261_p6, %p3255_p3 }
   0xf   :  { %3265 = shalt.err (!%p3262_p7)
}
  0x10   :  { %s3293_s28 = smov 256   ;;  %s3294_s29 = smov 16  }
  0x11   :  { %25 = dma.hbm_to_vmem [thread:$0]  %s5493_s1, 9984, %s20_s19, [#allocation5], %s3293_s28, %s3293_s28, %s3294_s29  }
  0x12   :  { %3288 = dma.done.wait [#allocation5], 9984  }
  0x13   :  { %3289 = vsyncadd [#allocation5], 4294957312  ;;  %vm40_vm0 = vcmask 830464   ;;  %v3295_v0 = vmov 0   ;;  %v3118_v1 = vld [vmem:[#allocation4 + $0xd4] ss:$16 sps:$4 sm:$0xff]  }
  0x14   :  { %365 = vmatprep.mubr.bf16.mxu0 %v3295_v0  ;;  %438 = vmatprep.mubr.bf16.mxu1 %v3295_v0  ;;  %54 = vst.msk [vmem:[#allocation2 + $0x20] sm:$0xf] %vm40_vm0, %v3295_v0  ;;  %v3120_v2 = vld [vmem:[#allocation4 + $0xdc] ss:$16 sps:$4 sm:$0xff]   ;;  %v3122_v3 = vld [vmem:[#allocation4 + $0xd0] ss:$16 sps:$4 sm:$0xff]  }
  0x15   :  { %333 = vmatprep.subr.bf16.mxu0 %v3118_v1  ;;  %v3123_v4 = vld [vmem:[#allocation4 + $0xd8] ss:$16 sps:$4 sm:$0xff]   ;;  %406 = vmatprep.subr.bf16.mxu1 %v3120_v2  ;;  %v3124_v5 = vld [vmem:[#allocation4 + $0xf4] ss:$16 sps:$4 sm:$0xff]   ;;  %v3126_v6 = vld [vmem:[#allocation4 + $0xfc] ss:$16 sps:$4 sm:$0xff]  }
  0x16   :  { %334 = vmatpush1.bf16.msra.mxu0 %v3122_v3  ;;  %407 = vmatpush1.bf16.msra.mxu1 %v3123_v4  ;;  %v3128_v7 = vld [vmem:[#allocation4 + $0xf0] ss:$16 sps:$4 sm:$0xff]   ;;  %v3129_v8 = vld [vmem:[#allocation4 + $0xf8] ss:$16 sps:$4 sm:$0xff]   ;;  %v3130_v9 = vld [vmem:[#allocation4 + $0x114] ss:$16 sps:$4 sm:$0xff]  }
  0x17   :  { %335 = vmatprep.subr.bf16.mxu0 %v3124_v5  ;;  %408 = vmatprep.subr.bf16.mxu1 %v3126_v6  ;;  %v3132_v10 = vld [vmem:[#allocation4 + $0x11c] ss:$16 sps:$4 sm:$0xff]   ;;  %v3134_v11 = vld [vmem:[#allocation4 + $0x110] ss:$16 sps:$4 sm:$0xff]   ;;  %v3135_v12 = vld [vmem:[#allocation4 + $0x118] ss:$16 sps:$4 sm:$0xff]  }
  0x18   :  { %v3136_v13 = vld [vmem:[#allocation4 + $0x134] ss:$16 sps:$4 sm:$0xff]   ;;  %v3138_v14 = vld [vmem:[#allocation4 + $0x13c] ss:$16 sps:$4 sm:$0xff]   ;;  %v3140_v15 = vld [vmem:[#allocation4 + $0x130] ss:$16 sps:$4 sm:$0xff]  }
  0x19   :  { %v3141_v16 = vld [vmem:[#allocation4 + $0x138] ss:$16 sps:$4 sm:$0xff]   ;;  %v3142_v17 = vld [vmem:[#allocation4 + $0x154] ss:$16 sps:$4 sm:$0xff]   ;;  %v3144_v18 = vld [vmem:[#allocation4 + $0x15c] ss:$16 sps:$4 sm:$0xff]  }
  0x1a   :  { %336 = vmatpush1.bf16.msra.mxu0 %v3128_v7  ;;  %409 = vmatpush1.bf16.msra.mxu1 %v3129_v8  ;;  %v3146_v19 = vld [vmem:[#allocation4 + $0x150] ss:$16 sps:$4 sm:$0xff]   ;;  %v3147_v20 = vld [vmem:[#allocation4 + $0x158] ss:$16 sps:$4 sm:$0xff]   ;;  %v3148_v21 = vld [vmem:[#allocation4 + $0x174] ss:$16 sps:$4 sm:$0xff]  }
  0x1b   :  { %337 = vmatprep.subr.bf16.mxu0 %v3130_v9  ;;  %410 = vmatprep.subr.bf16.mxu1 %v3132_v10  ;;  %v3150_v22 = vld [vmem:[#allocation4 + $0x17c] ss:$16 sps:$4 sm:$0xff]   ;;  %v115_v23 = vld [vmem:[#allocation4 + $0x190] sm:$0x77]  ;;  %v37_v26 = vld [vmem:[%s5492_s0 + $0x4] sm:$0xf] }
  0x1c   :  { %v116_v24 = vld [vmem:[#allocation4 + $0x198] sm:$0x77]  ;;  %v38_v27 = vld [vmem:[%s5492_s0 + $0x8] sm:$0xf]  ;;  %v39_v28 = vld [vmem:[%s5492_s0 + $0xc] sm:$0xf]  ;;  %v2885_v31 = vcombine.low %v115_v23, %v115_v23  ;;  %v2886_v33 = vcombine.high %v115_v23, %v115_v23 }
  0x1d   :  { %v36_v25 = vld [vmem:[%s5492_s0] sm:$0xf]  ;;  %42 = vst.msk [vmem:[#allocation2 + $0x4] sm:$0xf] %vm40_vm0, %v37_v26  ;;  %43 = vst.msk [vmem:[#allocation2 + $0x8] sm:$0xf] %vm40_vm0, %v38_v27  ;;  %v2887_v32 = vcombine.low %v116_v24, %v116_v24  ;;  %v2888_v34 = vcombine.high %v116_v24, %v116_v24 }
  0x1e   :  { %338 = vmatpush1.bf16.msra.mxu0 %v3134_v11  ;;  %411 = vmatpush1.bf16.msra.mxu1 %v3135_v12  ;;  %41 = vst.msk [vmem:[#allocation2] sm:$0xf] %vm40_vm0, %v36_v25  ;;  %44 = vst.msk [vmem:[#allocation2 + $0xc] sm:$0xf] %vm40_vm0, %v39_v28  ;;  %v3152_v29 = vld [vmem:[#allocation4 + $0x170] ss:$16 sps:$4 sm:$0xff]  }
  0x1f   :  { %339 = vmatprep.subr.bf16.mxu0 %v3136_v13  ;;  %412 = vmatprep.subr.bf16.mxu1 %v3138_v14  ;;  %v3153_v30 = vld [vmem:[#allocation4 + $0x178] ss:$16 sps:$4 sm:$0xff]   ;;  %vm320_vm1 = vcmask 1042432   ;;  %v2852_v35 = vld [vmem:[%s5492_s0 + $0x10] sm:$0xf]  ;;  %vm307_vm3 = vcmask 834560  }
  0x20   :  { %v2853_v36 = vld [vmem:[%s5492_s0 + $0x14] sm:$0xf]  ;;  %v3162_v37 = vld [vmem:[#allocation4 + $0x4] ss:$16 sps:$4 sm:$0xff]   ;;  %v3165_v38 = vld [vmem:[#allocation4 + $0xc] ss:$16 sps:$4 sm:$0xff]  }
  0x21   :  { %50 = vst.msk [vmem:[#allocation2 + $0x10] sm:$0xf] %vm40_vm0, %v2852_v35  ;;  %51 = vst.msk [vmem:[#allocation2 + $0x14] sm:$0xf] %vm40_vm0, %v2853_v36  ;;  %v322_v39 = vsel %vm320_vm1, %v2885_v31, 0  ;;  %v328_v40 = vsel %vm320_vm1, %v2887_v32, 0 }
  0x22   :  { %340 = vmatpush1.bf16.msra.mxu0 %v3140_v15  ;;  %413 = vmatpush1.bf16.msra.mxu1 %v3141_v16  ;;  %vm140_vm2 = vsmask.f32 7424  ;;  %v3160_v50 = vld [vmem:[#allocation4] ss:$16 sps:$4 sm:$0xff]   ;;  %v3163_v51 = vld [vmem:[#allocation4 + $0x8] ss:$16 sps:$4 sm:$0xff]  }
  0x23   :  { %341 = vmatprep.subr.bf16.mxu0 %v3142_v17  ;;  %414 = vmatprep.subr.bf16.mxu1 %v3144_v18  ;;  %v2854_v53 = vld [vmem:[%s5492_s0 + $0x18] sm:$0xf]  ;;  %v2855_v56 = vld [vmem:[%s5492_s0 + $0x1c] sm:$0xf]  ;;  %v3172_v60 = vld [vmem:[#allocation4 + $0x2c] ss:$16 sps:$4 sm:$0xff]  }
  0x24   :  { %v3371_v42 = vld [vmem:[#allocation2 + $0x4] sm:$0xf]  ;;  %52 = vst.msk [vmem:[#allocation2 + $0x18] sm:$0xf] %vm40_vm0, %v2854_v53  ;;  %v3168_v57 = vld [vmem:[#allocation4 + $0x24] ss:$16 sps:$4 sm:$0xff]  }
  0x25   :  { %v55_v41 = vld [vmem:[#allocation2] sm:$0xf]  ;;  %v3376_v44 = vld [vmem:[#allocation2 + $0x8] sm:$0xff]   ;;  %53 = vst.msk [vmem:[#allocation2 + $0x1c] sm:$0xf] %vm40_vm0, %v2855_v56  ;;  %vm806_vm4 = vcmask 1046528  }
  0x26   :  { %342 = vmatpush1.bf16.msra.mxu0 %v3146_v19  ;;  %415 = vmatpush1.bf16.msra.mxu1 %v3147_v20  ;;  %v3374_v43 = vcombine.low %v55_v41, %v3371_v42  ;;  %v149_v47 = vshll.u32 %v3376_v44, 16  ;;  %v153_v55 = vshrl.u32 %v3376_v44, 16  ;;  %v808_v61 = vrot.slane %v3376_v44, 1  ;;  %v3166_v63 = vld [vmem:[#allocation4 + $0x20] ss:$16 sps:$4 sm:$0xff]   ;;  %s3296_s19 = smov [#allocation7]  }
  0x27   :  { %343 = vmatprep.subr.bf16.mxu0 %v3148_v21  ;;  %416 = vmatprep.subr.bf16.mxu1 %v3150_v22  ;;  %v3170_v3 = vld [vmem:[#allocation4 + $0x28] ss:$16 sps:$4 sm:$0xff]   ;;  %v3175_v5 = vld [vmem:[#allocation4 + $0x44] ss:$16 sps:$4 sm:$0xff]   ;;  %v3178_v6 = vld [vmem:[#allocation4 + $0x4c] ss:$16 sps:$4 sm:$0xff]  }
  0x28   :  { %v142_v45 = vshrl.u32 %v3374_v43, 16  ;;  %v144_v46 = vshll.u32 %v3374_v43, 16  ;;  %v151_v49 = vrot.slane %v149_v47, 1  ;;  %v3381_v52 = vld [vmem:[#allocation2 + $0x10] sm:$0xff]   ;;  %v3176_v10 = vld [vmem:[#allocation4 + $0x48] ss:$16 sps:$4 sm:$0xff]  }
  0x29   :  { %v157_v58 = vshll.u32 %v3381_v52, 16  ;;  %v810_v62 = vrot.slane %v3381_v52, 1  ;;  %v3173_v7 = vld [vmem:[#allocation4 + $0x40] ss:$16 sps:$4 sm:$0xff]   ;;  %v161_v12 = vshrl.u32 %v3381_v52, 16  ;;  %vm1414_vm5 = vcmask 130112  }
  0x2a   :  { %344 = vmatpush1.bf16.msra.mxu0 %v3152_v29  ;;  %417 = vmatpush1.bf16.msra.mxu1 %v3153_v30  ;;  %v146_v48 = vrot.slane %v144_v46, 1  ;;  %v155_v1 = vor.u32 %v153_v55, %v151_v49  ;;  %v3195_v8 = vld [vmem:[#allocation2 + $0x20] ss:$0 sps:$4 sm:$0x11]   ;;  %v3181_v13 = vld [vmem:[#allocation4 + $0x64] ss:$16 sps:$4 sm:$0xff]  }
  0x2b   :  { %2889 = vmatprep.subr.msk.bf16.mxu0 %vm320_vm1, %v2886_v33  ;;  %2894 = vmatprep.subr.msk.bf16.mxu1 %vm320_vm1, %v2888_v34  ;;  %v159_v2 = vrot.slane %v157_v58, 1  ;;  %v3401_v4 = vsel %vm806_vm4, %v808_v61, %v810_v62  ;;  %v814_v14 = vrot.slane %v3195_v8, 1  ;;  %v3185_v16 = vld [vmem:[#allocation4 + $0x6c] ss:$16 sps:$4 sm:$0xff]   ;;  %v3179_v17 = vld [vmem:[#allocation4 + $0x60] ss:$16 sps:$4 sm:$0xff]  }
  0x2c   :  { %v147_v54 = vor.u32 %v146_v48, %v142_v45  ;;  %v3406_v11 = vld [vmem:[#allocation2 + $0x18] sm:$0xff]   ;;  %v3191_v23 = vld [vmem:[#allocation4 + $0x8c] ss:$16 sps:$4 sm:$0xff]   ;;  %v3186_v26 = vld [vmem:[#allocation4 + $0x80] ss:$16 sps:$4 sm:$0xff]   ;;  %v173_v31 = vshll.u32 %v3195_v8, 16 }
  0x2d   :  { %v160_v9 = vsel %vm140_vm2, %v155_v1, %v159_v2  ;;  %v165_v15 = vshll.u32 %v3406_v11, 16  ;;  %v812_v18 = vrot.slane %v3406_v11, 1  ;;  %v163_v19 = vor.u32 %v161_v12, %v159_v2  ;;  %v3183_v21 = vld [vmem:[#allocation4 + $0x68] ss:$16 sps:$4 sm:$0xff]   ;;  %v3188_v22 = vld [vmem:[#allocation4 + $0x84] ss:$16 sps:$4 sm:$0xff]  }
  0x2e   :  { %346 = vmatpush1.bf16.msra.mxu0 %v322_v39  ;;  %419 = vmatpush1.bf16.msra.mxu1 %v328_v40  ;;  %v152_v59 = vsel %vm140_vm2, %v147_v54, %v151_v49  ;;  %v3189_v27 = vld [vmem:[#allocation4 + $0x88] ss:$16 sps:$4 sm:$0xff]   ;;  %v3194_v29 = vld [vmem:[#allocation4 + $0xa4] ss:$16 sps:$4 sm:$0xff]   ;;  %v169_v30 = vshrl.u32 %v3406_v11, 16  ;;  %vm1421_vm6 = vcmask 195712  }
  0x2f   :  { %629 = vmatprep.subr.bf16.mxu0 %v3162_v37  ;;  %702 = vmatprep.subr.bf16.mxu1 %v3165_v38  ;;  %v167_v20 = vrot.slane %v165_v15, 1  ;;  %v3415_v24 = vsel %vm806_vm4, %v810_v62, %v812_v18  ;;  %v3418_v25 = vsel %vm806_vm4, %v812_v18, %v814_v14  ;;  %v3198_v32 = vld [vmem:[#allocation4 + $0xac] ss:$16 sps:$4 sm:$0xff]   ;;  %v87_v33 = vld [vmem:[#allocation4 + $0xc0] sm:$0x77]  ;;  %v175_v37 = vrot.slane %v173_v31, 1 }
  0x30   :  { %v88_v34 = vld [vmem:[#allocation4 + $0xc8] sm:$0x77]  ;;  %v3192_v35 = vld [vmem:[#allocation4 + $0xa0] ss:$16 sps:$4 sm:$0xff]   ;;  %v2924_v39 = vcombine.high %v87_v33, %v87_v33  ;;  %v2923_v41 = vcombine.low %v87_v33, %v87_v33  ;;  %v3205_v49 = vld [vmem:[#allocation4 + $0x1a4] ss:$16 sps:$4 sm:$0xff]  }
  0x31   :  { %2890 = vmatmul.mubr.msk.bf16.vlgmr.msra.gmra.mrb[0].mxu0 %vm307_vm3, %v152_v59  ;;  %2895 = vmatmul.mubr.msk.bf16.vlgmr.msra.gmra.mrb[0].mxu1 %vm307_vm3, %v152_v59  ;;  %v168_v28 = vsel %vm140_vm2, %v163_v19, %v167_v20  ;;  %v171_v36 = vor.u32 %v169_v30, %v167_v20  ;;  %v3196_v38 = vld [vmem:[#allocation4 + $0xa8] ss:$16 sps:$4 sm:$0xff]   ;;  %v2926_v40 = vcombine.high %v88_v34, %v88_v34  ;;  %v3203_v55 = vld [vmem:[#allocation4 + $0x1a0] ss:$16 sps:$4 sm:$0xff]   ;;  %v3211_v58 = vld [vmem:[#allocation4 + $0x1c4] ss:$16 sps:$4 sm:$0xff]  }
  0x32   :  { %630 = vmatpush1.bf16.msra.mxu0 %v3160_v50  ;;  %703 = vmatpush1.bf16.msra.mxu1 %v3163_v51  ;;  %v2925_v45 = vcombine.low %v88_v34, %v88_v34  ;;  %v618_v47 = vsel %vm320_vm1, %v2923_v41, 0  ;;  %v3208_v50 = vld [vmem:[#allocation4 + $0x1ac] ss:$16 sps:$4 sm:$0xff]   ;;  %v3206_v56 = vld [vmem:[#allocation4 + $0x1a8] ss:$16 sps:$4 sm:$0xff]   ;;  %vm1428_vm7 = vcmask 261312  }
  0x33   :  { %631 = vmatprep.subr.bf16.mxu0 %v3168_v57  ;;  %375 = vmatprep.mubr.bf16.mxu0 %v3295_v0  ;;  %v176_v46 = vsel %vm140_vm2, %v171_v36, %v175_v37  ;;  %v775_v51 = vld [vmem:[#allocation2] sm:$0xe]  ;;  %v3217_v62 = vld [vmem:[#allocation4 + $0x1e4] ss:$16 sps:$4 sm:$0xff]   ;;  %v3218_v1 = vld [vmem:[#allocation4 + $0x1e8] ss:$16 sps:$4 sm:$0xff]  }
  0x34   :  { %448 = vmatprep.mubr.bf16.mxu1 %v3295_v0  ;;  %704 = vmatprep.subr.bf16.mxu1 %v3172_v60  ;;  %v624_v48 = vsel %vm320_vm1, %v2925_v45, 0  ;;  %v2937_v53 = vcombine.low %v775_v51, %v3371_v42  ;;  %v3214_v59 = vld [vmem:[#allocation4 + $0x1cc] ss:$16 sps:$4 sm:$0xff]   ;;  %v3209_v42 = vld [vmem:[#allocation4 + $0x1c0] ss:$16 sps:$4 sm:$0xff]   ;;  %v3538_v34 = vld [vmem:[%s5495_s3 + $0x88] sm:$0xff] }
  0x35   :  { %v3212_v60 = vld [vmem:[#allocation4 + $0x1c8] ss:$16 sps:$4 sm:$0xff]   ;;  %v3223_v2 = vld [vmem:[#allocation4 + $0x204] ss:$16 sps:$4 sm:$0xff]   ;;  %v3227_v8 = vld [vmem:[#allocation4 + $0x220] ss:$16 sps:$4 sm:$0xff]  }
  0x36   :  { %632 = vmatpush1.bf16.msra.mxu0 %v3166_v63  ;;  %705 = vmatpush1.bf16.msra.mxu1 %v3170_v3  ;;  %v807_v54 = vrot.slane %v2937_v53, 1  ;;  %v3220_v63 = vld [vmem:[#allocation4 + $0x1ec] ss:$16 sps:$4 sm:$0xff]   ;;  %v3221_v3 = vld [vmem:[#allocation4 + $0x200] ss:$16 sps:$4 sm:$0xff]   ;;  %5667 = vst [vmem:[#allocation16_spill] sm:$0xff] %v3538_v34 }
  0x37   :  { %633 = vmatprep.subr.bf16.mxu0 %v3175_v5  ;;  %706 = vmatprep.subr.bf16.mxu1 %v3178_v6  ;;  %v3224_v5 = vld [vmem:[#allocation4 + $0x208] ss:$16 sps:$4 sm:$0xff]   ;;  %v3229_v6 = vld [vmem:[#allocation4 + $0x224] ss:$16 sps:$4 sm:$0xff]   ;;  %v3238_v12 = vld [vmem:[#allocation4 + $0x24c] ss:$16 sps:$4 sm:$0xff]  }
  0x38   :  { %v3440_v57 = vsel %vm806_vm4, %v807_v54, %v808_v61  ;;  %v3215_v61 = vld [vmem:[#allocation4 + $0x1e0] ss:$16 sps:$4 sm:$0xff]   ;;  %v3236_v15 = vld [vmem:[#allocation4 + $0x248] ss:$16 sps:$4 sm:$0xff]   ;;  %vm1449_vm8 = vcmask 1041409   ;;  %vm1452_vm9 = vcmask 254976  }
  0x39   :  { %2891 = vmatmul.mubr.msk.bf16.gmra.mrb[4].mxu0 %vm307_vm3, %v160_v9  ;;  %2896 = vmatmul.mubr.msk.bf16.gmra.mrb[4].mxu1 %vm307_vm3, %v160_v9  ;;  %v3230_v9 = vld [vmem:[#allocation4 + $0x228] ss:$16 sps:$4 sm:$0xff]   ;;  %v3233_v14 = vld [vmem:[#allocation4 + $0x240] ss:$16 sps:$4 sm:$0xff]   ;;  %s2843_s20 = sshll.u32 %s3296_s19, 4  ;;  %s2844_s20 = int_to_ptr.vmem [resolvable:$true] %s2843_s20 }
  0x3a   :  { %634 = vmatpush1.bf16.msra.mxu0 %v3173_v7  ;;  %707 = vmatpush1.bf16.msra.mxu1 %v3176_v10  ;;  %v3232_v7 = vld [vmem:[#allocation4 + $0x22c] ss:$16 sps:$4 sm:$0xff]   ;;  %v801_v10 = vld [vmem:[#allocation4 + $0x260] sm:$0x77]  ;;  %s3266_s21 = scalar_lea.vmem %s2844_s20, 32  ;;  %p3271_p9 = scmp.lt.s32.totalorder %s2844_s20, %s2844_s20 }
  0x3b   :  { %635 = vmatprep.subr.bf16.mxu0 %v3181_v13  ;;  %385 = vmatprep.mubr.bf16.mxu0 %v3295_v0  ;;  %v802_v13 = vld [vmem:[#allocation4 + $0x268] sm:$0x77]  ;;  %v2962_v18 = vcombine.low %v801_v10, %v801_v10  ;;  %v3533_v33 = vld [vmem:[%s5495_s3 + $0x80] sm:$0xff]  ;;  %p3267_p8 = scmp.ne.s32.totalorder %s2844_s20, %s3266_s21  ;;  %p3272_p10 = scmp.lt.s32.totalorder %s3266_s21, %s3266_s21 }
  0x3c   :  { %458 = vmatprep.mubr.bf16.mxu1 %v3295_v0  ;;  %708 = vmatprep.subr.bf16.mxu1 %v3185_v16  ;;  %v2963_v16 = vcombine.high %v801_v10, %v801_v10  ;;  %v2964_v19 = vcombine.low %v802_v13, %v802_v13  ;;  %5666 = vst [vmem:[#allocation15_spill] sm:$0xff] %v3533_v33  ;;  %v3622_v10 = vld [vmem:[%s5495_s3 + $0x148] sm:$0xff]  ;;  %v3855_v51 = vld [vmem:[%s5495_s3 + $0x160] sm:$0xff]  ;;  %v3911_v37 = vld [vmem:[%s5495_s3 + $0x30] sm:$0xff] }
  0x3d   :  { %5675 = vst [vmem:[#allocation24_spill] sm:$0xff] %v3622_v10  ;;  %v3804_v54 = vld [vmem:[%s5495_s3 + $0x68] sm:$0xff]  ;;  %5702 = vst [vmem:[#allocation51_spill] sm:$0xff] %v3855_v51  ;;  %v3925_v41 = vld [vmem:[%s5495_s3 + $0x70] sm:$0xff]  ;;  %p3273_p11 = por %p3272_p10, %p3271_p9 }
  0x3e   :  { %636 = vmatpush1.bf16.msra.mxu0 %v3179_v17  ;;  %709 = vmatpush1.bf16.msra.mxu1 %v3183_v21  ;;  %v2965_v17 = vcombine.high %v802_v13, %v802_v13  ;;  %v965_v20 = vsel %vm320_vm1, %v2964_v19, 0  ;;  %v3729_v19 = vld [vmem:[%s5495_s3 + $0x190] sm:$0xff]  ;;  %5695 = vst [vmem:[#allocation44_spill] sm:$0xff] %v3804_v54  ;;  %v3818_v53 = vld [vmem:[%s5495_s3 + $0xa8] sm:$0xff]  ;;  %v3883_v13 = vld [vmem:[%s5495_s3 + $0x1e0] sm:$0xff] }
  0x3f   :  { %637 = vmatprep.subr.bf16.mxu0 %v3188_v22  ;;  %710 = vmatprep.subr.bf16.mxu1 %v3191_v23  ;;  %5684 = vst [vmem:[#allocation33_spill] sm:$0xff] %v3729_v19  ;;  %5697 = vst [vmem:[#allocation46_spill] sm:$0xff] %v3818_v53  ;;  %v3860_v45 = vld [vmem:[%s5495_s3 + $0x168] sm:$0xff]  ;;  %v3981_v51 = vld [vmem:[%s5495_s3 + $0x170] sm:$0xff]  ;;  %p3274_p12 = pnand %p3273_p11, %p3267_p8 }
  0x40   :  { %5703 = vst [vmem:[#allocation52_spill] sm:$0xff] %v3860_v45  ;;  %v3874_v36 = vld [vmem:[%s5495_s3 + $0x1a8] sm:$0xff]  ;;  %5706 = vst [vmem:[#allocation55_spill] sm:$0xff] %v3883_v13  ;;  %v3916_v45 = vld [vmem:[%s5495_s3 + $0x38] sm:$0xff] }
  0x41   :  { %2892 = vmatmul.mubr.msk.bf16.gmra.mrb[8].mxu0 %vm307_vm3, %v168_v28  ;;  %2897 = vmatmul.mubr.msk.bf16.gmra.mrb[8].mxu1 %vm307_vm3, %v168_v28  ;;  %v3520_v28 = vld [vmem:[%s5495_s3 + $0x8] sm:$0xff]  ;;  %5705 = vst [vmem:[#allocation54_spill] sm:$0xff] %v3874_v36  ;;  %5710 = vst [vmem:[#allocation59_spill] sm:$0xff] %v3911_v37  ;;  %v3930_v36 = vld [vmem:[%s5495_s3 + $0x78] sm:$0xff] }
  0x42   :  { %638 = vmatpush1.bf16.msra.mxu0 %v3186_v26  ;;  %711 = vmatpush1.bf16.msra.mxu1 %v3189_v27  ;;  %v3510_v26 = vld [vmem:[%s5495_s3 + $0x48] sm:$0xff]  ;;  %v3515_v27 = vld [vmem:[%s5495_s3] sm:$0xff]  ;;  %5665 = vst [vmem:[#allocation14_spill] sm:$0xff] %v3520_v28  ;;  %5711 = vst [vmem:[#allocation60_spill] sm:$0xff] %v3916_v45 }
  0x43   :  { %395 = vmatprep.mubr.bf16.mxu0 %v3295_v0  ;;  %468 = vmatprep.mubr.bf16.mxu1 %v3295_v0  ;;  %5663 = vst [vmem:[#allocation12_spill] sm:$0xff] %v3510_v26  ;;  %5664 = vst [vmem:[#allocation13_spill] sm:$0xff] %v3515_v27  ;;  %v3972_v45 = vld [vmem:[%s5495_s3 + $0x138] sm:$0xff] }
  0x44   :  { %639 = vmatprep.subr.bf16.mxu0 %v3194_v29  ;;  %712 = vmatprep.subr.bf16.mxu1 %v3198_v32  ;;  %5712 = vst [vmem:[#allocation61_spill] sm:$0xff] %v3925_v41  ;;  %5713 = vst [vmem:[#allocation62_spill] sm:$0xff] %v3930_v36  ;;  %v3990_v13 = vld [vmem:[%s5495_s3 + $0x178] sm:$0xff] }
  0x45   :  { %5719 = vst [vmem:[#allocation68_spill] sm:$0xff] %v3972_v45  ;;  %5720 = vst [vmem:[#allocation69_spill] sm:$0xff] %v3981_v51  ;;  %v4008_v54 = vld [vmem:[%s5495_s3 + $0x1b8] sm:$0xff] }
  0x46   :  { %640 = vmatpush1.bf16.msra.mxu0 %v3192_v35  ;;  %713 = vmatpush1.bf16.msra.mxu1 %v3196_v38  ;;  %v3869_v38 = vld [vmem:[%s5495_s3 + $0x1a0] sm:$0xff]  ;;  %v3939_v35 = vld [vmem:[%s5495_s3 + $0xb0] sm:$0xff]  ;;  %5721 = vst [vmem:[#allocation70_spill] sm:$0xff] %v3990_v13  ;;  %5723 = vst [vmem:[#allocation72_spill] sm:$0xff] %v4008_v54 }
  0x47   :  { %2927 = vmatprep.subr.msk.bf16.mxu0 %vm320_vm1, %v2924_v39  ;;  %2932 = vmatprep.subr.msk.bf16.mxu1 %vm320_vm1, %v2926_v40  ;;  %v3547_v39 = vld [vmem:[%s5495_s3 + $0x10] sm:$0xff]  ;;  %v3552_v40 = vld [vmem:[%s5495_s3 + $0x18] sm:$0xff]  ;;  %5704 = vst [vmem:[#allocation53_spill] sm:$0xff] %v3869_v38  ;;  %5714 = vst [vmem:[#allocation63_spill] sm:$0xff] %v3939_v35 }
  0x48   :  { %5668 = vst [vmem:[#allocation17_spill] sm:$0xff] %v3547_v39  ;;  %5669 = vst [vmem:[#allocation18_spill] sm:$0xff] %v3552_v40 }
  0x49   :  { %2893 = vmatmul.mubr.msk.bf16.gmra.mrb[12].mxu0 %vm307_vm3, %v176_v46  ;;  %2898 = vmatmul.mubr.msk.bf16.gmra.mrb[12].mxu1 %vm307_vm3, %v176_v46  ;;  %v3846_v46 = vld [vmem:[%s5495_s3 + $0x128] sm:$0xff] }
  0x4a   :  { %642 = vmatpush1.bf16.msra.mxu0 %v618_v47  ;;  %715 = vmatpush1.bf16.msra.mxu1 %v624_v48  ;;  %v3561_v48 = vld [vmem:[%s5495_s3 + $0xc0] sm:$0xff]  ;;  %v3832_v47 = vld [vmem:[%s5495_s3 + $0xe8] sm:$0xff]  ;;  %5701 = vst [vmem:[#allocation50_spill] sm:$0xff] %v3846_v46 }
  0x4b   :  { %661 = vmatprep.mubr.bf16.mxu0 %v3295_v0  ;;  %734 = vmatprep.mubr.bf16.mxu1 %v3295_v0  ;;  %5670 = vst [vmem:[#allocation19_spill] sm:$0xff] %v3561_v48  ;;  %5699 = vst [vmem:[#allocation48_spill] sm:$0xff] %v3832_v47  ;;  %v3902_v46 = vld [vmem:[%s5495_s3 + $0x228] sm:$0xff]  ;;  %v3953_v47 = vld [vmem:[%s5495_s3 + $0xf0] sm:$0xff] }
  0x4c   :  { %970 = vmatprep.subr.bf16.mxu0 %v3205_v49  ;;  %1043 = vmatprep.subr.bf16.mxu1 %v3208_v50  ;;  %v3566_v49 = vld [vmem:[%s5495_s3 + $0xc8] sm:$0xff]  ;;  %v3841_v50 = vld [vmem:[%s5495_s3 + $0x120] sm:$0xff]  ;;  %5709 = vst [vmem:[#allocation58_spill] sm:$0xff] %v3902_v46  ;;  %5716 = vst [vmem:[#allocation65_spill] sm:$0xff] %v3953_v47 }
  0x4d   :  { %5671 = vst [vmem:[#allocation20_spill] sm:$0xff] %v3566_v49  ;;  %5700 = vst [vmem:[#allocation49_spill] sm:$0xff] %v3841_v50  ;;  %v3958_v46 = vld [vmem:[%s5495_s3 + $0xf8] sm:$0xff]  ;;  %v3967_v50 = vld [vmem:[%s5495_s3 + $0x130] sm:$0xff] }
  0x4e   :  { %5717 = vst [vmem:[#allocation66_spill] sm:$0xff] %v3958_v46  ;;  %5718 = vst [vmem:[#allocation67_spill] sm:$0xff] %v3967_v50 }
  0x51   :  { %2928 = vmatmul.mubr.msk.bf16.vlgmr.msra.gmra.mrb[0].mxu0 %vm307_vm3, %v3374_v43  ;;  %2933 = vmatmul.mubr.msk.bf16.vlgmr.msra.gmra.mrb[0].mxu1 %vm307_vm3, %v3374_v43  ;;  %v3226_v43 = vld [vmem:[#allocation4 + $0x20c] ss:$16 sps:$4 sm:$0xff]  }
  0x52   :  { %971 = vmatpush1.bf16.msra.mxu0 %v3203_v55  ;;  %1044 = vmatpush1.bf16.msra.mxu1 %v3206_v56  ;;  %v3575_v55 = vld [vmem:[%s5495_s3 + $0x50] sm:$0xff]  ;;  %v3580_v56 = vld [vmem:[%s5495_s3 + $0x58] sm:$0xff] }
  0x53   :  { %972 = vmatprep.subr.bf16.mxu0 %v3211_v58  ;;  %671 = vmatprep.mubr.bf16.mxu0 %v3295_v0  ;;  %v3785_v58 = vld [vmem:[%s5495_s3 + $0x20] sm:$0xff] }
  0x54   :  { %744 = vmatprep.mubr.bf16.mxu1 %v3295_v0  ;;  %1045 = vmatprep.subr.bf16.mxu1 %v3214_v59  ;;  %5692 = vst [vmem:[#allocation41_spill] sm:$0xff] %v3785_v58  ;;  %v3790_v59 = vld [vmem:[%s5495_s3 + $0x28] sm:$0xff] }
  0x55   :  { %5693 = vst [vmem:[#allocation42_spill] sm:$0xff] %v3790_v59 }
  0x56   :  { %973 = vmatpush1.bf16.msra.mxu0 %v3209_v42  ;;  %1046 = vmatpush1.bf16.msra.mxu1 %v3212_v60  ;;  %v3589_v60 = vld [vmem:[%s5495_s3 + $0x100] sm:$0xff]  ;;  %v3762_v42 = vld [vmem:[%s5495_s3 + $0x218] sm:$0xff] }
  0x57   :  { %974 = vmatprep.subr.bf16.mxu0 %v3217_v62  ;;  %1047 = vmatprep.subr.bf16.mxu1 %v3220_v63  ;;  %5672 = vst [vmem:[#allocation21_spill] sm:$0xff] %v3589_v60  ;;  %v3594_v62 = vld [vmem:[%s5495_s3 + $0x108] sm:$0xff]  ;;  %5689 = vst [vmem:[#allocation38_spill] sm:$0xff] %v3762_v42  ;;  %v3799_v63 = vld [vmem:[%s5495_s3 + $0x60] sm:$0xff] }
  0x58   :  { %5673 = vst [vmem:[#allocation22_spill] sm:$0xff] %v3594_v62  ;;  %5694 = vst [vmem:[#allocation43_spill] sm:$0xff] %v3799_v63 }
  0x59   :  { %2929 = vmatmul.mubr.msk.bf16.gmra.mrb[4].mxu0 %vm307_vm3, %v3376_v44  ;;  %2934 = vmatmul.mubr.msk.bf16.gmra.mrb[4].mxu1 %vm307_vm3, %v3376_v44  ;;  %v3235_v44 = vld [vmem:[#allocation4 + $0x244] ss:$16 sps:$4 sm:$0xff]  }
  0x5a   :  { %975 = vmatpush1.bf16.msra.mxu0 %v3215_v61  ;;  %1048 = vmatpush1.bf16.msra.mxu1 %v3218_v1  ;;  %v3776_v1 = vld [vmem:[%s5495_s3 + $0x258] sm:$0xff]  ;;  %v3897_v61 = vld [vmem:[%s5495_s3 + $0x220] sm:$0xff] }
  0x5b   :  { %976 = vmatprep.subr.bf16.mxu0 %v3223_v2  ;;  %681 = vmatprep.mubr.bf16.mxu0 %v3295_v0  ;;  %v3753_v2 = vld [vmem:[%s5495_s3 + $0x210] sm:$0xff]  ;;  %5691 = vst [vmem:[#allocation40_spill] sm:$0xff] %v3776_v1  ;;  %5708 = vst [vmem:[#allocation57_spill] sm:$0xff] %v3897_v61 }
  0x5c   :  { %754 = vmatprep.mubr.bf16.mxu1 %v3295_v0  ;;  %1049 = vmatprep.subr.bf16.mxu1 %v3226_v43  ;;  %v3603_v43 = vld [vmem:[%s5495_s3 + $0x90] sm:$0xff]  ;;  %5688 = vst [vmem:[#allocation37_spill] sm:$0xff] %v3753_v2 }
  0x5e   :  { %977 = vmatpush1.bf16.msra.mxu0 %v3221_v3  ;;  %1050 = vmatpush1.bf16.msra.mxu1 %v3224_v5  ;;  %v3608_v3 = vld [vmem:[%s5495_s3 + $0x98] sm:$0xff]  ;;  %v3613_v5 = vld [vmem:[%s5495_s3 + $0x140] sm:$0xff] }
  0x5f   :  { %978 = vmatprep.subr.bf16.mxu0 %v3229_v6  ;;  %1051 = vmatprep.subr.bf16.mxu1 %v3232_v7  ;;  %5674 = vst [vmem:[#allocation23_spill] sm:$0xff] %v3613_v5  ;;  %v3734_v7 = vld [vmem:[%s5495_s3 + $0x198] sm:$0xff] }
  0x60   :  { %5685 = vst [vmem:[#allocation34_spill] sm:$0xff] %v3734_v7  ;;  %v3748_v6 = vld [vmem:[%s5495_s3 + $0x1d8] sm:$0xff] }
  0x61   :  { %2930 = vmatmul.mubr.msk.bf16.gmra.mrb[8].mxu0 %vm307_vm3, %v3381_v52  ;;  %2935 = vmatmul.mubr.msk.bf16.gmra.mrb[8].mxu1 %vm307_vm3, %v3381_v52  ;;  %v959_v52 = vsel %vm320_vm1, %v2962_v18, 0  ;;  %v3743_v18 = vld [vmem:[%s5495_s3 + $0x1d0] sm:$0xff]  ;;  %5687 = vst [vmem:[#allocation36_spill] sm:$0xff] %v3748_v6 }
  0x62   :  { %979 = vmatpush1.bf16.msra.mxu0 %v3227_v8  ;;  %1052 = vmatpush1.bf16.msra.mxu1 %v3230_v9  ;;  %5686 = vst [vmem:[#allocation35_spill] sm:$0xff] %v3743_v18  ;;  %v3771_v9 = vld [vmem:[%s5495_s3 + $0x250] sm:$0xff]  ;;  %v3827_v8 = vld [vmem:[%s5495_s3 + $0xe0] sm:$0xff] }
  0x63   :  { %691 = vmatprep.mubr.bf16.mxu0 %v3295_v0  ;;  %764 = vmatprep.mubr.bf16.mxu1 %v3295_v0  ;;  %5690 = vst [vmem:[#allocation39_spill] sm:$0xff] %v3771_v9  ;;  %5698 = vst [vmem:[#allocation47_spill] sm:$0xff] %v3827_v8 }
  0x64   :  { %980 = vmatprep.subr.bf16.mxu0 %v3235_v44  ;;  %1053 = vmatprep.subr.bf16.mxu1 %v3238_v12  ;;  %v3706_v12 = vld [vmem:[%s5495_s3 + $0x158] sm:$0xff]  ;;  %v3720_v44 = vld [vmem:[%s5495_s3 + $0x248] sm:$0xff] }
  0x65   :  { %5683 = vst [vmem:[#allocation32_spill] sm:$0xff] %v3720_v44 }
  0x66   :  { %981 = vmatpush1.bf16.msra.mxu0 %v3233_v14  ;;  %1054 = vmatpush1.bf16.msra.mxu1 %v3236_v15  ;;  %v3631_v15 = vld [vmem:[%s5495_s3 + $0x180] sm:$0xff]  ;;  %v3678_v14 = vld [vmem:[%s5495_s3 + $0x118] sm:$0xff] }
  0x67   :  { %2966 = vmatprep.subr.msk.bf16.mxu0 %vm320_vm1, %v2963_v16  ;;  %2971 = vmatprep.subr.msk.bf16.mxu1 %vm320_vm1, %v2965_v17  ;;  %5676 = vst [vmem:[#allocation25_spill] sm:$0xff] %v3631_v15  ;;  %v3636_v16 = vld [vmem:[%s5495_s3 + $0x188] sm:$0xff] }
  0x68   :  { %5677 = vst [vmem:[#allocation26_spill] sm:$0xff] %v3636_v16  ;;  %v3692_v17 = vld [vmem:[%s5495_s3 + $0x208] sm:$0xff] }
  0x69   :  { %2931 = vmatmul.mubr.msk.bf16.gmra.mrb[12].mxu0 %vm307_vm3, %v3406_v11  ;;  %2936 = vmatmul.mubr.msk.bf16.gmra.mrb[12].mxu1 %vm307_vm3, %v3406_v11  ;;  %5681 = vst [vmem:[#allocation30_spill] sm:$0xff] %v3692_v17 }
  0x6a   :  { %983 = vmatpush1.bf16.msra.mxu0 %v959_v52  ;;  %1056 = vmatpush1.bf16.msra.mxu1 %v965_v20  ;;  %v3645_v20 = vld [vmem:[%s5495_s3 + $0xd0] sm:$0xff]  ;;  %v3664_v52 = vld [vmem:[%s5495_s3 + $0x1c8] sm:$0xff] }
  0x6b   :  { %1002 = vmatprep.mubr.bf16.mxu0 %v3295_v0  ;;  %1075 = vmatprep.mubr.bf16.mxu1 %v3295_v0  ;;  %5679 = vst [vmem:[#allocation28_spill] sm:$0xff] %v3664_v52 }
  0x71   :  { %2967 = vmatmul.mubr.msk.bf16.vlgmr.msra.gmra.mrb[0].mxu0 %vm307_vm3, %v3440_v57  ;;  %2972 = vmatmul.mubr.msk.bf16.vlgmr.msra.gmra.mrb[0].mxu1 %vm307_vm3, %v3440_v57  ;;  %v3809_v57 = vld [vmem:[%s5495_s3 + $0xa0] sm:$0xff] }
  0x72   :  { %1012 = vmatprep.mubr.bf16.mxu0 %v3295_v0  ;;  %1085 = vmatprep.mubr.bf16.mxu1 %v3295_v0  ;;  %5696 = vst [vmem:[#allocation45_spill] sm:$0xff] %v3809_v57  ;;  %v3999_v57 = vld [vmem:[%s5495_s3 + $0x1b0] sm:$0xff] }
  0x73   :  { %5722 = vst [vmem:[#allocation71_spill] sm:$0xff] %v3999_v57 }
  0x79   :  { %2968 = vmatmul.mubr.msk.bf16.gmra.mrb[4].mxu0 %vm307_vm3, %v3401_v4  ;;  %2973 = vmatmul.mubr.msk.bf16.gmra.mrb[4].mxu1 %vm307_vm3, %v3401_v4  ;;  %v5498_v4 = vlaneseq }
  0x7a   :  { %1022 = vmatprep.mubr.bf16.mxu0 %v3295_v0  ;;  %1095 = vmatprep.mubr.bf16.mxu1 %v3295_v0 }
  0x7b   :  { %v3493_v11 = vshrl.u32 %v5498_v4, 7  ;;  %v3659_v4 = vld [vmem:[%s5495_s3 + $0x1c0] sm:$0xff] }
  0x7c   :  { %5678 = vst [vmem:[#allocation27_spill] sm:$0xff] %v3659_v4 }
  0x7d   :  { %5661 = vst [vmem:[#allocation10_spill] sm:$0xff] %v3493_v11  ;;  %v1152_v21 = vsub.s32 0, %v3493_v11  ;;  %v1160_v22 = vsub.s32 2, %v3493_v11  ;;  %v1156_v23 = vsub.s32 1, %v3493_v11 }
  0x81   :  { %2969 = vmatmul.mubr.msk.bf16.gmra.mrb[8].mxu0 %vm307_vm3, %v3415_v24  ;;  %2974 = vmatmul.mubr.msk.bf16.gmra.mrb[8].mxu1 %vm307_vm3, %v3415_v24  ;;  %v1164_v24 = vsub.s32 3, %v3493_v11  ;;  %v3888_v11 = vld [vmem:[%s5495_s3 + $0x1e8] sm:$0xff] }
  0x82   :  { %1032 = vmatprep.mubr.bf16.mxu0 %v3295_v0  ;;  %1105 = vmatprep.mubr.bf16.mxu1 %v3295_v0  ;;  %v1148_v0 = vld [vmem:[%s5494_s2] sm:$0xf]  ;;  %5707 = vst [vmem:[#allocation56_spill] sm:$0xff] %v3888_v11  ;;  %v3944_v11 = vld [vmem:[%s5495_s3 + $0xb8] sm:$0xff] }
  0x83   :  { %v3522_v29 = vrot.slane %v1148_v0, %v1152_v21  ;;  %v3524_v30 = vrot.slane %v1148_v0, %v1160_v22  ;;  %v3526_v31 = vrot.slane %v1148_v0, %v1156_v23  ;;  %v3528_v32 = vrot.slane %v1148_v0, %v1164_v24  ;;  %v3650_v21 = vld [vmem:[%s5495_s3 + $0xd8] sm:$0xff]  ;;  %v3673_v0 = vld [vmem:[%s5495_s3 + $0x110] sm:$0xff]  ;;  %v3687_v24 = vld [vmem:[%s5495_s3 + $0x200] sm:$0xff]  ;;  %5715 = vst [vmem:[#allocation64_spill] sm:$0xff] %v3944_v11 }
  0x84   :  { %5680 = vst [vmem:[#allocation29_spill] sm:$0xff] %v3687_v24  ;;  %v3701_v23 = vld [vmem:[%s5495_s3 + $0x150] sm:$0xff]  ;;  %v3715_v22 = vld [vmem:[%s5495_s3 + $0x240] sm:$0xff] }
  0x85   :  { %5682 = vst [vmem:[#allocation31_spill] sm:$0xff] %v3715_v22 }
  0x89   :  { %2970 = vmatmul.mubr.msk.bf16.gmra.mrb[12].mxu0 %vm307_vm3, %v3418_v25  ;;  %2975 = vmatmul.mubr.msk.bf16.gmra.mrb[12].mxu1 %vm307_vm3, %v3418_v25  ;;  %v3505_v25 = vld [vmem:[%s5495_s3 + $0x40] sm:$0xff] }
  0x8a   :  { %5662 = vst [vmem:[#allocation11_spill] sm:$0xff] %v3505_v25  ;;  %v5726_v59 = vunpack.c.l.bf16 %v3505_v25  ;;  %v5727_v45 = vunpack.c.h.bf16 %v3505_v25  ;;  %v5730_v25 = vunpack.c.l.bf16 %v3510_v26 }
 0x144   :  { %v1004_v36 = vpop.f32.mrb[0].mxu0  ;;  %v1077_v41 = vpop.f32.mrb[0].mxu1 }
 0x145   :  { %v1170_v38 = vadd.f32 %v3522_v29, %v1004_v36  ;;  %v1172_v61 = vadd.f32 %v3524_v30, %v1077_v41  ;;  %v1006_v11 = vpop.f32.mrb[1].mxu0  ;;  %v1079_v35 = vpop.f32.mrb[1].mxu1  ;;  %v4018_v36 = vld [vmem:[%s5495_s3 + $0x1f0] sm:$0xff] }
 0x146   :  { %v1171_v37 = vadd.f32 %v3526_v31, %v1006_v11  ;;  %v1008_v8 = vpop.f32.mrb[2].mxu0  ;;  %v1081_v46 = vpop.f32.mrb[2].mxu1  ;;  %v1173_v63 = vadd.f32 %v3528_v32, %v1079_v35  ;;  %5724 = vst [vmem:[#allocation73_spill] sm:$0xff] %v4018_v36  ;;  %v4029_v35 = vld [vmem:[%s5495_s3 + $0x1f8] sm:$0xff] }
 0x147   :  { %v4010_v53 = vmax.f32 %v1170_v38, 0.0  ;;  %v1010_v1 = vpop.f32.mrb[3].mxu0  ;;  %v1083_v9 = vpop.f32.mrb[3].mxu1  ;;  %v4020_v41 = vmax.f32 %v1172_v61, 0.0  ;;  %5725 = vst [vmem:[#allocation74_spill] sm:$0xff] %v4029_v35  ;;  %v1174_v50 = vadd.f32 %v3522_v29, %v1008_v8  ;;  %v5729_v61 = vunpack.c.h.bf16 %v3515_v27 }
 0x148   :  { %v4022_v47 = vmax.f32 %v1171_v37, 0.0  ;;  %v1175_v38 = vadd.f32 %v3526_v31, %v1010_v1  ;;  %v4043_v42 = vmax.f32 %v1173_v63, 0.0  ;;  %v5731_v63 = vunpack.c.l.bf16 %v3533_v33 }
 0x149   :  { %v1485_v11 = vmul.f32 %v5726_v59, %v4010_v53  ;;  %v5728_v59 = vunpack.c.l.bf16 %v3515_v27  ;;  %v1176_v27 = vadd.f32 %v3524_v30, %v1081_v46  ;;  %v4064_v22 = vmax.f32 %v1174_v50, 0.0 }
 0x14a   :  { %v1486_v13 = vmul.f32 %v5727_v45, %v4022_v47  ;;  %v1326_v37 = vmul.f32 %v5729_v61, %v4022_v47  ;;  %v1487_v45 = vmul.f32 %v5730_v25, %v4020_v41  ;;  %v1637_v58 = vmul.f32 %v5731_v63, %v4010_v53 }
 0x14b   :  { %v1325_v51 = vmul.f32 %v5728_v59, %v4010_v53  ;;  %v5732_v59 = vunpack.c.h.bf16 %v3533_v33  ;;  %v1177_v61 = vadd.f32 %v3528_v32, %v1083_v9  ;;  %v4066_v25 = vmax.f32 %v1175_v38, 0.0 }
 0x14c   :  { %v1014_v54 = vpop.f32.mrb[4].mxu0  ;;  %v1087_v1 = vpop.f32.mrb[4].mxu1  ;;  %v1517_v57 = vadd.f32 %v1486_v13, %v1485_v11  ;;  %v5733_v9 = vunpack.c.h.bf16 %v3510_v26  ;;  %v5734_v50 = vunpack.c.l.bf16 %v3520_v28 }
 0x14d   :  { %v1638_v2 = vmul.f32 %v5732_v59, %v4022_v47  ;;  %v1016_v8 = vpop.f32.mrb[5].mxu0  ;;  %v1089_v6 = vpop.f32.mrb[5].mxu1  ;;  %v1357_v18 = vadd.f32 %v1326_v37, %v1325_v51  ;;  %v4091_v26 = vmax.f32 %v1177_v61, 0.0 }
 0x14e   :  { %v1018_v13 = vpop.f32.mrb[6].mxu0  ;;  %v1091_v11 = vpop.f32.mrb[6].mxu1  ;;  %v1518_v63 = vadd.f32 %v1517_v57, %v1487_v45  ;;  %v1488_v51 = vmul.f32 %v5733_v9, %v4043_v42  ;;  %v1327_v37 = vmul.f32 %v5734_v50, %v4020_v41  ;;  %v5738_v9 = vunpack.c.h.bf16 %v3520_v28 }
 0x14f   :  { %v1669_v7 = vadd.f32 %v1638_v2, %v1637_v58  ;;  %v1182_v33 = vadd.f32 %v3522_v29, %v1018_v13  ;;  %v1184_v59 = vadd.f32 %v3524_v30, %v1091_v11  ;;  %v1020_v46 = vpop.f32.mrb[7].mxu0  ;;  %v1093_v19 = vpop.f32.mrb[7].mxu1  ;;  %v5737_v58 = vunpack.c.l.bf16 %v3538_v34 }
 0x150   :  { %v4077_v38 = vadd.f32 %v3526_v31, %v1020_v46  ;;  %v4080_v57 = vadd.f32 %v3528_v32, %v1093_v19  ;;  %v4086_v13 = vmax.f32 %v1176_v27, 0.0  ;;  %v1519_v11 = vadd.f32 %v1518_v63, %v1488_v51  ;;  %v4102_v27 = vld [vmem:[%s5495_s3 + $0x260] sm:$0xff] }
 0x151   :  { %v1639_v2 = vmul.f32 %v5737_v58, %v4020_v41  ;;  %v1328_v44 = vmul.f32 %v5738_v9, %v4043_v42  ;;  %v1358_v50 = vadd.f32 %v1357_v18, %v1327_v37  ;;  %v5739_v19 = vunpack.c.h.bf16 %v3538_v34  ;;  %5741 = vst [vmem:[#allocation77_spill] sm:$0xff] %v4102_v27 }
 0x152   :  { %5735 = vst [vmem:[#allocation75_spill] sm:$0xff] %v4077_v38  ;;  %5736 = vst [vmem:[#allocation76_spill] sm:$0xff] %v4080_v57  ;;  %v5740_v58 = vunpack.c.l.bf16 %v3547_v39  ;;  %v1178_v63 = vadd.f32 %v3522_v29, %v1014_v54  ;;  %v1180_v18 = vadd.f32 %v3524_v30, %v1087_v1  ;;  %1520 = vadd.xlane.f32.xlu1 %v1519_v11  ;;  %v5742_v51 = vunpack.c.h.bf16 %v3547_v39 }
 0x153   :  { %v1640_v46 = vmul.f32 %v5739_v19, %v4043_v42  ;;  %v1670_v36 = vadd.f32 %v1669_v7, %v1639_v2  ;;  %v1359_v61 = vadd.f32 %v1358_v50, %v1328_v44  ;;  %v4112_v7 = vld [vmem:[%s5495_s3 + $0x268] sm:$0xff]  ;;  %v1179_v2 = vadd.f32 %v3526_v31, %v1016_v8  ;;  %v4124_v50 = vld [vmem:[%s5495_s3 + $0x230] sm:$0xff] }
 0x154   :  { %v1329_v57 = vmul.f32 %v5740_v58, %v4064_v22  ;;  %v1330_v37 = vmul.f32 %v5742_v51, %v4066_v25  ;;  %5743 = vst [vmem:[#allocation78_spill] sm:$0xff] %v4112_v7  ;;  %v1024_v9 = vpop.f32.mrb[8].mxu0  ;;  %v1097_v19 = vpop.f32.mrb[8].mxu1  ;;  %v5744_v54 = vunpack.c.l.bf16 %v3561_v48  ;;  %v5745_v44 = vunpack.c.h.bf16 %v3561_v48  ;;  %5746 = vst [vmem:[#allocation79_spill] sm:$0xff] %v4124_v50 }
 0x155   :  { %v1671_v58 = vadd.f32 %v1670_v36, %v1640_v46  ;;  %v1181_v51 = vadd.f32 %v3528_v32, %v1089_v6  ;;  %1360 = vadd.xlane.f32.xlu0 %v1359_v61  ;;  %v1026_v8 = vpop.f32.mrb[9].mxu0  ;;  %v1099_v45 = vpop.f32.mrb[9].mxu1  ;;  %v5747_v36 = vunpack.c.l.bf16 %v3552_v40  ;;  %v5748_v61 = vunpack.c.h.bf16 %v3552_v40 }
 0x156   :  { %v1789_v1 = vmul.f32 %v5744_v54, %v4010_v53  ;;  %v1790_v11 = vmul.f32 %v5745_v44, %v4022_v47  ;;  %v1362_v39 = vadd.f32 %v1330_v37, %v1329_v57  ;;  %v1101_v34 = vpop.f32.mrb[10].mxu1  ;;  %v4131_v48 = vpop.f32.mrb[10].mxu0  ;;  %v5749_v37 = vunpack.c.l.bf16 %v3566_v49 }
 0x157   :  { %v1331_v46 = vmul.f32 %v5747_v36, %v4086_v13  ;;  %1672 = vadd.xlane.f32.xlu1 %v1671_v58  ;;  %v1332_v28 = vmul.f32 %v5748_v61, %v4091_v26  ;;  %v4139_v36 = vpop.f32.mrb[11].mxu0  ;;  %v4141_v57 = vpop.f32.mrb[11].mxu1  ;;  %v4147_v35 = vmax.f32 %v1178_v63, 0.0  ;;  %v4149_v38 = vmax.f32 %v1180_v18, 0.0 }
 0x158   :  { %v1821_v44 = vadd.f32 %v1790_v11, %v1789_v1  ;;  %v1791_v1 = vmul.f32 %v5749_v37, %v4020_v41  ;;  %v4151_v58 = vmax.f32 %v1179_v2, 0.0  ;;  %v5753_v61 = vunpack.c.l.bf16 %v3575_v55 }
 0x159   :  { %v1363_v17 = vadd.f32 %v1362_v39, %v1331_v46  ;;  %5750 = vst [vmem:[#allocation80_spill] sm:$0xff] %v4147_v35  ;;  %5751 = vst [vmem:[#allocation81_spill] sm:$0xff] %v4149_v38  ;;  %v4156_v46 = vmax.f32 %v1181_v51, 0.0  ;;  %v5755_v54 = vunpack.c.h.bf16 %v3566_v49  ;;  %v4161_v7 = vmax.f32 %v1182_v33, 0.0 }
 0x15a   :  { %5752 = vst [vmem:[#allocation82_spill] sm:$0xff] %v4151_v58  ;;  %v1489_v39 = vmul.f32 %v5753_v61, %v4064_v22  ;;  %v1822_v37 = vadd.f32 %v1821_v44, %v1791_v1  ;;  %v4163_v63 = vmax.f32 %v1184_v59, 0.0  ;;  %v1186_v18 = vadd.f32 %v3522_v29, %v1024_v9 }
 0x15b   :  { %5754 = vst [vmem:[#allocation83_spill] sm:$0xff] %v4156_v46  ;;  %v1364_v6 = vadd.f32 %v1363_v17, %v1332_v28  ;;  %v1792_v40 = vmul.f32 %v5755_v54, %v4043_v42  ;;  %5756 = vst [vmem:[#allocation84_spill] sm:$0xff] %v4161_v7  ;;  %v5758_v2 = vunpack.c.h.bf16 %v3575_v55  ;;  %v1188_v61 = vadd.f32 %v3524_v30, %v1097_v19 }
 0x15c   :  { %5757 = vst [vmem:[#allocation85_spill] sm:$0xff] %v4163_v63  ;;  %v5759_v28 = vunpack.c.l.bf16 %v3580_v56  ;;  %v5760_v33 = vunpack.c.l.bf16 %v3589_v60  ;;  %v5761_v59 = vunpack.c.h.bf16 %v3580_v56  ;;  %v1034_v1 = vpop.f32.mrb[12].mxu0  ;;  %v1107_v50 = vpop.f32.mrb[12].mxu1  ;;  %v5762_v19 = vunpack.c.h.bf16 %v3589_v60 }
 0x15d   :  { %v1490_v11 = vmul.f32 %v5758_v2, %v4066_v25  ;;  %1365 = vadd.xlane.f32.xlu0 %v1364_v6  ;;  %v1823_v51 = vadd.f32 %v1822_v37, %v1792_v40  ;;  %v5763_v40 = vunpack.c.l.bf16 %v3594_v62  ;;  %v4186_v2 = vadd.f32 %v3522_v29, %v1034_v1 }
 0x15e   :  { %v1491_v17 = vmul.f32 %v5759_v28, %v4086_v13  ;;  %v1941_v54 = vmul.f32 %v5760_v33, %v4010_v53  ;;  %v1492_v9 = vmul.f32 %v5761_v59, %v4091_v26  ;;  %v1942_v6 = vmul.f32 %v5762_v19, %v4022_v47  ;;  %v1036_v33 = vpop.f32.mrb[13].mxu0  ;;  %v1109_v59 = vpop.f32.mrb[13].mxu1 }
 0x15f   :  { %v1522_v44 = vadd.f32 %v1490_v11, %v1489_v39  ;;  %v1943_v37 = vmul.f32 %v5763_v40, %v4020_v41  ;;  %1824 = vadd.xlane.f32.xlu1 %v1823_v51  ;;  %v4189_v28 = vadd.f32 %v3524_v30, %v1107_v50  ;;  %v5765_v11 = vunpack.c.l.bf16 %v3603_v43  ;;  %v1111_v1 = vpop.f32.mrb[14].mxu1  ;;  %v1038_v27 = vpop.f32.mrb[14].mxu0 }
 0x160   :  { %v5766_v19 = vunpack.c.h.bf16 %v3603_v43  ;;  %v4198_v40 = vadd.f32 %v3526_v31, %v1036_v33  ;;  %v4201_v51 = vadd.f32 %v3528_v32, %v1109_v59  ;;  %v1973_v50 = vadd.f32 %v1942_v6, %v1941_v54 }
 0x161   :  { %5764 = vst [vmem:[#allocation86_spill] sm:$0xff] %v4189_v28  ;;  %v1641_v39 = vmul.f32 %v5765_v11, %v4064_v22  ;;  %v1523_v60 = vadd.f32 %v1522_v44, %v1491_v17  ;;  %v4203_v63 = vmax.f32 %v1186_v18, 0.0  ;;  %v1187_v7 = vadd.f32 %v3526_v31, %v1026_v8  ;;  %v1040_v17 = vpop.f32.mrb[15].mxu0  ;;  %v1113_v44 = vpop.f32.mrb[15].mxu1 }
 0x162   :  { %v1642_v49 = vmul.f32 %v5766_v19, %v4066_v25  ;;  %5767 = vst [vmem:[#allocation87_spill] sm:$0xff] %v4201_v51  ;;  %v4207_v11 = vadd.f32 %v3528_v32, %v1099_v45  ;;  %v4210_v28 = vadd.f32 %v3524_v30, %v1111_v1  ;;  %v4212_v33 = vmax.f32 %v1188_v61, 0.0 }
 0x163   :  { %5768 = vst [vmem:[#allocation88_spill] sm:$0xff] %v4203_v63  ;;  %v1524_v19 = vadd.f32 %v1523_v60, %v1492_v9  ;;  %v5770_v59 = vunpack.c.h.bf16 %v3594_v62  ;;  %v1974_v6 = vadd.f32 %v1973_v50, %v1943_v37  ;;  %v4218_v18 = vadd.f32 %v3524_v30, %v1101_v34 }
 0x164   :  { %5769 = vst [vmem:[#allocation89_spill] sm:$0xff] %v4212_v33  ;;  %v5771_v45 = vunpack.c.l.bf16 %v3608_v3  ;;  %v1674_v51 = vadd.f32 %v1642_v49, %v1641_v39  ;;  %v4224_v1 = vadd.f32 %v3522_v29, %v1038_v27  ;;  %v4227_v60 = vadd.f32 %v3526_v31, %v1040_v17 }
 0x165   :  { %v1944_v54 = vmul.f32 %v5770_v59, %v4043_v42  ;;  %1525 = vadd.xlane.f32.xlu0 %v1524_v19  ;;  %v4230_v9 = vadd.f32 %v3528_v32, %v1113_v44  ;;  %v5775_v30 = vunpack.c.l.bf16 %v3613_v5  ;;  %v4235_v37 = vmax.f32 %v1187_v7, 0.0 }
 0x166   :  { %v1643_v8 = vmul.f32 %v5771_v45, %v4086_v13  ;;  %5772 = vst [vmem:[#allocation90_spill] sm:$0xff] %v4224_v1  ;;  %5773 = vst [vmem:[#allocation91_spill] sm:$0xff] %v4227_v60  ;;  %v5777_v49 = vunpack.c.h.bf16 %v3608_v3  ;;  %v5778_v50 = vunpack.c.h.bf16 %v3613_v5  ;;  %v4245_v17 = vadd.f32 %v3522_v29, %v4131_v48  ;;  %v5817_v5 = vld [vmem:[#allocation35_spill] sm:$0xff] }
 0x167   :  { %v1975_v61 = vadd.f32 %v1974_v6, %v1944_v54  ;;  %5774 = vst [vmem:[#allocation92_spill] sm:$0xff] %v4230_v9  ;;  %v2093_v34 = vmul.f32 %v5775_v30, %v4010_v53  ;;  %5776 = vst [vmem:[#allocation93_spill] sm:$0xff] %v4235_v37  ;;  %v4249_v44 = vadd.f32 %v3526_v31, %v4139_v36  ;;  %v5779_v7 = vunpack.c.l.bf16 %v3622_v10  ;;  %v5841_v60 = vld [vmem:[#allocation43_spill] sm:$0xff] }
 0x168   :  { %v1644_v39 = vmul.f32 %v5777_v49, %v4091_v26  ;;  %v1675_v27 = vadd.f32 %v1674_v51, %v1643_v8  ;;  %v2094_v19 = vmul.f32 %v5778_v50, %v4022_v47  ;;  %v5780_v51 = vunpack.c.l.bf16 %v3645_v20 }
 0x169   :  { %1976 = vadd.xlane.f32.xlu1 %v1975_v61  ;;  %v2095_v59 = vmul.f32 %v5779_v7, %v4020_v41  ;;  %v5781_v45 = vunpack.c.h.bf16 %v3622_v10  ;;  %v5782_v48 = vunpack.c.h.bf16 %v3645_v20  ;;  %v5783_v36 = vunpack.c.l.bf16 %v3650_v21 }
 0x16a   :  { %v1793_v54 = vmul.f32 %v5780_v51, %v4064_v22  ;;  %v1676_v6 = vadd.f32 %v1675_v27, %v1644_v39  ;;  %v2125_v29 = vadd.f32 %v2094_v19, %v2093_v34  ;;  %v5784_v30 = vunpack.c.h.bf16 %v3650_v21 }
 0x16b   :  { %v2096_v8 = vmul.f32 %v5781_v45, %v4043_v42  ;;  %v1794_v31 = vmul.f32 %v5782_v48, %v4066_v25  ;;  %v1795_v61 = vmul.f32 %v5783_v36, %v4086_v13  ;;  %v5785_v39 = vunpack.c.l.bf16 %v3631_v15 }
 0x16c   :  { %v1796_v49 = vmul.f32 %v5784_v30, %v4091_v26  ;;  %v5786_v50 = vunpack.c.h.bf16 %v3631_v15  ;;  %1677 = vadd.xlane.f32.xlu0 %v1676_v6  ;;  %v2126_v19 = vadd.f32 %v2125_v29, %v2095_v59  ;;  %v5787_v51 = vunpack.c.l.bf16 %v3636_v16 }
 0x16d   :  { %v2245_v27 = vmul.f32 %v5785_v39, %v4010_v53  ;;  %v1826_v7 = vadd.f32 %v1794_v31, %v1793_v54  ;;  %v5788_v48 = vunpack.c.l.bf16 %v3673_v0  ;;  %v5789_v30 = vunpack.c.h.bf16 %v3636_v16 }
 0x16e   :  { %v2246_v34 = vmul.f32 %v5786_v50, %v4022_v47  ;;  %v2247_v45 = vmul.f32 %v5787_v51, %v4020_v41  ;;  %v5790_v15 = vunpack.c.h.bf16 %v3673_v0  ;;  %v5791_v59 = vunpack.c.l.bf16 %v3678_v14 }
 0x16f   :  { %v1945_v36 = vmul.f32 %v5788_v48, %v4064_v22  ;;  %v2248_v10 = vmul.f32 %v5789_v30, %v4043_v42  ;;  %v2127_v6 = vadd.f32 %v2126_v19, %v2096_v8  ;;  %v1827_v29 = vadd.f32 %v1826_v7, %v1795_v61 }
 0x170   :  { %v2277_v39 = vadd.f32 %v2246_v34, %v2245_v27  ;;  %v1946_v50 = vmul.f32 %v5790_v15, %v4066_v25  ;;  %v1947_v54 = vmul.f32 %v5791_v59, %v4086_v13  ;;  %v5792_v31 = vunpack.c.l.bf16 %v3659_v4 }
 0x171   :  { %v5793_v48 = vunpack.c.h.bf16 %v3659_v4  ;;  %v5794_v27 = vunpack.c.h.bf16 %v3678_v14  ;;  %v5795_v62 = vunpack.c.l.bf16 %v3664_v52  ;;  %2128 = vadd.xlane.f32.xlu1 %v2127_v6  ;;  %v1828_v8 = vadd.f32 %v1827_v29, %v1796_v49 }
 0x172   :  { %v2397_v51 = vmul.f32 %v5792_v31, %v4010_v53  ;;  %v2278_v30 = vadd.f32 %v2277_v39, %v2247_v45  ;;  %v1978_v15 = vadd.f32 %v1946_v50, %v1945_v36  ;;  %v5796_v19 = vunpack.c.l.bf16 %v3701_v23 }
 0x173   :  { %v2398_v16 = vmul.f32 %v5793_v48, %v4022_v47  ;;  %v1948_v34 = vmul.f32 %v5794_v27, %v4091_v26  ;;  %v2399_v59 = vmul.f32 %v5795_v62, %v4020_v41  ;;  %v5797_v31 = vunpack.c.h.bf16 %v3701_v23  ;;  %1829 = vadd.xlane.f32.xlu0 %v1828_v8 }
 0x174   :  { %v2097_v7 = vmul.f32 %v5796_v19, %v4064_v22  ;;  %v2279_v39 = vadd.f32 %v2278_v30, %v2248_v10  ;;  %v1979_v48 = vadd.f32 %v1978_v15, %v1947_v54  ;;  %v5798_v36 = vunpack.c.h.bf16 %v3664_v52  ;;  %v5803_v19 = vld [vmem:[#allocation30_spill] sm:$0xff] }
 0x175   :  { %v2429_v61 = vadd.f32 %v2398_v16, %v2397_v51  ;;  %v2098_v45 = vmul.f32 %v5797_v31, %v4066_v25  ;;  %v5799_v62 = vunpack.c.l.bf16 %v3706_v12  ;;  %v5800_v29 = vunpack.c.l.bf16 %v3687_v24 }
 0x176   :  { %v2400_v50 = vmul.f32 %v5798_v36, %v4043_v42  ;;  %v5801_v27 = vunpack.c.h.bf16 %v3687_v24  ;;  %v1980_v54 = vadd.f32 %v1979_v48, %v1948_v34  ;;  %v5802_v30 = vunpack.c.h.bf16 %v3706_v12  ;;  %2280 = vadd.xlane.f32.xlu1 %v2279_v39  ;;  %v5811_v24 = vld [vmem:[#allocation31_spill] sm:$0xff] }
 0x177   :  { %v2099_v6 = vmul.f32 %v5799_v62, %v4086_v13  ;;  %v2430_v16 = vadd.f32 %v2429_v61, %v2399_v59  ;;  %v2130_v49 = vadd.f32 %v2098_v45, %v2097_v7  ;;  %v2549_v51 = vmul.f32 %v5800_v29, %v4010_v53  ;;  %v5805_v59 = vld [vmem:[#allocation33_spill] sm:$0xff] }
 0x178   :  { %v2550_v10 = vmul.f32 %v5801_v27, %v4022_v47  ;;  %v2100_v15 = vmul.f32 %v5802_v30, %v4091_v26  ;;  %v5804_v31 = vunpack.c.l.bf16 %v5803_v19  ;;  %v5806_v8 = vunpack.c.l.bf16 %v5805_v59  ;;  %v5809_v30 = vld [vmem:[#allocation34_spill] sm:$0xff]  ;;  %1981 = vadd.xlane.f32.xlu0 %v1980_v54 }
 0x179   :  { %v2431_v7 = vadd.f32 %v2430_v16, %v2400_v50  ;;  %v2131_v45 = vadd.f32 %v2130_v49, %v2099_v6  ;;  %v5807_v29 = vunpack.c.h.bf16 %v5805_v59  ;;  %v5808_v48 = vunpack.c.h.bf16 %v5803_v19 }
 0x17a   :  { %v2551_v36 = vmul.f32 %v5804_v31, %v4020_v41  ;;  %v2249_v61 = vmul.f32 %v5806_v8, %v4064_v22  ;;  %v2581_v62 = vadd.f32 %v2550_v10, %v2549_v51  ;;  %v5810_v52 = vunpack.c.l.bf16 %v5809_v30 }
 0x17b   :  { %v2250_v34 = vmul.f32 %v5807_v29, %v4066_v25  ;;  %v2552_v27 = vmul.f32 %v5808_v48, %v4043_v42  ;;  %v5812_v4 = vunpack.c.l.bf16 %v5811_v24  ;;  %v5813_v39 = vunpack.c.h.bf16 %v5811_v24  ;;  %v5815_v29 = vld [vmem:[#allocation32_spill] sm:$0xff]  ;;  %2432 = vadd.xlane.f32.xlu1 %v2431_v7 }
 0x17c   :  { %v2251_v31 = vmul.f32 %v5810_v52, %v4086_v13  ;;  %v2132_v6 = vadd.f32 %v2131_v45, %v2100_v15  ;;  %v2582_v16 = vadd.f32 %v2581_v62, %v2551_v36  ;;  %v5814_v49 = vunpack.c.h.bf16 %v5809_v30  ;;  %v5821_v62 = vld [vmem:[#allocation36_spill] sm:$0xff] }
 0x17d   :  { %v2701_v8 = vmul.f32 %v5812_v4, %v4010_v53  ;;  %v2702_v50 = vmul.f32 %v5813_v39, %v4022_v47  ;;  %v2282_v10 = vadd.f32 %v2250_v34, %v2249_v61  ;;  %v5816_v48 = vunpack.c.l.bf16 %v5815_v29 }
 0x17e   :  { %v2252_v51 = vmul.f32 %v5814_v49, %v4091_v26  ;;  %v5818_v4 = vunpack.c.l.bf16 %v5817_v5  ;;  %v5819_v47 = vunpack.c.h.bf16 %v5817_v5  ;;  %v2583_v15 = vadd.f32 %v2582_v16, %v2552_v27  ;;  %2133 = vadd.xlane.f32.xlu0 %v2132_v6  ;;  %v5827_v16 = vld [vmem:[#allocation38_spill] sm:$0xff] }
 0x17f   :  { %v2703_v52 = vmul.f32 %v5816_v48, %v4020_v41  ;;  %v2733_v19 = vadd.f32 %v2702_v50, %v2701_v8  ;;  %v2283_v36 = vadd.f32 %v2282_v10, %v2251_v31  ;;  %v5820_v45 = vunpack.c.h.bf16 %v5815_v29  ;;  %v5823_v50 = vld [vmem:[#allocation37_spill] sm:$0xff]  ;;  %v5835_v29 = vld [vmem:[#allocation39_spill] sm:$0xff] }
 0x180   :  { %v2401_v53 = vmul.f32 %v5818_v4, %v4064_v22  ;;  %v2402_v54 = vmul.f32 %v5819_v47, %v4066_v25  ;;  %v5822_v34 = vunpack.c.l.bf16 %v5821_v62  ;;  %v5824_v49 = vunpack.c.l.bf16 %v5823_v50  ;;  %2584 = vadd.xlane.f32.xlu1 %v2583_v15 }
 0x181   :  { %v2704_v61 = vmul.f32 %v5820_v45, %v4043_v42  ;;  %v2734_v8 = vadd.f32 %v2733_v19, %v2703_v52  ;;  %v5825_v4 = vunpack.c.h.bf16 %v5823_v50  ;;  %v2284_v27 = vadd.f32 %v2283_v36, %v2252_v51  ;;  %v5829_v19 = vld [vmem:[#allocation41_spill] sm:$0xff] }
 0x182   :  { %v2403_v41 = vmul.f32 %v5822_v34, %v4086_v13  ;;  %v2434_v39 = vadd.f32 %v2402_v54, %v2401_v53  ;;  %v2553_v48 = vmul.f32 %v5824_v49, %v4064_v22  ;;  %v5826_v31 = vunpack.c.h.bf16 %v5821_v62 }
 0x183   :  { %v2554_v7 = vmul.f32 %v5825_v4, %v4066_v25  ;;  %v5828_v10 = vunpack.c.l.bf16 %v5827_v16  ;;  %v5830_v52 = vunpack.c.l.bf16 %v5829_v19  ;;  %v2735_v54 = vadd.f32 %v2734_v8, %v2704_v61  ;;  %v5833_v4 = vld [vmem:[#allocation42_spill] sm:$0xff]  ;;  %2285 = vadd.xlane.f32.xlu0 %v2284_v27  ;;  %v5845_v27 = vld [vmem:[#allocation44_spill] sm:$0xff] }
 0x184   :  { %v2404_v42 = vmul.f32 %v5826_v31, %v4091_v26  ;;  %v2435_v45 = vadd.f32 %v2434_v39, %v2403_v41  ;;  %v5831_v49 = vunpack.c.h.bf16 %v5829_v19  ;;  %v5832_v51 = vunpack.c.h.bf16 %v5827_v16 }
 0x185   :  { %v2555_v47 = vmul.f32 %v5828_v10, %v4086_v13  ;;  %v1333_v53 = vmul.f32 %v5830_v52, %v4147_v35  ;;  %v2586_v34 = vadd.f32 %v2554_v7, %v2553_v48  ;;  %v5834_v31 = vunpack.c.l.bf16 %v5833_v4  ;;  %2736 = vadd.xlane.f32.xlu1 %v2735_v54 }
 0x186   :  { %v1334_v6 = vmul.f32 %v5831_v49, %v4151_v58  ;;  %v2556_v36 = vmul.f32 %v5832_v51, %v4091_v26  ;;  %v5836_v24 = vunpack.c.l.bf16 %v5835_v29  ;;  %v5837_v61 = vunpack.c.h.bf16 %v5835_v29  ;;  %v5839_v49 = vld [vmem:[#allocation40_spill] sm:$0xff] }
 0x187   :  { %v1335_v10 = vmul.f32 %v5834_v31, %v4149_v38  ;;  %v2436_v8 = vadd.f32 %v2435_v45, %v2404_v42  ;;  %v2587_v39 = vadd.f32 %v2586_v34, %v2555_v47  ;;  %v5838_v15 = vunpack.c.h.bf16 %v5833_v4 }
 0x188   :  { %v2705_v52 = vmul.f32 %v5836_v24, %v4064_v22  ;;  %v2706_v41 = vmul.f32 %v5837_v61, %v4066_v25  ;;  %v1367_v7 = vadd.f32 %v1334_v6, %v1333_v53  ;;  %v5840_v51 = vunpack.c.l.bf16 %v5839_v49 }
 0x189   :  { %v1336_v48 = vmul.f32 %v5838_v15, %v4156_v46  ;;  %v5842_v22 = vunpack.c.l.bf16 %v5841_v60  ;;  %v5843_v25 = vunpack.c.h.bf16 %v5841_v60  ;;  %v2588_v47 = vadd.f32 %v2587_v39, %v2556_v36  ;;  %2437 = vadd.xlane.f32.xlu0 %v2436_v8 }
 0x18a   :  { %v2707_v31 = vmul.f32 %v5840_v51, %v4086_v13  ;;  %v2738_v9 = vadd.f32 %v2706_v41, %v2705_v52  ;;  %v1368_v45 = vadd.f32 %v1367_v7, %v1335_v10  ;;  %v5844_v34 = vunpack.c.h.bf16 %v5839_v49  ;;  %v5847_v41 = vld [vmem:[#allocation45_spill] sm:$0xff] }
 0x18b   :  { %v1493_v24 = vmul.f32 %v5842_v22, %v4147_v35  ;;  %v1494_v42 = vmul.f32 %v5843_v25, %v4151_v58  ;;  %v5846_v6 = vunpack.c.l.bf16 %v5845_v27  ;;  %v5848_v15 = vunpack.c.l.bf16 %v5847_v41  ;;  %v5850_v7 = vld [vmem:[#allocation13_spill] sm:$0xff] }
 0x18c   :  { %v2708_v53 = vmul.f32 %v5844_v34, %v4091_v26  ;;  %v2739_v13 = vadd.f32 %v2738_v9, %v2707_v31  ;;  %v5849_v22 = vunpack.c.h.bf16 %v5847_v41  ;;  %v4417_v10 = vmax.f32 %v4245_v17, 0.0 }
 0x18d   :  { %v1495_v61 = vmul.f32 %v5846_v6, %v4149_v38  ;;  %v1527_v52 = vadd.f32 %v1494_v42, %v1493_v24  ;;  %v1645_v51 = vmul.f32 %v5848_v15, %v4147_v35  ;;  %v4420_v26 = vmax.f32 %v4249_v44, 0.0  ;;  %v5854_v44 = vld [vmem:[#allocation47_spill] sm:$0xff]  ;;  %2589 = vadd.xlane.f32.xlu0 %v2588_v47 }
 0x18e   :  { %v1646_v36 = vmul.f32 %v5849_v22, %v4151_v58  ;;  %v1369_v39 = vadd.f32 %v1368_v45, %v1336_v48  ;;  %v5851_v54 = vunpack.c.l.bf16 %v5850_v7  ;;  %v2740_v31 = vadd.f32 %v2739_v13, %v2708_v53  ;;  %v5860_v22 = vld [vmem:[#allocation14_spill] sm:$0xff] }
 0x18f   :  { %v1528_v24 = vadd.f32 %v1527_v52, %v1495_v61  ;;  %v5852_v42 = vunpack.c.h.bf16 %v5850_v7  ;;  %v4429_v6 = vmax.f32 %v4207_v11, 0.0  ;;  %v4432_v17 = vmax.f32 %v4218_v18, 0.0  ;;  %v5858_v52 = vld [vmem:[#allocation46_spill] sm:$0xff] }
 0x190   :  { %v1341_v9 = vmul.f32 %v5851_v54, %v4203_v63  ;;  %v1679_v25 = vadd.f32 %v1646_v36, %v1645_v51  ;;  %v5855_v48 = vunpack.c.l.bf16 %v5854_v44  ;;  %v5856_v8 = vunpack.c.h.bf16 %v5854_v44  ;;  %1370 = vadd.xlane.f32.xlu1 %v1369_v39  ;;  %v5864_v39 = vld [vmem:[#allocation75_spill] sm:$0xff] }
 0x191   :  { %v1342_v34 = vmul.f32 %v5852_v42, %v4235_v37  ;;  %5853 = vst [vmem:[#allocation33_spill] sm:$0xff] %v4429_v6  ;;  %v1193_v61 = vadd.f32 %v3528_v32, %v4141_v57  ;;  %v5857_v13 = vunpack.c.h.bf16 %v5845_v27  ;;  %v5859_v18 = vunpack.c.l.bf16 %v5858_v52  ;;  %v5871_v37 = vld [vmem:[#allocation76_spill] sm:$0xff]  ;;  %2741 = vadd.xlane.f32.xlu0 %v2740_v31  ;;  %v5883_v31 = vld [vmem:[#allocation50_spill] sm:$0xff] }
 0x192   :  { %v1797_v45 = vmul.f32 %v5855_v48, %v4147_v35  ;;  %v1798_v53 = vmul.f32 %v5856_v8, %v4151_v58  ;;  %v5861_v36 = vunpack.c.l.bf16 %v5860_v22  ;;  %v5862_v42 = vunpack.c.l.bf16 %v3575_v55 }
 0x193   :  { %v1496_v11 = vmul.f32 %v5857_v13, %v4156_v46  ;;  %v1647_v15 = vmul.f32 %v5859_v18, %v4149_v38  ;;  %v1377_v51 = vadd.f32 %v1342_v34, %v1341_v9  ;;  %v5863_v32 = vunpack.c.h.bf16 %v3575_v55  ;;  %v5866_v9 = vld [vmem:[#allocation48_spill] sm:$0xff] }
 0x194   :  { %v1343_v7 = vmul.f32 %v5861_v36, %v4212_v33  ;;  %v1831_v54 = vadd.f32 %v1798_v53, %v1797_v45  ;;  %v1505_v48 = vmul.f32 %v5862_v42, %v4417_v10  ;;  %v4458_v8 = vmax.f32 %v5864_v39, 0.0  ;;  %v5868_v53 = vld [vmem:[#allocation49_spill] sm:$0xff] }
 0x195   :  { %v1506_v57 = vmul.f32 %v5863_v32, %v4420_v26  ;;  %v1529_v13 = vadd.f32 %v1528_v24, %v1496_v11  ;;  %v1680_v18 = vadd.f32 %v1679_v25, %v1647_v15  ;;  %v5867_v34 = vunpack.c.l.bf16 %v5866_v9 }
 0x196   :  { %5865 = vst [vmem:[#allocation34_spill] sm:$0xff] %v4458_v8  ;;  %v1378_v36 = vadd.f32 %v1377_v51, %v1343_v7  ;;  %v5869_v33 = vunpack.c.l.bf16 %v5868_v53  ;;  %v5870_v55 = vunpack.c.h.bf16 %v5868_v53  ;;  %v4470_v39 = vmax.f32 %v5871_v37, 0.0 }
 0x197   :  { %v1799_v1 = vmul.f32 %v5867_v34, %v4149_v38  ;;  %v1542_v45 = vadd.f32 %v1506_v57, %v1505_v48  ;;  %v4472_v47 = vmax.f32 %v1193_v61, 0.0  ;;  %1530 = vadd.xlane.f32.xlu1 %v1529_v13  ;;  %v5874_v24 = vunpack.c.h.bf16 %v5858_v52 }
 0x198   :  { %v1949_v42 = vmul.f32 %v5869_v33, %v4147_v35  ;;  %v1950_v32 = vmul.f32 %v5870_v55, %v4151_v58  ;;  %5872 = vst [vmem:[#allocation35_spill] sm:$0xff] %v4470_v39  ;;  %v5875_v11 = vunpack.c.l.bf16 %v3603_v43  ;;  %v5876_v33 = vunpack.c.h.bf16 %v5860_v22  ;;  %v5879_v55 = vld [vmem:[#allocation51_spill] sm:$0xff] }
 0x199   :  { %5873 = vst [vmem:[#allocation36_spill] sm:$0xff] %v4472_v47  ;;  %v1648_v25 = vmul.f32 %v5874_v24, %v4156_v46  ;;  %v1832_v7 = vadd.f32 %v1831_v54, %v1799_v1  ;;  %v5877_v37 = vunpack.c.l.bf16 %v3580_v56  ;;  %v5878_v61 = vunpack.c.h.bf16 %v3603_v43 }
 0x19a   :  { %v1657_v15 = vmul.f32 %v5875_v11, %v4417_v10  ;;  %v1344_v51 = vmul.f32 %v5876_v33, %v4429_v6  ;;  %v1983_v34 = vadd.f32 %v1950_v32, %v1949_v42  ;;  %v5880_v24 = vunpack.c.l.bf16 %v5879_v55 }
 0x19b   :  { %v1507_v48 = vmul.f32 %v5877_v37, %v4432_v17  ;;  %v1658_v57 = vmul.f32 %v5878_v61, %v4420_v26  ;;  %v1681_v13 = vadd.f32 %v1680_v18, %v1648_v25  ;;  %v5881_v22 = vunpack.c.h.bf16 %v5879_v55 }
 0x19c   :  { %v2101_v11 = vmul.f32 %v5880_v24, %v4147_v35  ;;  %v4496_v1 = vmax.f32 %v4186_v2, 0.0  ;;  %v1379_v54 = vadd.f32 %v1378_v36, %v1344_v51  ;;  %v5882_v37 = vunpack.c.h.bf16 %v5866_v9  ;;  %v5887_v36 = vld [vmem:[#allocation86_spill] sm:$0xff] }
 0x19d   :  { %v2102_v33 = vmul.f32 %v5881_v22, %v4151_v58  ;;  %v1543_v61 = vadd.f32 %v1542_v45, %v1507_v48  ;;  %1682 = vadd.xlane.f32.xlu1 %v1681_v13  ;;  %v5884_v18 = vunpack.c.l.bf16 %v5883_v31  ;;  %v1694_v32 = vadd.f32 %v1658_v57, %v1657_v15 }
 0x19e   :  { %v1800_v43 = vmul.f32 %v5882_v37, %v4156_v46  ;;  %v5885_v25 = vunpack.c.l.bf16 %v3645_v20  ;;  %v5886_v2 = vunpack.c.h.bf16 %v3645_v20  ;;  %v4511_v51 = vmax.f32 %v5887_v36, 0.0  ;;  %1380 = vadd.xlane.f32.xlu0 %v1379_v54 }
 0x19f   :  { %v1951_v42 = vmul.f32 %v5884_v18, %v4149_v38  ;;  %v5888_v45 = vunpack.c.h.bf16 %v3580_v56  ;;  %v5889_v13 = vunpack.c.l.bf16 %v3608_v3  ;;  %v2135_v37 = vadd.f32 %v2102_v33, %v2101_v11  ;;  %v5890_v18 = vld [vmem:[#allocation53_spill] sm:$0xff]  ;;  %v5894_v11 = vld [vmem:[#allocation52_spill] sm:$0xff] }
 0x1a0   :  { %v1809_v24 = vmul.f32 %v5885_v25, %v4417_v10  ;;  %v1810_v22 = vmul.f32 %v5886_v2, %v4420_v26  ;;  %v1833_v6 = vadd.f32 %v1832_v7, %v1800_v43  ;;  %v5891_v25 = vunpack.c.l.bf16 %v5890_v18 }
 0x1a1   :  { %v1508_v48 = vmul.f32 %v5888_v45, %v4472_v47  ;;  %v1659_v15 = vmul.f32 %v5889_v13, %v4432_v17  ;;  %v1984_v57 = vadd.f32 %v1983_v34, %v1951_v42  ;;  %v5892_v2 = vunpack.c.h.bf16 %v5890_v18 }
 0x1a2   :  { %v2253_v20 = vmul.f32 %v5891_v25, %v4147_v35  ;;  %v4526_v7 = vmax.f32 %v4198_v40, 0.0  ;;  %v5893_v43 = vunpack.c.h.bf16 %v5883_v31  ;;  %v1846_v13 = vadd.f32 %v1810_v22, %v1809_v24  ;;  %1834 = vadd.xlane.f32.xlu1 %v1833_v6 }
 0x1a3   :  { %v2254_v36 = vmul.f32 %v5892_v2, %v4151_v58  ;;  %v1544_v56 = vadd.f32 %v1543_v61, %v1508_v48  ;;  %v1695_v34 = vadd.f32 %v1694_v32, %v1659_v15  ;;  %v5895_v33 = vunpack.c.l.bf16 %v5894_v11  ;;  %v5898_v61 = vld [vmem:[#allocation87_spill] sm:$0xff] }
 0x1a4   :  { %v1952_v45 = vmul.f32 %v5893_v43, %v4156_v46  ;;  %v5896_v42 = vunpack.c.l.bf16 %v3673_v0  ;;  %v5897_v40 = vunpack.c.h.bf16 %v3673_v0  ;;  %v4541_v48 = vmax.f32 %v5898_v61, 0.0 }
 0x1a5   :  { %v2103_v54 = vmul.f32 %v5895_v33, %v4149_v38  ;;  %v5899_v24 = vunpack.c.h.bf16 %v3608_v3  ;;  %v5900_v32 = vunpack.c.l.bf16 %v3650_v21  ;;  %v2287_v15 = vadd.f32 %v2254_v36, %v2253_v20  ;;  %1545 = vadd.xlane.f32.xlu0 %v1544_v56  ;;  %v5904_v3 = vld [vmem:[#allocation54_spill] sm:$0xff] }
 0x1a6   :  { %v1961_v25 = vmul.f32 %v5896_v42, %v4417_v10  ;;  %v1962_v2 = vmul.f32 %v5897_v40, %v4420_v26  ;;  %v1985_v43 = vadd.f32 %v1984_v57, %v1952_v45  ;;  %v5901_v42 = vld [vmem:[#allocation55_spill] sm:$0xff]  ;;  %v5907_v57 = vunpack.c.h.bf16 %v3701_v23 }
 0x1a7   :  { %v1660_v6 = vmul.f32 %v5899_v24, %v4472_v47  ;;  %v1811_v22 = vmul.f32 %v5900_v32, %v4432_v17  ;;  %v2136_v33 = vadd.f32 %v2135_v37, %v2103_v54  ;;  %v5902_v18 = vunpack.c.l.bf16 %v5901_v42 }
 0x1a8   :  { %v5903_v40 = vunpack.c.h.bf16 %v5901_v42  ;;  %v5905_v24 = vunpack.c.l.bf16 %v5904_v3  ;;  %v5906_v32 = vunpack.c.l.bf16 %v3701_v23  ;;  %v2114_v37 = vmul.f32 %v5907_v57, %v4420_v26  ;;  %1986 = vadd.xlane.f32.xlu1 %v1985_v43 }
 0x1a9   :  { %v2405_v0 = vmul.f32 %v5902_v18, %v4147_v35  ;;  %v1847_v63 = vadd.f32 %v1846_v13, %v1811_v22  ;;  %v1696_v36 = vadd.f32 %v1695_v34, %v1660_v6  ;;  %v5908_v18 = vunpack.c.h.bf16 %v5894_v11 }
 0x1aa   :  { %v2406_v61 = vmul.f32 %v5903_v40, %v4151_v58  ;;  %v2255_v55 = vmul.f32 %v5905_v24, %v4149_v38  ;;  %v2113_v20 = vmul.f32 %v5906_v32, %v4417_v10  ;;  %v5909_v45 = vunpack.c.h.bf16 %v3650_v21  ;;  %v5911_v32 = vld [vmem:[#allocation57_spill] sm:$0xff] }
 0x1ab   :  { %v2104_v56 = vmul.f32 %v5908_v18, %v4156_v46  ;;  %v1998_v54 = vadd.f32 %v1962_v2, %v1961_v25  ;;  %v5910_v22 = vunpack.c.h.bf16 %v5904_v3  ;;  %v5912_v23 = vunpack.c.l.bf16 %v5911_v32  ;;  %1697 = vadd.xlane.f32.xlu0 %v1696_v36 }
 0x1ac   :  { %v1812_v13 = vmul.f32 %v5909_v45, %v4472_v47  ;;  %v2288_v24 = vadd.f32 %v2287_v15, %v2255_v55  ;;  %v5913_v34 = vunpack.c.h.bf16 %v5911_v32  ;;  %v5914_v21 = vunpack.c.l.bf16 %v3678_v14 }
 0x1ad   :  { %v2256_v40 = vmul.f32 %v5910_v22, %v4156_v46  ;;  %v2557_v57 = vmul.f32 %v5912_v23, %v4147_v35  ;;  %v2137_v43 = vadd.f32 %v2136_v33, %v2104_v56  ;;  %v5915_v25 = vunpack.c.h.bf16 %v3678_v14  ;;  %v5918_v56 = vld [vmem:[#allocation56_spill] sm:$0xff]  ;;  %v5921_v14 = vld [vmem:[#allocation59_spill] sm:$0xff] }
 0x1ae   :  { %v2558_v6 = vmul.f32 %v5913_v34, %v4151_v58  ;;  %v1963_v18 = vmul.f32 %v5914_v21, %v4432_v17  ;;  %v2439_v45 = vadd.f32 %v2406_v61, %v2405_v0  ;;  %v1848_v55 = vadd.f32 %v1847_v63, %v1812_v13  ;;  %v5920_v35 = vld [vmem:[#allocation84_spill] sm:$0xff] }
 0x1af   :  { %v1964_v2 = vmul.f32 %v5915_v25, %v4472_v47  ;;  %v2150_v15 = vadd.f32 %v2114_v37, %v2113_v20  ;;  %v5916_v22 = vunpack.c.l.bf16 %v5805_v59  ;;  %v5917_v34 = vunpack.c.h.bf16 %v5805_v59  ;;  %2138 = vadd.xlane.f32.xlu1 %v2137_v43 }
 0x1b0   :  { %v1999_v33 = vadd.f32 %v1998_v54, %v1963_v18  ;;  %v5919_v21 = vunpack.c.l.bf16 %v5918_v56  ;;  %v5922_v25 = vunpack.c.l.bf16 %v5921_v14  ;;  %v5923_v63 = vunpack.c.h.bf16 %v5921_v14  ;;  %1849 = vadd.xlane.f32.xlu0 %v1848_v55 }
 0x1b1   :  { %v2265_v23 = vmul.f32 %v5916_v22, %v4417_v10  ;;  %v2266_v36 = vmul.f32 %v5917_v34, %v4420_v26  ;;  %v2289_v20 = vadd.f32 %v2288_v24, %v2256_v40  ;;  %v5924_v37 = vunpack.c.h.bf16 %v5918_v56 }
 0x1b2   :  { %v2407_v58 = vmul.f32 %v5919_v21, %v4149_v38  ;;  %v1337_v0 = vmul.f32 %v5922_v25, %v5920_v35  ;;  %v1338_v61 = vmul.f32 %v5923_v63, %v4458_v8  ;;  %v5925_v13 = vunpack.c.l.bf16 %v3706_v12 }
 0x1b3   :  { %v2408_v59 = vmul.f32 %v5924_v37, %v4156_v46  ;;  %v2591_v43 = vadd.f32 %v2558_v6, %v2557_v57  ;;  %v5926_v22 = vunpack.c.h.bf16 %v3706_v12  ;;  %v5927_v21 = vunpack.c.l.bf16 %v5817_v5  ;;  %v5929_v37 = vld [vmem:[#allocation58_spill] sm:$0xff]  ;;  %2290 = vadd.xlane.f32.xlu1 %v2289_v20  ;;  %v5931_v12 = vld [vmem:[#allocation61_spill] sm:$0xff] }
 0x1b4   :  { %v2115_v54 = vmul.f32 %v5925_v13, %v4432_v17  ;;  %v2440_v18 = vadd.f32 %v2439_v45, %v2407_v58  ;;  %v5928_v40 = vunpack.c.h.bf16 %v5817_v5  ;;  %v5930_v14 = vunpack.c.l.bf16 %v5929_v37 }
 0x1b5   :  { %v2116_v34 = vmul.f32 %v5926_v22, %v4472_v47  ;;  %v2417_v25 = vmul.f32 %v5927_v21, %v4417_v10  ;;  %v2302_v57 = vadd.f32 %v2266_v36, %v2265_v23  ;;  %v1372_v6 = vadd.f32 %v1338_v61, %v1337_v0 }
 0x1b6   :  { %v2418_v24 = vmul.f32 %v5928_v40, %v4420_v26  ;;  %v2151_v63 = vadd.f32 %v2150_v15, %v2115_v54  ;;  %v2559_v13 = vmul.f32 %v5930_v14, %v4149_v38  ;;  %v2000_v58 = vadd.f32 %v1999_v33, %v1964_v2  ;;  %v5935_v40 = vld [vmem:[#allocation85_spill] sm:$0xff]  ;;  %v5936_v14 = vld [vmem:[#allocation60_spill] sm:$0xff] }
 0x1b7   :  { %v5932_v55 = vunpack.c.l.bf16 %v5931_v12  ;;  %v5933_v21 = vunpack.c.h.bf16 %v5931_v12  ;;  %v5934_v15 = vunpack.c.l.bf16 %v5809_v30  ;;  %v5937_v23 = vunpack.c.l.bf16 %v5936_v14 }
 0x1b8   :  { %v2454_v45 = vadd.f32 %v2418_v24, %v2417_v25  ;;  %v2592_v5 = vadd.f32 %v2591_v43, %v2559_v13  ;;  %v5938_v2 = vunpack.c.l.bf16 %v5823_v50  ;;  %2001 = vadd.xlane.f32.xlu0 %v2000_v58  ;;  %v2441_v0 = vadd.f32 %v2440_v18, %v2408_v59  ;;  %v5942_v59 = vld [vmem:[#allocation62_spill] sm:$0xff] }
 0x1b9   :  { %v1497_v22 = vmul.f32 %v5932_v55, %v5920_v35  ;;  %v1498_v32 = vmul.f32 %v5933_v21, %v4458_v8  ;;  %v2267_v54 = vmul.f32 %v5934_v15, %v4432_v17  ;;  %v1339_v36 = vmul.f32 %v5937_v23, %v5935_v40 }
 0x1ba   :  { %v2569_v33 = vmul.f32 %v5938_v2, %v4417_v10  ;;  %v5939_v61 = vunpack.c.l.bf16 %v5821_v62  ;;  %v5940_v43 = vunpack.c.h.bf16 %v5823_v50  ;;  %v2152_v13 = vadd.f32 %v2151_v63, %v2116_v34  ;;  %2442 = vadd.xlane.f32.xlu1 %v2441_v0 }
 0x1bb   :  { %v1532_v25 = vadd.f32 %v1498_v32, %v1497_v22  ;;  %v5941_v55 = vunpack.c.h.bf16 %v5929_v37  ;;  %v2303_v15 = vadd.f32 %v2302_v57, %v2267_v54  ;;  %v1373_v23 = vadd.f32 %v1372_v6, %v1339_v36 }
 0x1bc   :  { %v2419_v20 = vmul.f32 %v5939_v61, %v4432_v17  ;;  %v2570_v24 = vmul.f32 %v5940_v43, %v4420_v26  ;;  %v5943_v18 = vunpack.c.l.bf16 %v5942_v59  ;;  %v5944_v61 = vld [vmem:[#allocation63_spill] sm:$0xff]  ;;  %v5947_v43 = vunpack.c.h.bf16 %v5809_v30  ;;  %2153 = vadd.xlane.f32.xlu0 %v2152_v13 }
 0x1bd   :  { %v2560_v21 = vmul.f32 %v5941_v55, %v4156_v46  ;;  %v5945_v32 = vunpack.c.l.bf16 %v5944_v61  ;;  %v5946_v50 = vunpack.c.h.bf16 %v5944_v61  ;;  %v5948_v6 = vunpack.c.h.bf16 %v5936_v14 }
 0x1be   :  { %v2455_v2 = vadd.f32 %v2454_v45, %v2419_v20  ;;  %v1499_v58 = vmul.f32 %v5943_v18, %v5935_v40  ;;  %v2268_v57 = vmul.f32 %v5947_v43, %v4472_v47  ;;  %v2606_v54 = vadd.f32 %v2570_v24, %v2569_v33 }
 0x1bf   :  { %v1649_v22 = vmul.f32 %v5945_v32, %v5920_v35  ;;  %v1650_v34 = vmul.f32 %v5946_v50, %v4458_v8  ;;  %v2593_v63 = vadd.f32 %v2592_v5, %v2560_v21  ;;  %v1340_v45 = vmul.f32 %v5948_v6, %v4470_v39 }
 0x1c0   :  { %v5949_v36 = vunpack.c.h.bf16 %v5821_v62  ;;  %v1533_v20 = vadd.f32 %v1532_v25, %v1499_v58  ;;  %v5950_v55 = vunpack.c.l.bf16 %v5835_v29  ;;  %v5951_v5 = vunpack.c.h.bf16 %v5835_v29 }
 0x1c1   :  { %v2304_v21 = vadd.f32 %v2303_v15, %v2268_v57  ;;  %v1374_v32 = vadd.f32 %v1373_v23, %v1340_v45  ;;  %v5952_v50 = vunpack.c.h.bf16 %v5942_v59  ;;  %v5953_v24 = vunpack.c.l.bf16 %v5827_v16  ;;  %2594 = vadd.xlane.f32.xlu1 %v2593_v63  ;;  %v5956_v57 = vld [vmem:[#allocation65_spill] sm:$0xff] }
 0x1c2   :  { %v2420_v0 = vmul.f32 %v5949_v36, %v4472_v47  ;;  %v2721_v18 = vmul.f32 %v5950_v55, %v4417_v10  ;;  %v2722_v30 = vmul.f32 %v5951_v5, %v4420_v26  ;;  %v5954_v13 = vunpack.c.h.bf16 %v5827_v16 }
 0x1c3   :  { %v1500_v33 = vmul.f32 %v5952_v50, %v4470_v39  ;;  %v2571_v62 = vmul.f32 %v5953_v24, %v4432_v17  ;;  %v1684_v43 = vadd.f32 %v1650_v34, %v1649_v22  ;;  %v5955_v29 = vunpack.c.l.bf16 %v5829_v19  ;;  %2305 = vadd.xlane.f32.xlu0 %v2304_v21  ;;  %v5960_v22 = vld [vmem:[#allocation64_spill] sm:$0xff] }
 0x1c4   :  { %v2456_v25 = vadd.f32 %v2455_v2, %v2420_v0  ;;  %v2572_v58 = vmul.f32 %v5954_v13, %v4472_v47  ;;  %v5957_v6 = vunpack.c.l.bf16 %v5956_v57  ;;  %v5958_v36 = vunpack.c.h.bf16 %v5956_v57 }
 0x1c5   :  { %v1349_v15 = vmul.f32 %v5955_v29, %v4496_v1  ;;  %v2607_v23 = vadd.f32 %v2606_v54, %v2571_v62  ;;  %v5959_v2 = vunpack.c.h.bf16 %v5829_v19  ;;  %v1534_v16 = vadd.f32 %v1533_v20, %v1500_v33  ;;  %v5964_v29 = vld [vmem:[#allocation67_spill] sm:$0xff]  ;;  %1375 = vadd.xlane.f32.xlu1 %v1374_v32 }
 0x1c6   :  { %v1801_v45 = vmul.f32 %v5957_v6, %v5920_v35  ;;  %v1802_v55 = vmul.f32 %v5958_v36, %v4458_v8  ;;  %v5961_v34 = vunpack.c.l.bf16 %v5960_v22  ;;  %v5962_v54 = vunpack.c.h.bf16 %v5960_v22 }
 0x1c7   :  { %v1350_v63 = vmul.f32 %v5959_v2, %v4526_v7  ;;  %v2758_v50 = vadd.f32 %v2722_v30, %v2721_v18  ;;  %v5963_v24 = vunpack.c.l.bf16 %v5833_v4  ;;  %v5965_v19 = vunpack.c.l.bf16 %v5964_v29  ;;  %2457 = vadd.xlane.f32.xlu0 %v2456_v25 }
 0x1c8   :  { %v1651_v0 = vmul.f32 %v5961_v34, %v5935_v40  ;;  %v1652_v5 = vmul.f32 %v5962_v54, %v4470_v39  ;;  %v5966_v20 = vunpack.c.h.bf16 %v5964_v29  ;;  %v5967_v36 = vunpack.c.l.bf16 %v5839_v49 }
 0x1c9   :  { %v1351_v62 = vmul.f32 %v5963_v24, %v4511_v51  ;;  %v1387_v13 = vadd.f32 %v1350_v63, %v1349_v15  ;;  %v1953_v6 = vmul.f32 %v5965_v19, %v5920_v35  ;;  %v5968_v18 = vunpack.c.l.bf16 %v5841_v60  ;;  %1535 = vadd.xlane.f32.xlu1 %v1534_v16 }
 0x1ca   :  { %v1954_v21 = vmul.f32 %v5966_v20, %v4458_v8  ;;  %v1685_v33 = vadd.f32 %v1684_v43, %v1651_v0  ;;  %v2723_v2 = vmul.f32 %v5967_v36, %v4432_v17  ;;  %v5969_v15 = vunpack.c.h.bf16 %v5841_v60  ;;  %v5971_v0 = vld [vmem:[#allocation66_spill] sm:$0xff] }
 0x1cb   :  { %v1509_v30 = vmul.f32 %v5968_v18, %v4496_v1  ;;  %v2608_v34 = vadd.f32 %v2607_v23, %v2572_v58  ;;  %v1836_v54 = vadd.f32 %v1802_v55, %v1801_v45  ;;  %v5970_v24 = vunpack.c.h.bf16 %v5833_v4  ;;  %v5976_v55 = vld [vmem:[#allocation69_spill] sm:$0xff] }
 0x1cc   :  { %v1510_v63 = vmul.f32 %v5969_v15, %v4526_v7  ;;  %v1388_v32 = vadd.f32 %v1387_v13, %v1351_v62  ;;  %v2759_v43 = vadd.f32 %v2758_v50, %v2723_v2  ;;  %v5972_v20 = vunpack.c.l.bf16 %v5971_v0 }
 0x1cd   :  { %v1352_v19 = vmul.f32 %v5970_v24, %v4541_v48  ;;  %v5973_v18 = vunpack.c.l.bf16 %v5845_v27  ;;  %v1988_v15 = vadd.f32 %v1954_v21, %v1953_v6  ;;  %v5974_v58 = vunpack.c.h.bf16 %v5845_v27  ;;  %2609 = vadd.xlane.f32.xlu0 %v2608_v34  ;;  %v5982_v24 = vld [vmem:[#allocation68_spill] sm:$0xff] }
 0x1ce   :  { %v1803_v36 = vmul.f32 %v5972_v20, %v5935_v40  ;;  %v1547_v38 = vadd.f32 %v1510_v63, %v1509_v30  ;;  %v5975_v4 = vunpack.c.l.bf16 %v5847_v41  ;;  %v5977_v50 = vunpack.c.l.bf16 %v5976_v55 }
 0x1cf   :  { %v1511_v46 = vmul.f32 %v5973_v18, %v4511_v51  ;;  %v1389_v60 = vadd.f32 %v1388_v32, %v1352_v19  ;;  %v1512_v23 = vmul.f32 %v5974_v58, %v4541_v48  ;;  %v5978_v13 = vunpack.c.h.bf16 %v5976_v55 }
 0x1d0   :  { %v1661_v25 = vmul.f32 %v5975_v4, %v4496_v1  ;;  %v2105_v62 = vmul.f32 %v5977_v50, %v5920_v35  ;;  %v5979_v6 = vunpack.c.h.bf16 %v5847_v41  ;;  %v1686_v27 = vadd.f32 %v1685_v33, %v1652_v5 }
 0x1d1   :  { %v1548_v45 = vadd.f32 %v1547_v38, %v1511_v46  ;;  %v2106_v2 = vmul.f32 %v5978_v13, %v4458_v8  ;;  %v5980_v30 = vunpack.c.h.bf16 %v5839_v49  ;;  %v5981_v38 = vunpack.c.h.bf16 %v5971_v0  ;;  %v5989_v13 = vld [vmem:[#allocation71_spill] sm:$0xff] }
 0x1d2   :  { %v1662_v21 = vmul.f32 %v5979_v6, %v4526_v7  ;;  %v1837_v16 = vadd.f32 %v1836_v54, %v1803_v36  ;;  %v5983_v19 = vunpack.c.l.bf16 %v5982_v24  ;;  %v5984_v41 = vunpack.c.l.bf16 %v5858_v52  ;;  %1687 = vadd.xlane.f32.xlu1 %v1686_v27 }
 0x1d3   :  { %v2724_v63 = vmul.f32 %v5980_v30, %v4472_v47  ;;  %v1804_v46 = vmul.f32 %v5981_v38, %v4470_v39  ;;  %v1549_v20 = vadd.f32 %v1548_v45, %v1512_v23  ;;  %v5985_v49 = vunpack.c.h.bf16 %v5982_v24 }
 0x1d4   :  { %v1955_v32 = vmul.f32 %v5983_v19, %v5935_v40  ;;  %v1663_v18 = vmul.f32 %v5984_v41, %v4511_v51  ;;  %v1699_v5 = vadd.f32 %v1662_v21, %v1661_v25  ;;  %v5986_v4 = vunpack.c.l.bf16 %v5854_v44 }
 0x1d5   :  { %v2760_v33 = vadd.f32 %v2759_v43, %v2724_v63  ;;  %v1956_v58 = vmul.f32 %v5985_v49, %v4470_v39  ;;  %v5987_v34 = vunpack.c.h.bf16 %v5854_v44  ;;  %v2140_v45 = vadd.f32 %v2106_v2, %v2105_v62  ;;  %v5993_v62 = vld [vmem:[#allocation70_spill] sm:$0xff] }
 0x1d6   :  { %v1813_v54 = vmul.f32 %v5986_v4, %v4496_v1  ;;  %v1989_v23 = vadd.f32 %v1988_v15, %v1955_v32  ;;  %v5988_v50 = vunpack.c.h.bf16 %v5858_v52  ;;  %v1700_v43 = vadd.f32 %v1699_v5, %v1663_v18 }
 0x1d7   :  { %v1814_v36 = vmul.f32 %v5987_v34, %v4526_v7  ;;  %v5990_v6 = vunpack.c.l.bf16 %v5989_v13  ;;  %v5991_v30 = vunpack.c.h.bf16 %v5989_v13  ;;  %v5992_v44 = vunpack.c.l.bf16 %v5866_v9  ;;  %2761 = vadd.xlane.f32.xlu0 %v2760_v33 }
 0x1d8   :  { %v1664_v25 = vmul.f32 %v5988_v50, %v4541_v48  ;;  %v1838_v15 = vadd.f32 %v1837_v16, %v1804_v46  ;;  %v5994_v52 = vunpack.c.l.bf16 %v5993_v62  ;;  %v5995_v32 = vunpack.c.l.bf16 %v5868_v53  ;;  %v5999_v50 = vld [vmem:[#allocation72_spill] sm:$0xff] }
 0x1d9   :  { %v2257_v21 = vmul.f32 %v5990_v6, %v5920_v35  ;;  %v2258_v63 = vmul.f32 %v5991_v30, %v4458_v8  ;;  %v1815_v38 = vmul.f32 %v5992_v44, %v4511_v51  ;;  %v1851_v27 = vadd.f32 %v1814_v36, %v1813_v54 }
 0x1da   :  { %v2107_v2 = vmul.f32 %v5994_v52, %v5935_v40  ;;  %v1701_v19 = vadd.f32 %v1700_v43, %v1664_v25  ;;  %v1965_v41 = vmul.f32 %v5995_v32, %v4496_v1  ;;  %v4775_v18 = vmax.f32 %v4210_v28, 0.0  ;;  %1839 = vadd.xlane.f32.xlu1 %v1838_v15 }
 0x1db   :  { %v5996_v5 = vunpack.c.h.bf16 %v5866_v9  ;;  %v1852_v4 = vadd.f32 %v1851_v27, %v1815_v38  ;;  %v5997_v46 = vunpack.c.h.bf16 %v5868_v53  ;;  %v1990_v33 = vadd.f32 %v1989_v23, %v1956_v58  ;;  %1390 = vadd.xlane.f32.xlu0 %v1389_v60  ;;  %v6002_v53 = vld [vmem:[#allocation73_spill] sm:$0xff]  ;;  %v6005_v27 = vld [vmem:[#allocation51_spill] sm:$0xff] }
 0x1dc   :  { %v5998_v54 = vunpack.c.h.bf16 %v5993_v62  ;;  %v2141_v36 = vadd.f32 %v2140_v45, %v2107_v2  ;;  %v6000_v28 = vunpack.c.l.bf16 %v5999_v50  ;;  %v2292_v43 = vadd.f32 %v2258_v63, %v2257_v21 }
 0x1dd   :  { %v1816_v49 = vmul.f32 %v5996_v5, %v4541_v48  ;;  %v1966_v16 = vmul.f32 %v5997_v46, %v4526_v7  ;;  %v6001_v9 = vunpack.c.l.bf16 %v5883_v31  ;;  %v6003_v58 = vunpack.c.l.bf16 %v6002_v53  ;;  %v6010_v5 = vld [vmem:[#allocation11_spill] sm:$0xff]  ;;  %v6012_v46 = vld [vmem:[#allocation93_spill] sm:$0xff] }
 0x1de   :  { %v2108_v34 = vmul.f32 %v5998_v54, %v4470_v39  ;;  %v2259_v25 = vmul.f32 %v6000_v28, %v5935_v40  ;;  %v6004_v38 = vunpack.c.h.bf16 %v6002_v53  ;;  %v6006_v15 = vunpack.c.l.bf16 %v6005_v27  ;;  %v6014_v28 = vld [vmem:[#allocation90_spill] sm:$0xff]  ;;  %1991 = vadd.xlane.f32.xlu1 %v1990_v33 }
 0x1df   :  { %v1853_v6 = vadd.f32 %v1852_v4, %v1816_v49  ;;  %v1967_v30 = vmul.f32 %v6001_v9, %v4511_v51  ;;  %v2003_v44 = vadd.f32 %v1966_v16, %v1965_v41  ;;  %v2409_v23 = vmul.f32 %v6003_v58, %v5920_v35  ;;  %v6009_v41 = vld [vmem:[#allocation88_spill] sm:$0xff]  ;;  %v6015_v58 = vld [vmem:[#allocation91_spill] sm:$0xff]  ;;  %1550 = vadd.xlane.f32.xlu0 %v1549_v20 }
 0x1e0   :  { %v2410_v45 = vmul.f32 %v6004_v38, %v4458_v8  ;;  %v2117_v52 = vmul.f32 %v6006_v15, %v4496_v1  ;;  %v6007_v21 = vunpack.c.h.bf16 %v6005_v27  ;;  %v6008_v2 = vunpack.c.h.bf16 %v5883_v31 }
 0x1e1   :  { %v2004_v32 = vadd.f32 %v2003_v44, %v1967_v30  ;;  %v6011_v49 = vunpack.c.l.bf16 %v6010_v5  ;;  %v6013_v16 = vunpack.c.h.bf16 %v6010_v5  ;;  %v4814_v9 = vmax.f32 %v6014_v28, 0.0 }
 0x1e2   :  { %v2118_v63 = vmul.f32 %v6007_v21, %v4526_v7  ;;  %v1968_v60 = vmul.f32 %v6008_v2, %v4541_v48  ;;  %v4817_v38 = vmax.f32 %v6015_v58, 0.0  ;;  %v6016_v31 = vunpack.c.l.bf16 %v5894_v11  ;;  %v6017_v2 = vld [vmem:[#allocation53_spill] sm:$0xff] }
 0x1e3   :  { %v1501_v4 = vmul.f32 %v6011_v49, %v6009_v41  ;;  %v1502_v54 = vmul.f32 %v6013_v16, %v6012_v46  ;;  %v2142_v44 = vadd.f32 %v2141_v36, %v2108_v34  ;;  %v2293_v15 = vadd.f32 %v2292_v43, %v2259_v25  ;;  %v6022_v43 = vld [vmem:[#allocation15_spill] sm:$0xff]  ;;  %1702 = vadd.xlane.f32.xlu0 %v1701_v19 }
 0x1e4   :  { %v2119_v27 = vmul.f32 %v6016_v31, %v4511_v51  ;;  %v2155_v30 = vadd.f32 %v2118_v63, %v2117_v52  ;;  %v2005_v21 = vadd.f32 %v2004_v32, %v1968_v60  ;;  %v6018_v49 = vunpack.c.l.bf16 %v6017_v2 }
 0x1e5   :  { %v2444_v16 = vadd.f32 %v2410_v45, %v2409_v23  ;;  %v6019_v28 = vunpack.c.h.bf16 %v5894_v11  ;;  %v6020_v33 = vunpack.c.h.bf16 %v6017_v2  ;;  %v6021_v34 = vunpack.c.h.bf16 %v5999_v50  ;;  %2143 = vadd.xlane.f32.xlu1 %v2142_v44  ;;  %v6025_v11 = vld [vmem:[#allocation74_spill] sm:$0xff]  ;;  %v6029_v2 = vld [vmem:[#allocation89_spill] sm:$0xff] }
 0x1e6   :  { %v2269_v5 = vmul.f32 %v6018_v49, %v4496_v1  ;;  %v2156_v47 = vadd.f32 %v2155_v30, %v2119_v27  ;;  %v1537_v25 = vadd.f32 %v1502_v54, %v1501_v4  ;;  %v6023_v52 = vunpack.c.l.bf16 %v6022_v43  ;;  %v6030_v49 = vld [vmem:[#allocation12_spill] sm:$0xff] }
 0x1e7   :  { %v2120_v58 = vmul.f32 %v6019_v28, %v4541_v48  ;;  %v2270_v8 = vmul.f32 %v6020_v33, %v4526_v7  ;;  %v2260_v36 = vmul.f32 %v6021_v34, %v4470_v39  ;;  %v6024_v20 = vunpack.c.h.bf16 %v6022_v43  ;;  %1854 = vadd.xlane.f32.xlu0 %v1853_v6 }
 0x1e8   :  { %v1653_v63 = vmul.f32 %v6023_v52, %v6009_v41  ;;  %v6026_v45 = vunpack.c.l.bf16 %v6025_v11  ;;  %v6027_v31 = vunpack.c.l.bf16 %v5904_v3  ;;  %v6028_v4 = vunpack.c.h.bf16 %v6025_v11 }
 0x1e9   :  { %v1654_v23 = vmul.f32 %v6024_v20, %v6012_v46  ;;  %v2157_v32 = vadd.f32 %v2156_v47, %v2120_v58  ;;  %v2307_v30 = vadd.f32 %v2270_v8, %v2269_v5  ;;  %v6031_v28 = vunpack.c.l.bf16 %v6030_v49 }
 0x1ea   :  { %v2411_v60 = vmul.f32 %v6026_v45, %v5935_v40  ;;  %v2271_v27 = vmul.f32 %v6027_v31, %v4511_v51  ;;  %v2412_v54 = vmul.f32 %v6028_v4, %v4470_v39  ;;  %v6032_v44 = vunpack.c.l.bf16 %v5901_v42 }
 0x1eb   :  { %v1503_v33 = vmul.f32 %v6031_v28, %v6029_v2  ;;  %v6033_v47 = vunpack.c.h.bf16 %v5901_v42  ;;  %v2294_v43 = vadd.f32 %v2293_v15, %v2260_v36  ;;  %v6034_v8 = vunpack.c.h.bf16 %v5904_v3  ;;  %v6036_v42 = vld [vmem:[#allocation19_spill] sm:$0xff]  ;;  %v6039_v3 = vld [vmem:[#allocation57_spill] sm:$0xff]  ;;  %2006 = vadd.xlane.f32.xlu0 %v2005_v21 }
 0x1ec   :  { %v2421_v34 = vmul.f32 %v6032_v44, %v4496_v1  ;;  %v2445_v52 = vadd.f32 %v2444_v16, %v2411_v60  ;;  %v2308_v20 = vadd.f32 %v2307_v30, %v2271_v27  ;;  %v1689_v31 = vadd.f32 %v1654_v23, %v1653_v63  ;;  %v6041_v63 = vld [vmem:[#allocation33_spill] sm:$0xff] }
 0x1ed   :  { %v2422_v58 = vmul.f32 %v6033_v47, %v4526_v7  ;;  %v2272_v5 = vmul.f32 %v6034_v8, %v4541_v48  ;;  %v1538_v45 = vadd.f32 %v1537_v25, %v1503_v33  ;;  %v6035_v4 = vunpack.c.l.bf16 %v5918_v56  ;;  %2295 = vadd.xlane.f32.xlu1 %v2294_v43  ;;  %v6045_v43 = vld [vmem:[#allocation92_spill] sm:$0xff] }
 0x1ee   :  { %v6037_v47 = vunpack.c.l.bf16 %v6036_v42  ;;  %v6038_v15 = vunpack.c.h.bf16 %v6036_v42  ;;  %v6040_v36 = vunpack.c.l.bf16 %v6039_v3  ;;  %v6042_v23 = vunpack.c.h.bf16 %v6030_v49 }
 0x1ef   :  { %v2423_v28 = vmul.f32 %v6035_v4, %v4511_v51  ;;  %v2459_v39 = vadd.f32 %v2422_v58, %v2421_v34  ;;  %v2309_v44 = vadd.f32 %v2308_v20, %v2272_v5  ;;  %v6043_v27 = vunpack.c.h.bf16 %v5918_v56  ;;  %v6046_v20 = vld [vmem:[#allocation16_spill] sm:$0xff]  ;;  %2158 = vadd.xlane.f32.xlu0 %v2157_v32 }
 0x1f0   :  { %v1805_v19 = vmul.f32 %v6037_v47, %v6009_v41  ;;  %v1806_v16 = vmul.f32 %v6038_v15, %v6012_v46  ;;  %v2573_v25 = vmul.f32 %v6040_v36, %v4496_v1  ;;  %v1504_v60 = vmul.f32 %v6042_v23, %v6041_v63 }
 0x1f1   :  { %v2424_v30 = vmul.f32 %v6043_v27, %v4541_v48  ;;  %v2460_v33 = vadd.f32 %v2459_v39, %v2423_v28  ;;  %v6044_v34 = vunpack.c.h.bf16 %v6039_v3  ;;  %v4883_v8 = vmax.f32 %v6045_v43, 0.0 }
 0x1f2   :  { %v2446_v5 = vadd.f32 %v2445_v52, %v2412_v54  ;;  %v6047_v4 = vunpack.c.l.bf16 %v6046_v20  ;;  %v6048_v49 = vunpack.c.h.bf16 %v6046_v20  ;;  %v1539_v56 = vadd.f32 %v1538_v45, %v1504_v60  ;;  %v6050_v54 = vld [vmem:[#allocation77_spill] sm:$0xff]  ;;  %v6060_v20 = vld [vmem:[#allocation78_spill] sm:$0xff] }
 0x1f3   :  { %v2574_v58 = vmul.f32 %v6044_v34, %v4526_v7  ;;  %v4891_v15 = vadd.f32 %v2460_v33, %v2424_v30  ;;  %v6049_v39 = vunpack.c.l.bf16 %v5929_v37  ;;  %v1841_v6 = vadd.f32 %v1806_v16, %v1805_v19  ;;  %v6053_v45 = vld [vmem:[#allocation21_spill] sm:$0xff]  ;;  %2310 = vadd.xlane.f32.xlu0 %v2309_v44 }
 0x1f4   :  { %v1655_v42 = vmul.f32 %v6047_v4, %v6029_v2  ;;  %v1656_v47 = vmul.f32 %v6048_v49, %v6041_v63  ;;  %2447 = vadd.xlane.f32.xlu1 %v2446_v5  ;;  %v6051_v52 = vunpack.c.l.bf16 %v6050_v54  ;;  %v6052_v27 = vunpack.c.h.bf16 %v6050_v54 }
 0x1f5   :  { %v2575_v28 = vmul.f32 %v6049_v39, %v4511_v51  ;;  %v2611_v3 = vadd.f32 %v2574_v58, %v2573_v25  ;;  %v6054_v60 = vunpack.c.l.bf16 %v6053_v45  ;;  %v6055_v33 = vunpack.c.h.bf16 %v6053_v45 }
 0x1f6   :  { %v1690_v36 = vadd.f32 %v1689_v31, %v1655_v42  ;;  %v2725_v23 = vmul.f32 %v6051_v52, %v4496_v1  ;;  %v2726_v34 = vmul.f32 %v6052_v27, %v4526_v7  ;;  %v6056_v31 = vunpack.c.h.bf16 %v5929_v37  ;;  %v6057_v1 = vld [vmem:[#allocation20_spill] sm:$0xff]  ;;  %v6062_v37 = vld [vmem:[#allocation23_spill] sm:$0xff] }
 0x1f7   :  { %v1957_v30 = vmul.f32 %v6054_v60, %v6009_v41  ;;  %v1958_v43 = vmul.f32 %v6055_v33, %v6012_v46  ;;  %v2612_v16 = vadd.f32 %v2611_v3, %v2575_v28  ;;  %v6058_v25 = vunpack.c.l.bf16 %v6057_v1  ;;  %2462 = vadd.xlane.f32.xlu0 %v4891_v15 }
 0x1f8   :  { %v2576_v19 = vmul.f32 %v6056_v31, %v4541_v48  ;;  %v6059_v7 = vunpack.c.h.bf16 %v6057_v1  ;;  %v6061_v4 = vunpack.c.l.bf16 %v6060_v20  ;;  %v2763_v49 = vadd.f32 %v2726_v34, %v2725_v23  ;;  %1540 = vadd.xlane.f32.xlu1 %v1539_v56 }
 0x1f9   :  { %v1807_v58 = vmul.f32 %v6058_v25, %v6029_v2  ;;  %v6063_v52 = vunpack.c.l.bf16 %v6062_v37  ;;  %v6064_v21 = vunpack.c.h.bf16 %v6062_v37  ;;  %v6065_v27 = vunpack.c.l.bf16 %v5931_v12 }
 0x1fa   :  { %v1808_v5 = vmul.f32 %v6059_v7, %v6041_v63  ;;  %v2727_v42 = vmul.f32 %v6061_v4, %v4511_v51  ;;  %v4920_v39 = vadd.f32 %v2612_v16, %v2576_v19  ;;  %v1691_v60 = vadd.f32 %v1690_v36, %v1656_v47  ;;  %v6068_v16 = vld [vmem:[#allocation22_spill] sm:$0xff]  ;;  %v6070_v4 = vld [vmem:[#allocation25_spill] sm:$0xff] }
 0x1fb   :  { %v2109_v28 = vmul.f32 %v6063_v52, %v6009_v41  ;;  %v2110_v3 = vmul.f32 %v6064_v21, %v6012_v46  ;;  %v1513_v45 = vmul.f32 %v6065_v27, %v4814_v9  ;;  %v6066_v51 = vunpack.c.h.bf16 %v6060_v20 }
 0x1fc   :  { %v2764_v34 = vadd.f32 %v2763_v49, %v2727_v42  ;;  %v6067_v33 = vunpack.c.h.bf16 %v5931_v12  ;;  %v1842_v19 = vadd.f32 %v1841_v6, %v1807_v58  ;;  %v6069_v1 = vunpack.c.l.bf16 %v6068_v16  ;;  %1692 = vadd.xlane.f32.xlu1 %v1691_v60  ;;  %2614 = vadd.xlane.f32.xlu0 %v4920_v39 }
 0x1fd   :  { %v2728_v23 = vmul.f32 %v6066_v51, %v4541_v48  ;;  %v1993_v7 = vadd.f32 %v1958_v43, %v1957_v30  ;;  %v6071_v37 = vunpack.c.l.bf16 %v6070_v4  ;;  %v6072_v48 = vunpack.c.h.bf16 %v6070_v4 }
 0x1fe   :  { %v1514_v31 = vmul.f32 %v6067_v33, %v4817_v38  ;;  %v1959_v25 = vmul.f32 %v6069_v1, %v6029_v2  ;;  %v6073_v12 = vunpack.c.l.bf16 %v5942_v59  ;;  %v6074_v42 = vunpack.c.h.bf16 %v6068_v16 }
 0x1ff   :  { %v2261_v56 = vmul.f32 %v6071_v37, %v6009_v41  ;;  %v4943_v47 = vadd.f32 %v2764_v34, %v2728_v23  ;;  %v2262_v36 = vmul.f32 %v6072_v48, %v6012_v46  ;;  %v2145_v43 = vadd.f32 %v2110_v3, %v2109_v28 }
 0x200   :  { %v1515_v6 = vmul.f32 %v6073_v12, %v4775_v18  ;;  %v1552_v58 = vadd.f32 %v1514_v31, %v1513_v45  ;;  %v1960_v30 = vmul.f32 %v6074_v42, %v6041_v63  ;;  %v6075_v49 = vunpack.c.l.bf16 %v5944_v61  ;;  %v6078_v45 = vld [vmem:[#allocation27_spill] sm:$0xff] }
 0x201   :  { %v6076_v52 = vunpack.c.h.bf16 %v5944_v61  ;;  %v6077_v27 = vunpack.c.h.bf16 %v5942_v59  ;;  %v6079_v34 = vunpack.c.l.bf16 %v6078_v45  ;;  %v6080_v28 = vunpack.c.h.bf16 %v6078_v45  ;;  %v6082_v59 = vld [vmem:[#allocation24_spill] sm:$0xff]  ;;  %2766 = vadd.xlane.f32.xlu0 %v4943_v47 }
 0x202   :  { %v1665_v32 = vmul.f32 %v6075_v49, %v4814_v9  ;;  %v1553_v23 = vadd.f32 %v1552_v58, %v1515_v6  ;;  %v1843_v31 = vadd.f32 %v1842_v19, %v1808_v5  ;;  %v1994_v16 = vadd.f32 %v1993_v7, %v1959_v25 }
 0x203   :  { %v1666_v21 = vmul.f32 %v6076_v52, %v4817_v38  ;;  %v1516_v51 = vmul.f32 %v6077_v27, %v4883_v8  ;;  %v2413_v33 = vmul.f32 %v6079_v34, %v6009_v41  ;;  %v2414_v3 = vmul.f32 %v6080_v28, %v6012_v46  ;;  %v6090_v27 = vld [vmem:[#allocation29_spill] sm:$0xff] }
 0x204   :  { %v6081_v61 = vunpack.c.l.bf16 %v5960_v22  ;;  %v6083_v4 = vunpack.c.l.bf16 %v6082_v59  ;;  %v2297_v48 = vadd.f32 %v2262_v36, %v2261_v56  ;;  %v6084_v6 = vunpack.c.l.bf16 %v5956_v57  ;;  %1844 = vadd.xlane.f32.xlu1 %v1843_v31  ;;  %v6088_v36 = vld [vmem:[#allocation26_spill] sm:$0xff] }
 0x205   :  { %v1704_v60 = vadd.f32 %v1666_v21, %v1665_v32  ;;  %v4975_v12 = vadd.f32 %v1553_v23, %v1516_v51  ;;  %v6085_v5 = vunpack.c.h.bf16 %v6082_v59  ;;  %v6086_v25 = vunpack.c.h.bf16 %v5960_v22 }
 0x206   :  { %v1667_v1 = vmul.f32 %v6081_v61, %v4775_v18  ;;  %v2111_v37 = vmul.f32 %v6083_v4, %v6029_v2  ;;  %v1817_v58 = vmul.f32 %v6084_v6, %v4814_v9  ;;  %v6087_v42 = vunpack.c.h.bf16 %v5956_v57 }
 0x207   :  { %v2112_v19 = vmul.f32 %v6085_v5, %v6041_v63  ;;  %v1668_v7 = vmul.f32 %v6086_v25, %v4883_v8  ;;  %v6089_v32 = vunpack.c.l.bf16 %v6088_v36  ;;  %v2449_v21 = vadd.f32 %v2414_v3, %v2413_v33  ;;  %1555 = vadd.xlane.f32.xlu0 %v4975_v12 }
 0x208   :  { %v1705_v44 = vadd.f32 %v1704_v60, %v1667_v1  ;;  %v1818_v49 = vmul.f32 %v6087_v42, %v4817_v38  ;;  %v2146_v56 = vadd.f32 %v2145_v43, %v2111_v37  ;;  %v6091_v51 = vunpack.c.l.bf16 %v6090_v27  ;;  %v6097_v37 = vld [vmem:[#allocation28_spill] sm:$0xff] }
 0x209   :  { %v2263_v52 = vmul.f32 %v6089_v32, %v6029_v2  ;;  %v6092_v22 = vunpack.c.h.bf16 %v6090_v27  ;;  %v6093_v57 = vunpack.c.l.bf16 %v5971_v0  ;;  %v1995_v31 = vadd.f32 %v1994_v16, %v1960_v30 }
 0x20a   :  { %v2565_v23 = vmul.f32 %v6091_v51, %v6009_v41  ;;  %v4995_v45 = vadd.f32 %v1705_v44, %v1668_v7  ;;  %v1856_v43 = vadd.f32 %v1818_v49, %v1817_v58  ;;  %v6094_v33 = vunpack.c.l.bf16 %v5964_v29 }
 0x20b   :  { %v2566_v34 = vmul.f32 %v6092_v22, %v6012_v46  ;;  %v1819_v28 = vmul.f32 %v6093_v57, %v4775_v18  ;;  %v2298_v61 = vadd.f32 %v2297_v48, %v2263_v52  ;;  %v6095_v1 = vunpack.c.h.bf16 %v5964_v29  ;;  %1996 = vadd.xlane.f32.xlu1 %v1995_v31  ;;  %v6107_v57 = vld [vmem:[#allocation31_spill] sm:$0xff] }
 0x20c   :  { %v1969_v3 = vmul.f32 %v6094_v33, %v4814_v9  ;;  %v6096_v59 = vunpack.c.h.bf16 %v6088_v36  ;;  %v6098_v6 = vunpack.c.l.bf16 %v6097_v37  ;;  %v6099_v15 = vunpack.c.h.bf16 %v5971_v0  ;;  %1707 = vadd.xlane.f32.xlu0 %v4995_v45 }
 0x20d   :  { %v1970_v60 = vmul.f32 %v6095_v1, %v4817_v38  ;;  %v1857_v16 = vadd.f32 %v1856_v43, %v1819_v28  ;;  %v2147_v48 = vadd.f32 %v2146_v56, %v2112_v19  ;;  %v6100_v5 = vunpack.c.h.bf16 %v6097_v37 }
 0x20e   :  { %v2264_v4 = vmul.f32 %v6096_v59, %v6041_v63  ;;  %v2415_v58 = vmul.f32 %v6098_v6, %v6029_v2  ;;  %v1820_v30 = vmul.f32 %v6099_v15, %v4883_v8  ;;  %v6101_v25 = vunpack.c.l.bf16 %v5982_v24 }
 0x20f   :  { %v2416_v29 = vmul.f32 %v6100_v5, %v6041_v63  ;;  %v2008_v44 = vadd.f32 %v1970_v60, %v1969_v3  ;;  %v2601_v49 = vadd.f32 %v2566_v34, %v2565_v23  ;;  %v6102_v0 = vunpack.c.l.bf16 %v5976_v55  ;;  %2148 = vadd.xlane.f32.xlu1 %v2147_v48 }
 0x210   :  { %v1971_v7 = vmul.f32 %v6101_v25, %v4775_v18  ;;  %v2450_v42 = vadd.f32 %v2449_v21, %v2415_v58  ;;  %v5025_v36 = vadd.f32 %v1857_v16, %v1820_v30  ;;  %v2299_v19 = vadd.f32 %v2298_v61, %v2264_v4  ;;  %v6105_v21 = vld [vmem:[#allocation30_spill] sm:$0xff] }
 0x211   :  { %v2121_v32 = vmul.f32 %v6102_v0, %v4814_v9  ;;  %v6103_v56 = vunpack.c.h.bf16 %v5982_v24  ;;  %v6104_v51 = vunpack.c.h.bf16 %v5976_v55  ;;  %v6106_v23 = vunpack.c.l.bf16 %v6105_v21 }
 0x212   :  { %v2009_v27 = vadd.f32 %v2008_v44, %v1971_v7  ;;  %v6108_v28 = vunpack.c.l.bf16 %v6107_v57  ;;  %v6109_v39 = vunpack.c.h.bf16 %v6107_v57  ;;  %v6110_v24 = vunpack.c.l.bf16 %v5989_v13  ;;  %1859 = vadd.xlane.f32.xlu0 %v5025_v36 }
 0x213   :  { %v1972_v52 = vmul.f32 %v6103_v56, %v4883_v8  ;;  %v2122_v22 = vmul.f32 %v6104_v51, %v4817_v38  ;;  %v2567_v34 = vmul.f32 %v6106_v23, %v6029_v2  ;;  %v6111_v55 = vunpack.c.l.bf16 %v5993_v62  ;;  %2300 = vadd.xlane.f32.xlu1 %v2299_v19 }
 0x214   :  { %v2717_v43 = vmul.f32 %v6108_v28, %v6009_v41  ;;  %v2718_v31 = vmul.f32 %v6109_v39, %v6012_v46  ;;  %v2273_v61 = vmul.f32 %v6110_v24, %v4814_v9  ;;  %v6112_v60 = vunpack.c.h.bf16 %v5989_v13  ;;  %v6113_v46 = vld [vmem:[#allocation59_spill] sm:$0xff] }
 0x215   :  { %v5049_v33 = vadd.f32 %v2009_v27, %v1972_v52  ;;  %v2123_v3 = vmul.f32 %v6111_v55, %v4775_v18  ;;  %v2160_v1 = vadd.f32 %v2122_v22, %v2121_v32  ;;  %v2451_v59 = vadd.f32 %v2450_v42, %v2416_v29  ;;  %v6128_v55 = vld [vmem:[#allocation32_spill] sm:$0xff] }
 0x216   :  { %v2274_v41 = vmul.f32 %v6112_v60, %v4817_v38  ;;  %v2602_v4 = vadd.f32 %v2601_v49, %v2567_v34  ;;  %v6114_v37 = vunpack.c.l.bf16 %v6113_v46  ;;  %v6115_v58 = vunpack.c.h.bf16 %v6113_v46  ;;  %v6130_v60 = vld [vmem:[#allocation79_spill] sm:$0xff] }
 0x217   :  { %v6116_v30 = vunpack.c.h.bf16 %v5993_v62  ;;  %v2161_v48 = vadd.f32 %v2160_v1, %v2123_v3  ;;  %v6117_v13 = vunpack.c.l.bf16 %v5999_v50  ;;  %v2753_v25 = vadd.f32 %v2718_v31, %v2717_v43  ;;  %v5096_v43 = vld [vmem:[%s5495_s3 + $0x238] sm:$0xff]  ;;  %2452 = vadd.xlane.f32.xlu1 %v2451_v59  ;;  %2011 = vadd.xlane.f32.xlu0 %v5049_v33 }
 0x218   :  { %v1353_v6 = vmul.f32 %v6114_v37, %v4814_v9  ;;  %v1354_v15 = vmul.f32 %v6115_v58, %v4817_v38  ;;  %v2312_v29 = vadd.f32 %v2274_v41, %v2273_v61  ;;  %v6118_v7 = vunpack.c.h.bf16 %v5999_v50  ;;  %v6122_v50 = vld [vmem:[#allocation17_spill] sm:$0xff] }
 0x219   :  { %v2124_v16 = vmul.f32 %v6116_v30, %v4883_v8  ;;  %v2275_v5 = vmul.f32 %v6117_v13, %v4775_v18  ;;  %v6119_v42 = vunpack.c.l.bf16 %v5936_v14  ;;  %v6120_v32 = vunpack.c.l.bf16 %v6002_v53 }
 0x21a   :  { %v2276_v44 = vmul.f32 %v6118_v7, %v4883_v8  ;;  %v1392_v47 = vadd.f32 %v1354_v15, %v1353_v6  ;;  %v6121_v52 = vunpack.c.h.bf16 %v6002_v53  ;;  %v6123_v51 = vunpack.c.l.bf16 %v6122_v50 }
 0x21b   :  { %v1355_v49 = vmul.f32 %v6119_v42, %v4775_v18  ;;  %v5076_v0 = vadd.f32 %v2161_v48, %v2124_v16  ;;  %v2313_v62 = vadd.f32 %v2312_v29, %v2275_v5  ;;  %v2425_v56 = vmul.f32 %v6120_v32, %v4814_v9  ;;  %v5134_v29 = vld [vmem:[%s5495_s3 + $0x278] sm:$0xff] }
 0x21c   :  { %v2426_v27 = vmul.f32 %v6121_v52, %v4817_v38  ;;  %v1345_v22 = vmul.f32 %v6123_v51, %v4417_v10  ;;  %v6124_v23 = vunpack.c.h.bf16 %v6122_v50  ;;  %v6125_v19 = vunpack.c.h.bf16 %v5936_v14  ;;  %v1521_v50 = vpop.xlane.xlu1 %1520  ;;  %v6138_v51 = vld [vmem:[#allocation34_spill] sm:$0xff] }
 0x21d   :  { %v1393_v28 = vadd.f32 %v1392_v47, %v1355_v49  ;;  %v5099_v53 = vadd.f32 %v2313_v62, %v2276_v44  ;;  %v6126_v10 = vunpack.c.l.bf16 %v6025_v11  ;;  %v6127_v24 = vunpack.c.h.bf16 %v6105_v21  ;;  %v6135_v49 = vld [vmem:[#allocation18_spill] sm:$0xff]  ;;  %2163 = vadd.xlane.f32.xlu0 %v5076_v0 }
 0x21e   :  { %v1346_v34 = vmul.f32 %v6124_v23, %v4420_v26  ;;  %v1356_v57 = vmul.f32 %v6125_v19, %v4883_v8  ;;  %v2464_v31 = vadd.f32 %v2426_v27, %v2425_v56  ;;  %v3243_v26 = vld [vmem:[%s5495_s3 + $0x230] sm:$0xff]  ;;  %v6129_v3 = vunpack.c.l.bf16 %v6128_v55 }
 0x21f   :  { %v2427_v39 = vmul.f32 %v6126_v10, %v4775_v18  ;;  %v2546_v14 = vunpack.c.h.bf16 %v3243_v26  ;;  %v2568_v61 = vmul.f32 %v6127_v24, %v6041_v63  ;;  %v6131_v41 = vunpack.c.l.bf16 %v6130_v60  ;;  %v6139_v26 = vld [vmem:[#allocation36_spill] sm:$0xff] }
 0x220   :  { %v2719_v12 = vmul.f32 %v6129_v3, %v6029_v2  ;;  %v5113_v1 = vadd.f32 %v1393_v28, %v1356_v57  ;;  %v6132_v37 = vunpack.c.h.bf16 %v6025_v11  ;;  %v2547_v15 = vunpack.c.l.bf16 %v5096_v43  ;;  %v3046_v2 = vld [vmem:[%s5495_s3 + $0x270] sm:$0xff]  ;;  %v6141_v24 = vld [vmem:[#allocation80_spill] sm:$0xff] }
 0x221   :  { %v2577_v46 = vmul.f32 %v6131_v41, %v4814_v9  ;;  %v2465_v58 = vadd.f32 %v2464_v31, %v2427_v39  ;;  %v2578_v21 = vmul.f32 %v2546_v14, %v4817_v38  ;;  %v2603_v30 = vadd.f32 %v2602_v4, %v2568_v61  ;;  %2315 = vadd.xlane.f32.xlu0 %v5099_v53 }
 0x222   :  { %v2428_v6 = vmul.f32 %v6132_v37, %v4883_v8  ;;  %v2754_v16 = vadd.f32 %v2753_v25, %v2719_v12  ;;  %v1382_v48 = vadd.f32 %v1346_v34, %v1345_v22  ;;  %v2548_v59 = vunpack.c.h.bf16 %v5096_v43  ;;  %v1361_v43 = vpop.xlane.xlu0 %1360 }
 0x223   :  { %v2579_v11 = vmul.f32 %v2547_v15, %v4775_v18  ;;  %v2616_v5 = vadd.f32 %v2578_v21, %v2577_v46  ;;  %v6133_v7 = vlaneseq  ;;  %v6134_v4 = vunpack.c.h.bf16 %v6128_v55  ;;  %2604 = vadd.xlane.f32.xlu1 %v2603_v30  ;;  %v6143_v55 = vld [vmem:[#allocation82_spill] sm:$0xff] }
 0x224   :  { %v5127_v13 = vadd.f32 %v2465_v58, %v2428_v6  ;;  %v2697_v45 = vunpack.c.l.bf16 %v3046_v2  ;;  %v2698_v42 = vunpack.c.h.bf16 %v3046_v2  ;;  %v6136_v47 = vunpack.c.l.bf16 %v6135_v49  ;;  %v6145_v46 = vld [vmem:[#allocation10_spill] sm:$0xff]  ;;  %v1673_v58 = vpop.xlane.xlu1 %1672 }
 0x225   :  { %v5137_v44 = vand.u32 127, %v6133_v7  ;;  %v2720_v25 = vmul.f32 %v6134_v4, %v6041_v63  ;;  %v6137_v32 = vmov %v6131_v41  ;;  %v2580_v52 = vmul.f32 %v2548_v59, %v4883_v8  ;;  %v6147_v7 = vld [vmem:[#allocation81_spill] sm:$0xff] }
 0x226   :  { %v1347_v62 = vmul.f32 %v6136_v47, %v4432_v17  ;;  %v2561_v56 = vmul.f32 %v6137_v32, %v5920_v35  ;;  %v2617_v27 = vadd.f32 %v2616_v5, %v2579_v11  ;;  %v2562_v22 = vmul.f32 %v2546_v14, %v6138_v51  ;;  %v6146_v5 = vld [vmem:[#allocation35_spill] sm:$0xff]  ;;  %2467 = vadd.xlane.f32.xlu0 %v5127_v13 }
 0x227   :  { %v2699_v23 = vunpack.c.l.bf16 %v5134_v29  ;;  %v2729_v63 = vmul.f32 %v2697_v45, %v4814_v9  ;;  %v2730_v34 = vmul.f32 %v2698_v42, %v4817_v38  ;;  %v2755_v19 = vadd.f32 %v2754_v16, %v2720_v25 }
 0x228   :  { %v1383_v17 = vadd.f32 %v1382_v48, %v1347_v62  ;;  %v1409_v57 = vadd.s32 4294967288, %v5137_v44  ;;  %v2618_v28 = vadd.f32 %v2617_v27, %v2580_v52  ;;  %v2700_v10 = vunpack.c.h.bf16 %v5134_v29  ;;  %v1825_v0 = vpop.xlane.xlu1 %1824 }
 0x229   :  { %v2731_v39 = vmul.f32 %v2699_v23, %v4775_v18  ;;  %v2768_v31 = vadd.f32 %v2730_v34, %v2729_v63  ;;  %2756 = vadd.xlane.f32.xlu1 %v2755_v19  ;;  %v6140_v14 = vunpack.c.h.bf16 %v6135_v49  ;;  %v6142_v38 = vunpack.c.l.bf16 %v6050_v54 }
 0x22a   :  { %v2596_v61 = vadd.f32 %v2562_v22, %v2561_v56  ;;  %v6144_v3 = vunpack.c.h.bf16 %v6050_v54  ;;  %v2732_v60 = vmul.f32 %v2700_v10, %v4883_v8  ;;  %v5170_v37 = vsub.s32 %v5137_v44, %v6145_v46  ;;  %v1366_v54 = vpop.xlane.xlu0 %1365  ;;  %2619 = vadd.xlane.f32.xlu0 %v2618_v28 }
 0x22b   :  { %v1348_v9 = vmul.f32 %v6140_v14, %v6139_v26  ;;  %v2709_v36 = vmul.f32 %v6142_v38, %v6141_v24  ;;  %v2769_v41 = vadd.f32 %v2768_v31, %v2731_v39  ;;  %v5173_v6 = vsub.s32 %v1409_v57, %v6145_v46 }
 0x22c   :  { %v2710_v12 = vmul.f32 %v6144_v3, %v6143_v55  ;;  %v2563_v21 = vmul.f32 %v2547_v15, %v5935_v40  ;;  %v1408_v33 = vrot.slane %v1361_v43, %v5170_v37  ;;  %v2713_v48 = vmul.f32 %v2697_v45, %v5920_v35  ;;  %v6149_v45 = vld [vmem:[#allocation83_spill] sm:$0xff] }
 0x22d   :  { %v1384_v18 = vadd.f32 %v1383_v17, %v1348_v9  ;;  %v2770_v2 = vadd.f32 %v2769_v41, %v2732_v60  ;;  %v1413_v16 = vrot.slane %v1366_v54, %v5173_v6  ;;  %v2714_v11 = vmul.f32 %v2698_v42, %v6138_v51  ;;  %v1977_v51 = vpop.xlane.xlu1 %1976 }
 0x22e   :  { %v2597_v30 = vadd.f32 %v2596_v61, %v2563_v21  ;;  %v2743_v8 = vadd.f32 %v2710_v12, %v2709_v36  ;;  %v2564_v29 = vmul.f32 %v2548_v59, %v6146_v5  ;;  %v6148_v4 = vunpack.c.l.bf16 %v6060_v20  ;;  %v1526_v35 = vpop.xlane.xlu0 %1525 }
 0x22f   :  { %1385 = vadd.xlane.f32.xlu1 %v1384_v18  ;;  %v5183_v15 = vsel %vm1414_vm5, %v1413_v16, %v1408_v33  ;;  %v2748_v62 = vadd.f32 %v2714_v11, %v2713_v48  ;;  %v2715_v32 = vmul.f32 %v2699_v23, %v5935_v40  ;;  %v1568_v59 = vrot.slane %v1521_v50, %v5170_v37 }
 0x230   :  { %v2711_v25 = vmul.f32 %v6148_v4, %v6147_v7  ;;  %v2598_v49 = vadd.f32 %v2597_v30, %v2564_v29  ;;  %v1572_v56 = vrot.slane %v1526_v35, %v5173_v6  ;;  %v2716_v22 = vmul.f32 %v2700_v10, %v6146_v5  ;;  %2771 = vadd.xlane.f32.xlu0 %v2770_v2 }
 0x231   :  { %v2749_v27 = vadd.f32 %v2748_v62, %v2715_v32  ;;  %v2129_v34 = vpop.xlane.xlu1 %2128  ;;  %v1872_v19 = vrot.slane %v1825_v0, %v5170_v37  ;;  %v2024_v39 = vrot.slane %v1977_v51, %v5170_v37  ;;  %v1416_v61 = vadd.s32 4294967280, %v5137_v44 }
 0x232   :  { %v2744_v47 = vadd.f32 %v2743_v8, %v2711_v25  ;;  %v1573_v53 = vsel %vm1414_vm5, %v1572_v56, %v1568_v59  ;;  %v1678_v63 = vpop.xlane.xlu0 %1677  ;;  %v2176_v9 = vrot.slane %v2129_v34, %v5170_v37  ;;  %vm1456_vm10 = vcmp.eq.s32.totalorder %v5137_v44, 0 }
 0x233   :  { %1395 = vadd.xlane.f32.xlu1 %v5113_v1  ;;  %v6150_v1 = vunpack.c.h.bf16 %v6060_v20  ;;  %v1720_v20 = vrot.slane %v1673_v58, %v5170_v37  ;;  %v1724_v40 = vrot.slane %v1678_v63, %v5173_v6  ;;  %v2750_v23 = vadd.f32 %v2749_v27, %v2716_v22 }
 0x234   :  { %v5216_v18 = vsub.s32 %v1416_v61, %v6145_v46  ;;  %vm1608_vm11 = vcmp.eq.s32.totalorder %v5137_v44, 1  ;;  %vm1760_vm12 = vcmp.eq.s32.totalorder %v5137_v44, 2  ;;  %vm1912_vm13 = vcmp.eq.s32.totalorder %v5137_v44, 3 }
 0x235   :  { %v2712_v42 = vmul.f32 %v6150_v1, %v6149_v45  ;;  %v1725_v50 = vsel %vm1414_vm5, %v1724_v40, %v1720_v20  ;;  %v2281_v57 = vpop.xlane.xlu1 %2280  ;;  %vm2064_vm14 = vcmp.eq.s32.totalorder %v5137_v44, 4  ;;  %vm2216_vm15 = vcmp.eq.s32.totalorder %v5137_v44, 5 }
 0x236   :  { %v1830_v13 = vpop.xlane.xlu0 %1829  ;;  %v2328_v3 = vrot.slane %v2281_v57, %v5170_v37  ;;  %vm2368_vm0 = vcmp.eq.s32.totalorder %v5137_v44, 6  ;;  %vm2520_vm1 = vcmp.eq.s32.totalorder %v5137_v44, 7  ;;  %vm2672_vm2 = vcmp.eq.s32.totalorder %v5137_v44, 8 }
 0x237   :  { %2599 = vadd.xlane.f32.xlu1 %v2598_v49  ;;  %v2745_v52 = vadd.f32 %v2744_v47, %v2712_v42  ;;  %v1876_v17 = vrot.slane %v1830_v13, %v5173_v6  ;;  %vm2824_vm3 = vcmp.eq.s32.totalorder %v5137_v44, 9 }
 0x239   :  { %v1877_v43 = vsel %vm1414_vm5, %v1876_v17, %v1872_v19  ;;  %v2433_v31 = vpop.xlane.xlu1 %2432  ;;  %v1423_v17 = vadd.s32 4294967272, %v5137_v44 }
 0x23a   :  { %v1982_v10 = vpop.xlane.xlu0 %1981  ;;  %v2480_v21 = vrot.slane %v2433_v31, %v5170_v37 }
 0x23b   :  { %2746 = vadd.xlane.f32.xlu1 %v2745_v52  ;;  %v2028_v28 = vrot.slane %v1982_v10, %v5173_v6 }
 0x23d   :  { %v2029_v26 = vsel %vm1414_vm5, %v2028_v28, %v2024_v39  ;;  %v2585_v38 = vpop.xlane.xlu1 %2584  ;;  %v5271_v28 = vsub.s32 %v1423_v17, %v6145_v46 }
 0x23e   :  { %v2134_v14 = vpop.xlane.xlu0 %2133  ;;  %v2632_v16 = vrot.slane %v2585_v38, %v5170_v37 }
 0x23f   :  { %2751 = vadd.xlane.f32.xlu1 %v2750_v23  ;;  %v2180_v24 = vrot.slane %v2134_v14, %v5173_v6 }
 0x241   :  { %v2181_v36 = vsel %vm1414_vm5, %v2180_v24, %v2176_v9  ;;  %v2737_v60 = vpop.xlane.xlu1 %2736 }
 0x242   :  { %v2286_v55 = vpop.xlane.xlu0 %2285  ;;  %v2784_v25 = vrot.slane %v2737_v60, %v5170_v37 }
 0x243   :  { %v2332_v12 = vrot.slane %v2286_v55, %v5173_v6 }
 0x245   :  { %v2333_v41 = vsel %vm1414_vm5, %v2332_v12, %v2328_v3  ;;  %v1371_v54 = vpop.xlane.xlu1 %1370 }
 0x246   :  { %v2438_v58 = vpop.xlane.xlu0 %2437  ;;  %v1420_v8 = vrot.slane %v1371_v54, %v5216_v18 }
 0x247   :  { %v2484_v2 = vrot.slane %v2438_v58, %v5173_v6 }
 0x248   :  { %v1422_v11 = vsel %vm1421_vm6, %v1420_v8, %v5183_v15 }
 0x249   :  { %v2485_v30 = vsel %vm1414_vm5, %v2484_v2, %v2480_v21  ;;  %v1531_v5 = vpop.xlane.xlu1 %1530 }
 0x24a   :  { %v2590_v33 = vpop.xlane.xlu0 %2589  ;;  %v1577_v7 = vrot.slane %v1531_v5, %v5216_v18 }
 0x24b   :  { %v2636_v48 = vrot.slane %v2590_v33, %v5173_v6 }
 0x24c   :  { %v5231_v49 = vsel %vm1421_vm6, %v1577_v7, %v1573_v53 }
 0x24d   :  { %v2637_v29 = vsel %vm1414_vm5, %v2636_v48, %v2632_v16  ;;  %v1683_v47 = vpop.xlane.xlu1 %1682 }
 0x24e   :  { %v2742_v4 = vpop.xlane.xlu0 %2741  ;;  %v1729_v35 = vrot.slane %v1683_v47, %v5216_v18 }
 0x24f   :  { %v2788_v0 = vrot.slane %v2742_v4, %v5173_v6 }
 0x250   :  { %v1730_v45 = vsel %vm1421_vm6, %v1729_v35, %v1725_v50 }
 0x251   :  { %v5234_v62 = vsel %vm1414_vm5, %v2788_v0, %v2784_v25  ;;  %v1835_v1 = vpop.xlane.xlu1 %1834 }
 0x252   :  { %v5237_v15 = vpop.xlane.xlu0 %1380  ;;  %v1881_v42 = vrot.slane %v1835_v1, %v5216_v18 }
 0x254   :  { %v5244_v59 = vsel %vm1421_vm6, %v1881_v42, %v1877_v43 }
 0x255   :  { %v1987_v56 = vpop.xlane.xlu1 %1986 }
 0x256   :  { %v5241_v32 = vpop.xlane.xlu0 %1545  ;;  %v2033_v52 = vrot.slane %v1987_v56, %v5216_v18 }
 0x257   :  { %v1591_v56 = vrot.slane %v5241_v32, %v5173_v6 }
 0x258   :  { %v2034_v53 = vsel %vm1421_vm6, %v2033_v52, %v2029_v26 }
 0x259   :  { %v2139_v51 = vpop.xlane.xlu1 %2138 }
 0x25a   :  { %v5247_v27 = vpop.xlane.xlu0 %1697  ;;  %v2185_v22 = vrot.slane %v2139_v51, %v5216_v18 }
 0x25c   :  { %v5254_v20 = vsel %vm1421_vm6, %v2185_v22, %v2181_v36 }
 0x25d   :  { %v2291_v40 = vpop.xlane.xlu1 %2290 }
 0x25e   :  { %v5251_v63 = vpop.xlane.xlu0 %1849  ;;  %v2337_v23 = vrot.slane %v2291_v40, %v5216_v18 }
 0x260   :  { %v5260_v34 = vsel %vm1421_vm6, %v2337_v23, %v2333_v41 }
 0x261   :  { %v2443_v13 = vpop.xlane.xlu1 %2442 }
 0x262   :  { %v5257_v50 = vpop.xlane.xlu0 %2001  ;;  %v2489_v19 = vrot.slane %v2443_v13, %v5216_v18  ;;  %v1743_v13 = vrot.slane %v5247_v27, %v5173_v6 }
 0x264   :  { %v5267_v43 = vsel %vm1421_vm6, %v2489_v19, %v2485_v30 }
 0x265   :  { %v2595_v10 = vpop.xlane.xlu1 %2594 }
 0x266   :  { %v5264_v57 = vpop.xlane.xlu0 %2153  ;;  %v2641_v39 = vrot.slane %v2595_v10, %v5216_v18 }
 0x268   :  { %v5276_v26 = vsel %vm1421_vm6, %v2641_v39, %v2637_v29 }
 0x269   :  { %v1376_v14 = vpop.xlane.xlu1 %1375 }
 0x26a   :  { %v5273_v31 = vpop.xlane.xlu0 %2305  ;;  %v1427_v9 = vrot.slane %v1376_v14, %v5271_v28 }
 0x26c   :  { %v5282_v38 = vsel %vm1428_vm7, %v1427_v9, %v1422_v11 }
 0x26d   :  { %v1536_v36 = vpop.xlane.xlu1 %1535 }
 0x26e   :  { %v5279_v24 = vpop.xlane.xlu0 %2457 }
 0x271   :  { %v1688_v55 = vpop.xlane.xlu1 %1687 }
 0x272   :  { %v5284_v61 = vpop.xlane.xlu0 %2609  ;;  %v1734_v46 = vrot.slane %v1688_v55, %v5271_v28 }
 0x274   :  { %v1735_v12 = vsel %vm1428_vm7, %v1734_v46, %v1730_v45  ;;  %v1895_v46 = vrot.slane %v5251_v63, %v5173_v6 }
 0x275   :  { %v5290_v60 = vpop.xlane.xlu1 %1839 }
 0x276   :  { %v5287_v3 = vpop.xlane.xlu0 %2761 }
 0x279   :  { %v1992_v58 = vpop.xlane.xlu1 %1991 }
 0x27a   :  { %v5292_v41 = vpop.xlane.xlu0 %1390  ;;  %v2038_v21 = vrot.slane %v1992_v58, %v5271_v28 }
 0x27c   :  { %v5296_v54 = vsel %vm1428_vm7, %v2038_v21, %v2034_v53  ;;  %v1582_v53 = vrot.slane %v1536_v36, %v5271_v28 }
 0x27d   :  { %v5298_v30 = vpop.xlane.xlu1 %2143 }
 0x27e   :  { %v1551_v2 = vpop.xlane.xlu0 %1550  ;;  %v1583_v14 = vsel %vm1428_vm7, %v1582_v53, %v5231_v49  ;;  %v1886_v49 = vrot.slane %v5290_v60, %v5271_v28  ;;  %v2047_v53 = vrot.slane %v5257_v50, %v5173_v6 }
 0x27f   :  { %v1596_v40 = vrot.slane %v1551_v2, %v5216_v18 }
 0x281   :  { %v5300_v33 = vpop.xlane.xlu1 %2295 }
 0x282   :  { %v1703_v8 = vpop.xlane.xlu0 %1702 }
 0x283   :  { %v1748_v36 = vrot.slane %v1703_v8, %v5216_v18 }
 0x285   :  { %v5302_v48 = vpop.xlane.xlu1 %2447 }
 0x286   :  { %v1855_v16 = vpop.xlane.xlu0 %1854 }
 0x287   :  { %v1900_v63 = vrot.slane %v1855_v16, %v5216_v18  ;;  %v1887_v16 = vsel %vm1428_vm7, %v1886_v49, %v5244_v59  ;;  %v2190_v59 = vrot.slane %v5298_v30, %v5271_v28 }
 0x289   :  { %v1541_v5 = vpop.xlane.xlu1 %1540 }
 0x28a   :  { %v5304_v11 = vpop.xlane.xlu0 %2006  ;;  %v1587_v1 = vrot.slane %v1541_v5, %v5170_v37 }
 0x28c   :  { %v1592_v51 = vsel %vm1414_vm5, %v1591_v56, %v1587_v1 }
 0x28d   :  { %v1693_v7 = vpop.xlane.xlu1 %1692  ;;  %v1597_v32 = vsel %vm1421_vm6, %v1596_v40, %v1592_v51 }
 0x28e   :  { %v5306_v29 = vpop.xlane.xlu0 %2158  ;;  %v1739_v22 = vrot.slane %v1693_v7, %v5170_v37 }
 0x290   :  { %v1744_v10 = vsel %vm1414_vm5, %v1743_v13, %v1739_v22 }
 0x291   :  { %v1845_v25 = vpop.xlane.xlu1 %1844  ;;  %v1749_v5 = vsel %vm1421_vm6, %v1748_v36, %v1744_v10 }
 0x292   :  { %v5308_v4 = vpop.xlane.xlu0 %2310  ;;  %v1891_v39 = vrot.slane %v1845_v25, %v5170_v37 }
 0x294   :  { %v1896_v8 = vsel %vm1414_vm5, %v1895_v46, %v1891_v39 }
 0x295   :  { %v1901_v60 = vsel %vm1421_vm6, %v1900_v63, %v1896_v8 }
 0x296   :  { %v5310_v0 = vpop.xlane.xlu0 %2462 }
 0x298   :  { %v1997_v47 = vpop.xlane.xlu1 %1996 }
 0x299   :  { %v2043_v7 = vrot.slane %v1997_v47, %v5170_v37 }
 0x29a   :  { %v5312_v35 = vpop.xlane.xlu0 %2614 }
 0x29b   :  { %v2048_v40 = vsel %vm1414_vm5, %v2047_v53, %v2043_v7 }
 0x29c   :  { %v2149_v45 = vpop.xlane.xlu1 %2148 }
 0x29d   :  { %v2195_v47 = vrot.slane %v2149_v45, %v5170_v37  ;;  %v1433_v45 = vrot.slane %v5237_v15, %v5170_v37 }
 0x29e   :  { %v5315_v42 = vpop.xlane.xlu0 %2766 }
 0x2a0   :  { %v5319_v52 = vpop.xlane.xlu1 %2300 }
 0x2a2   :  { %v1556_v23 = vpop.xlane.xlu0 %1555 }
 0x2a3   :  { %v1601_v19 = vrot.slane %v1556_v23, %v5271_v28 }
 0x2a4   :  { %v5328_v17 = vpop.xlane.xlu1 %2452 }
 0x2a5   :  { %v1602_v9 = vsel %vm1428_vm7, %v1601_v19, %v1597_v32  ;;  %v2199_v19 = vrot.slane %v5264_v57, %v5173_v6 }
 0x2a6   :  { %v1708_v27 = vpop.xlane.xlu0 %1707  ;;  %v1603_v55 = vsel %vm1449_vm8, %v1602_v9, %v1583_v14  ;;  %v2347_v9 = vrot.slane %v5319_v52, %v5170_v37  ;;  %v1442_v52 = vrot.slane %v5292_v41, %v5216_v18  ;;  %v2356_v41 = vrot.slane %v5308_v4, %v5216_v18 }
 0x2a7   :  { %v1753_v58 = vrot.slane %v1708_v27, %v5271_v28  ;;  %v1605_v21 = vsel %vm1452_vm9, %v1603_v55, 0.0  ;;  %v2200_v14 = vsel %vm1414_vm5, %v2199_v19, %v2195_v47  ;;  %v2204_v27 = vrot.slane %v5306_v29, %v5216_v18 }
 0x2a8   :  { %1606 = vadd.xlane.f32.xlu1 %v1605_v21  ;;  %v2351_v55 = vrot.slane %v5273_v31, %v5173_v6  ;;  %v2342_v21 = vrot.slane %v5300_v33, %v5271_v28  ;;  %v2191_v29 = vsel %vm1428_vm7, %v2190_v59, %v5254_v20  ;;  %v2499_v31 = vrot.slane %v5328_v17, %v5170_v37 }
 0x2a9   :  { %v1754_v25 = vsel %vm1428_vm7, %v1753_v58, %v1749_v5  ;;  %v2205_v49 = vsel %vm1421_vm6, %v2204_v27, %v2200_v14  ;;  %v2503_v20 = vrot.slane %v5279_v24, %v5173_v6 }
 0x2aa   :  { %v1860_v1 = vpop.xlane.xlu0 %1859  ;;  %v5352_v56 = vsel %vm1449_vm8, %v1754_v25, %v1735_v12  ;;  %v2052_v12 = vrot.slane %v5304_v11, %v5216_v18 }
 0x2ab   :  { %v1905_v51 = vrot.slane %v1860_v1, %v5271_v28  ;;  %v2504_v24 = vsel %vm1414_vm5, %v2503_v20, %v2499_v31 }
 0x2ac   :  { %v2053_v11 = vsel %vm1421_vm6, %v2052_v12, %v2048_v40  ;;  %v2343_v40 = vsel %vm1428_vm7, %v2342_v21, %v5260_v34  ;;  %v2655_v34 = vrot.slane %v5284_v61, %v5173_v6  ;;  %v1757_v61 = vsel %vm1452_vm9, %v5352_v56, 0.0 }
 0x2ad   :  { %v1906_v23 = vsel %vm1428_vm7, %v1905_v51, %v1901_v60  ;;  %v2494_v51 = vrot.slane %v5302_v48, %v5271_v28  ;;  %v2508_v48 = vrot.slane %v5310_v0, %v5216_v18 }
 0x2ae   :  { %v2012_v13 = vpop.xlane.xlu0 %2011  ;;  %v1907_v50 = vsel %vm1449_vm8, %v1906_v23, %v1887_v16 }
 0x2af   :  { %v2057_v32 = vrot.slane %v2012_v13, %v5271_v28  ;;  %v1909_v10 = vsel %vm1452_vm9, %v1907_v50, 0.0 }
 0x2b0   :  { %v5342_v2 = vpop.xlane.xlu1 %2604  ;;  %1910 = vadd.xlane.f32.xlu1 %v1909_v10  ;;  %v2509_v10 = vsel %vm1421_vm6, %v2508_v48, %v2504_v24 }
 0x2b1   :  { %v2058_v36 = vsel %vm1428_vm7, %v2057_v32, %v2053_v11  ;;  %v2651_v16 = vrot.slane %v5342_v2, %v5170_v37  ;;  %v2495_v32 = vsel %vm1428_vm7, %v2494_v51, %v5267_v43 }
 0x2b2   :  { %v2164_v15 = vpop.xlane.xlu0 %2163  ;;  %v2059_v30 = vsel %vm1449_vm8, %v2058_v36, %v5296_v54  ;;  %v2352_v54 = vsel %vm1414_vm5, %v2351_v55, %v2347_v9 }
 0x2b3   :  { %v2209_v58 = vrot.slane %v2164_v15, %v5271_v28  ;;  %v2357_v47 = vsel %vm1421_vm6, %v2356_v41, %v2352_v54  ;;  %v2656_v0 = vsel %vm1414_vm5, %v2655_v34, %v2651_v16  ;;  %v2812_v15 = vrot.slane %v5315_v42, %v5216_v18 }
 0x2b5   :  { %v2210_v7 = vsel %vm1428_vm7, %v2209_v58, %v2205_v49 }
 0x2b6   :  { %v5357_v22 = vpop.xlane.xlu1 %2756  ;;  %v2316_v25 = vpop.xlane.xlu0 %2315  ;;  %v2211_v33 = vsel %vm1449_vm8, %v2210_v7, %v2191_v29 }
 0x2b7   :  { %v2361_v1 = vrot.slane %v2316_v25, %v5271_v28  ;;  %v2213_v53 = vsel %vm1452_vm9, %v2211_v33, 0.0  ;;  %v2803_v19 = vrot.slane %v5357_v22, %v5170_v37  ;;  %v2660_v37 = vrot.slane %v5312_v35, %v5216_v18 }
 0x2b8   :  { %2214 = vadd.xlane.f32.xlu1 %v2213_v53 }
 0x2b9   :  { %v2362_v12 = vsel %vm1428_vm7, %v2361_v1, %v2357_v47  ;;  %v2661_v36 = vsel %vm1421_vm6, %v2660_v37, %v2656_v0 }
 0x2ba   :  { %v2468_v13 = vpop.xlane.xlu0 %2467 }
 0x2bb   :  { %v2513_v50 = vrot.slane %v2468_v13, %v5271_v28 }
 0x2bc   :  { %v1386_v39 = vpop.xlane.xlu1 %1385 }
 0x2bd   :  { %v1437_v57 = vrot.slane %v1386_v39, %v5173_v6  ;;  %v2514_v59 = vsel %vm1428_vm7, %v2513_v50, %v2509_v10  ;;  %v2807_v39 = vrot.slane %v5287_v3, %v5173_v6  ;;  %v2061_v3 = vsel %vm1452_vm9, %v2059_v30, 0.0 }
 0x2be   :  { %v2620_v22 = vpop.xlane.xlu0 %2619  ;;  %v2515_v11 = vsel %vm1449_vm8, %v2514_v59, %v2495_v32 }
 0x2bf   :  { %v1438_v46 = vsel %vm1414_vm5, %v1437_v57, %v1433_v45  ;;  %v2665_v14 = vrot.slane %v2620_v22, %v5271_v28  ;;  %v2517_v9 = vsel %vm1452_vm9, %v2515_v11, 0.0  ;;  %v2808_v57 = vsel %vm1414_vm5, %v2807_v39, %v2803_v19 }
 0x2c0   :  { %v1396_v5 = vpop.xlane.xlu1 %1395  ;;  %v1443_v63 = vsel %vm1421_vm6, %v1442_v52, %v1438_v46  ;;  %2518 = vadd.xlane.f32.xlu1 %v2517_v9  ;;  %v2813_v30 = vsel %vm1421_vm6, %v2812_v15, %v2808_v57 }
 0x2c1   :  { %v1447_v8 = vrot.slane %v1396_v5, %v5271_v28  ;;  %v2666_v27 = vsel %vm1428_vm7, %v2665_v14, %v2661_v36 }
 0x2c2   :  { %v2772_v46 = vpop.xlane.xlu0 %2771 }
 0x2c3   :  { %v1448_v17 = vsel %vm1428_vm7, %v1447_v8, %v1443_v63  ;;  %v2817_v52 = vrot.slane %v2772_v46, %v5271_v28 }
 0x2c4   :  { %v2600_v60 = vpop.xlane.xlu1 %2599  ;;  %v1450_v4 = vsel %vm1449_vm8, %v1448_v17, %v5282_v38  ;;  %v2363_v38 = vsel %vm1449_vm8, %v2362_v12, %v2343_v40 }
 0x2c5   :  { %v1453_v23 = vsel %vm1452_vm9, %v1450_v4, 0.0  ;;  %v2646_v45 = vrot.slane %v2600_v60, %v5271_v28  ;;  %v2818_v5 = vsel %vm1428_vm7, %v2817_v52, %v2813_v30  ;;  %v3048_v4 = vld [vmem:[%s5496_s4] ss:$0 sm:$0xff] }
 0x2c6   :  { %1454 = vadd.xlane.f32.xlu0 %v1453_v23 }
 0x2c7   :  { %v2647_v35 = vsel %vm1428_vm7, %v2646_v45, %v5276_v26  ;;  %v2365_v26 = vsel %vm1452_vm9, %v2363_v38, 0.0 }
 0x2c8   :  { %v2747_v2 = vpop.xlane.xlu1 %2746  ;;  %v2667_v58 = vsel %vm1449_vm8, %v2666_v27, %v2647_v35 }
 0x2c9   :  { %v2793_v43 = vrot.slane %v2747_v2, %v5216_v18 }
 0x2ca   :  { %1758 = vadd.xlane.f32.xlu0 %v1757_v61 }
 0x2cb   :  { %v2794_v55 = vsel %vm1421_vm6, %v2793_v43, %v5234_v62  ;;  %v2669_v62 = vsel %vm1452_vm9, %v2667_v58, 0.0 }
 0x2cc   :  { %v2752_v56 = vpop.xlane.xlu1 %2751 }
 0x2cd   :  { %v2798_v6 = vrot.slane %v2752_v56, %v5271_v28 }
 0x2ce   :  { %2062 = vadd.xlane.f32.xlu0 %v2061_v3 }
 0x2cf   :  { %v2799_v21 = vsel %vm1428_vm7, %v2798_v6, %v2794_v55 }
 0x2d0   :  { %v2819_v18 = vsel %vm1449_vm8, %v2818_v5, %v2799_v21 }
 0x2d1   :  { %v2821_v42 = vsel %vm1452_vm9, %v2819_v18, 0.0 }
 0x2d2   :  { %2366 = vadd.xlane.f32.xlu0 %v2365_v26  ;;  %2822 = vadd.xlane.f32.xlu1 %v2821_v42 }
 0x2d6   :  { %2670 = vadd.xlane.f32.xlu0 %v2669_v62 }
 0x335   :  { %v1607_v29 = vpop.xlane.xlu1 %1606 }
 0x33d   :  { %v1911_v8 = vpop.xlane.xlu1 %1910 }
 0x345   :  { %v2215_v33 = vpop.xlane.xlu1 %2214 }
 0x34d   :  { %v2519_v53 = vpop.xlane.xlu1 %2518 }
 0x353   :  { %v1455_v28 = vpop.xlane.xlu0 %1454 }
 0x354   :  { %v1459_v49 = vsel %vm1456_vm10, %v1455_v28, 0.0 }
 0x355   :  { %v1611_v54 = vsel %vm1608_vm11, %v1607_v29, %v1459_v49 }
 0x357   :  { %v1759_v31 = vpop.xlane.xlu0 %1758 }
 0x358   :  { %v1763_v7 = vsel %vm1760_vm12, %v1759_v31, %v1611_v54 }
 0x359   :  { %v1915_v25 = vsel %vm1912_vm13, %v1911_v8, %v1763_v7 }
 0x35b   :  { %v2063_v41 = vpop.xlane.xlu0 %2062 }
 0x35c   :  { %v2067_v63 = vsel %vm2064_vm14, %v2063_v41, %v1915_v25 }
 0x35d   :  { %v2219_v1 = vsel %vm2216_vm15, %v2215_v33, %v2067_v63 }
 0x35f   :  { %v2367_v20 = vpop.xlane.xlu0 %2366  ;;  %v2823_v40 = vpop.xlane.xlu1 %2822 }
 0x360   :  { %v2371_v17 = vsel %vm2368_vm0, %v2367_v20, %v2219_v1 }
 0x361   :  { %v2523_v60 = vsel %vm2520_vm1, %v2519_v53, %v2371_v17 }
 0x363   :  { %v2671_v51 = vpop.xlane.xlu0 %2670 }
 0x364   :  { %v2675_v47 = vsel %vm2672_vm2, %v2671_v51, %v2523_v60 }
 0x365   :  { %v2827_v24 = vsel %vm2824_vm3, %v2823_v40, %v2675_v47 }
 0x366   :  { %v2835_v16 = vadd.f32 %v3048_v4, %v2827_v24 }
 0x368   :  { %2836 = vst [vmem:[#allocation7] sm:$0x3] %v2835_v16 }
 0x369   :  { %3277 = shalt.err (!%p3274_p12)
}
 0x36a   :  { %s3278_s23 = scalar_lea.hbm %s5497_s5, 32 }
 0x36b   :  { %p3279_p13 = scmp.ne.s32.totalorder %s5497_s5, %s3278_s23  ;;  %p3282_p0 = scmp.lt.u32.totalorder %s3278_s23, %s5497_s5 }
 0x36d   :  { %p3284_p1 = pnand %p3282_p0, %p3279_p13 }
 0x36f   :  { %3287 = shalt.err (!%p3284_p1)
}
 0x370   :  { %2846 = dma.vmem_to_hbm [thread:$0]  %s2844_s20, 32, %s5497_s5, [#allocation6]  }
 0x371   :  { %3290 = dma.done.wait [#allocation6], 32  }
 0x372   :  { %3291 = vsyncadd [#allocation6], 4294967264 }
 0x373   :  { %2850 = vsyncpa [#allocation5], 1 }
 0x374   :  { %2851 = vsyncpa [#allocation6], 1 }

</bundles_post_ra>
